<compile_context>
chip_gen: v7x
topology: tpu7x:2x2x1
jax: 0.10.0
libtpu: 0.0.40
codegen_flags: <defaults>
</compile_context>

<pallas_src>
import jax
import jax.numpy as jnp
from jax.experimental import pallas as pl
from jax.experimental.pallas import tpu as pltpu


def decoder_kernel(
    # inputs (all resident VMEM blocks)
    emb_ref, mask_ref, h0_ref, c0_ref,
    we_ref, wf_ref, wh_ref, b_ref,
    wk_t_ref, bk_ref,
    wc_h_ref, wc_s_ref, bc_ref,
    wp_t_ref, bp_ref,
    # outputs
    pred_ref, h_out_ref, c_out_ref,
    # scratch
    hid_sc, key_sc,
):
    T, B, H = hid_sc.shape  # static

    # Zero the history buffers once: future (masked) positions get exactly
    # zero softmax weight, but uninitialized VMEM could contain NaNs which
    # would contaminate the weighted sum (NaN * 0 = NaN).
    hid_sc[...] = jnp.zeros_like(hid_sc)
    key_sc[...] = jnp.zeros_like(key_sc)

    # Hoisted loop invariants.
    mask_neg = mask_ref[...] * (-99999.0)                        # (T, B)
    time_idx = jax.lax.broadcasted_iota(jnp.int32, (T, B), 0)    # (T, B)
    neg_inf = jnp.float32(-jnp.inf)

    def step(t, carry):
        h, c, feed = carry

        # ---- LSTM cell (PyTorch gate order i, f, g, o), concat-free ------
        emb = emb_ref[t]                                          # (B, E)
        gates = (
            jnp.dot(emb, we_ref[...], preferred_element_type=jnp.float32)
            + jnp.dot(feed, wf_ref[...], preferred_element_type=jnp.float32)
            + jnp.dot(h, wh_ref[...], preferred_element_type=jnp.float32)
            + b_ref[...]
        )                                                         # (B, 4H)
        i_g = jax.nn.sigmoid(gates[:, 0:H])
        f_g = jax.nn.sigmoid(gates[:, H:2 * H])
        g_g = jnp.tanh(gates[:, 2 * H:3 * H])
        o_g = jax.nn.sigmoid(gates[:, 3 * H:4 * H])
        c_new = f_g * c + i_g * g_g
        h_new = o_g * jnp.tanh(c_new)                             # (B, H)

        # ---- self-attention over hidden history (cached key projections) -
        hid_sc[t] = h_new
        key_sc[t] = (
            jnp.dot(h_new, wk_t_ref[...], preferred_element_type=jnp.float32)
            + bk_ref[...]
        )

        scores = jnp.sum(key_sc[...] * h_new[None, :, :], axis=2)  # (T, B)
        # pad mask + causal mask fused into a single select
        scores = jnp.where(time_idx <= t, scores + mask_neg, neg_inf)
        m = jnp.max(scores, axis=0, keepdims=True)
        e = jnp.exp(scores - m)
        denom = jnp.sum(e, axis=0, keepdims=True)
        dist = e * pl.reciprocal(denom, approx=True)              # softmax over time
        summary = jnp.sum(hid_sc[...] * dist[:, :, None], axis=0)  # (B, H)

        # ---- combine (split weight, concat-free) + predict ---------------
        comb = (
            jnp.dot(h_new, wc_h_ref[...], preferred_element_type=jnp.float32)
            + jnp.dot(summary, wc_s_ref[...], preferred_element_type=jnp.float32)
            + bc_ref[...]
        )                                                         # (B, H)
        pred_ref[t] = (
            jnp.dot(comb, wp_t_ref[...], preferred_element_type=jnp.float32)
            + bp_ref[...]
        )                                                         # (B, V)
        return (h_new, c_new, comb)

    h_f, c_f, _ = jax.lax.fori_loop(
        0, T, step,
        (h0_ref[...], c0_ref[...], jnp.zeros((B, H), jnp.float32)),
        unroll=True,   # short, fixed trip count -> give the scheduler visibility
    )
    h_out_ref[...] = h_f
    c_out_ref[...] = c_f


def prepare_params(params):
    """One-time weight prep (hoisted out of the per-call path)."""
    H = params["w_hh"].shape[1]
    E = params["w_ih"].shape[1] - H
    return {
        "we": jnp.asarray(params["w_ih"][:, :E].T),        # (E, 4H)
        "wf": jnp.asarray(params["w_ih"][:, E:].T),        # (H, 4H)
        "wh": jnp.asarray(params["w_hh"].T),               # (H, 4H)
        "b": (params["b_ih"] + params["b_hh"]).reshape(1, -1),   # (1, 4H)
        "wk_t": jnp.asarray(params["wk"].T),               # (H, H)
        "bk": params["bk"].reshape(1, -1),                 # (1, H)
        "wc_h": jnp.asarray(params["wc"][:, :H].T),        # (H, H)
        "wc_s": jnp.asarray(params["wc"][:, H:].T),        # (H, H)
        "bc": params["bc"].reshape(1, -1),                 # (1, H)
        "wp_t": jnp.asarray(params["wp"].T),               # (H, V)
        "bp": params["bp"].reshape(1, -1),                 # (1, V)
    }


@jax.jit
def decoder_forward(emb_seq, mask_seq, h0, c0, prep):
    """Full teacher-forced decode. Returns (preds[T,B,V], (h,c))."""
    T, B, E = emb_seq.shape
    H = h0.shape[-1]
    V = prep["wp_t"].shape[1]

    def full_spec(shape):
        nd = len(shape)
        return pl.BlockSpec(shape, lambda i, _nd=nd: (0,) * _nd)

    in_arrays = [
        emb_seq, mask_seq, h0, c0,
        prep["we"], prep["wf"], prep["wh"], prep["b"],
        prep["wk_t"], prep["bk"],
        prep["wc_h"], prep["wc_s"], prep["bc"],
        prep["wp_t"], prep["bp"],
    ]
    in_specs = [full_spec(tuple(a.shape)) for a in in_arrays]
    out_specs = [
        full_spec((T, B, V)),   # resident preds block, written back to HBM once
        full_spec((B, H)),      # final h
        full_spec((B, H)),      # final c
    ]
    out_shape = (
        jax.ShapeDtypeStruct((T, B, V), jnp.float32),
        jax.ShapeDtypeStruct((B, H), jnp.float32),
        jax.ShapeDtypeStruct((B, H), jnp.float32),
    )
    scratch_shapes = [
        pltpu.VMEM((T, B, H), jnp.float32),     # hidden-state history
        pltpu.VMEM((T, B, H), jnp.float32),     # cached key projections
    ]

    preds, h_f, c_f = pl.pallas_call(
        decoder_kernel,
        out_shape=out_shape,
        grid_spec=pltpu.PrefetchScalarGridSpec(
            num_scalar_prefetch=0,
            grid=(1,),                     # single step: recurrence lives in-kernel
            in_specs=in_specs,
            out_specs=out_specs,
            scratch_shapes=scratch_shapes,
        ),
        compiler_params=pltpu.CompilerParams(
            dimension_semantics=("arbitrary",)),
    )(*in_arrays)
    # PyTorch returns rnn_state as (h, c), each (n_layers=1, B, H)
    return preds, (h_f[None], c_f[None])


# ----------------------------- pure-JAX reference -----------------------------
def ref_forward(emb_seq, mask_seq, h0, c0, p):
    T, B, _ = emb_seq.shape
    H = h0.shape[-1]
    feed = jnp.zeros((B, H), jnp.float32)
    h, c = h0, c0
    hiddens, preds = [], []
    for t in range(T):
        inp = jnp.concatenate([emb_seq[t], feed], axis=1)
        gates = inp @ p["w_ih"].T + p["b_ih"] + h @ p["w_hh"].T + p["b_hh"]
        i_g = jax.nn.sigmoid(gates[:, :H])
        f_g = jax.nn.sigmoid(gates[:, H:2 * H])
        g_g = jnp.tanh(gates[:, 2 * H:3 * H])
        o_g = jax.nn.sigmoid(gates[:, 3 * H:])
        c = f_g * c + i_g * g_g
        h = o_g * jnp.tanh(c)
        hiddens.append(h)
        feats = jnp.stack(hiddens, axis=0)                       # (t+1, B, H)
        key = feats @ p["wk"].T + p["bk"]
        scores = jnp.sum(key * h[None], axis=2) + mask_seq[: t + 1] * -99999.0
        dist = jax.nn.softmax(scores, axis=0)
        summary = jnp.sum(feats * dist[:, :, None], axis=0)
        all_f = jnp.concatenate([h, summary], axis=1)
        comb = all_f @ p["wc"].T + p["bc"]
        preds.append(comb @ p["wp"].T + p["bp"])
        feed = comb
    return jnp.stack(preds), h, c


if __name__ == "__main__":
    # small config consistent with Decoder(vocab, n_embed, n_hidden, n_layers=1,
    # self_attention=True, copy=False, dropout=0)
    V, E, H = 16, 16, 32          # len(vocab), n_embed, n_hidden
    T, B = 6, 4                   # max_len, batch
    PAD = 0                       # vocab.pad()

    key = jax.random.PRNGKey(0)
    ks = jax.random.split(key, 16)

    def init(k, shape, scale=0.1):
        return jax.random.uniform(k, shape, jnp.float32, -scale, scale)

    # nn.Embedding(len(vocab), n_embed, padding_idx=pad) -> pad row is zero
    embed_table = init(ks[0], (V, E)).at[PAD].set(0.0)
    params = {
        "w_ih": init(ks[1], (4 * H, E + H)),   # rnn.weight_ih_l0
        "b_ih": init(ks[2], (4 * H,)),
        "w_hh": init(ks[3], (4 * H, H)),       # rnn.weight_hh_l0
        "b_hh": init(ks[4], (4 * H,)),
        "wk": init(ks[5], (H, H)),             # self-attention make_key
        "bk": init(ks[6], (H,)),
        "wc": init(ks[7], (H, 2 * H)),         # combine (hidden + 1 attention summary)
        "bc": init(ks[8], (H,)),
        "wp": init(ks[9], (V, H)),             # predict
        "bp": init(ks[10], (V,)),
    }

    ref_tokens = jax.random.randint(ks[11], (T, B), 0, V)        # may include pad
    h0 = init(ks[12], (B, H))
    c0 = init(ks[13], (B, H))

    # glue: embedding gather + pad mask (kept outside the kernel)
    emb_seq = embed_table[ref_tokens]                            # (T, B, E)
    mask_seq = (ref_tokens == PAD).astype(jnp.float32)           # (T, B)

    prep = prepare_params(params)                                # one-time weight prep
    preds, (h_f, c_f) = decoder_forward(emb_seq, mask_seq, h0, c0, prep)
    jax.block_until_ready(preds)

    preds_ref, h_ref, c_ref = ref_forward(emb_seq, mask_seq, h0, c0, params)
    # tolerance relaxed slightly for the approx (EUP) softmax reciprocal
    assert jnp.allclose(preds, preds_ref, atol=2e-3, rtol=2e-3)
    assert jnp.allclose(h_f[0], h_ref, atol=2e-3, rtol=2e-3)
    assert jnp.allclose(c_f[0], c_ref, atol=2e-3, rtol=2e-3)

    print("KERNEL_OK")
</pallas_src>

<mosaic_0001>
module attributes {stable_mosaic.version = 11 : i64} {
  func.func @decoder_kernel(%arg0: i32, %arg1: memref<6x4x16xf32, #tpu.memory_space<vmem>>, %arg2: memref<6x4xf32, #tpu.memory_space<vmem>>, %arg3: memref<4x32xf32, #tpu.memory_space<vmem>>, %arg4: memref<4x32xf32, #tpu.memory_space<vmem>>, %arg5: memref<16x128xf32, #tpu.memory_space<vmem>>, %arg6: memref<32x128xf32, #tpu.memory_space<vmem>>, %arg7: memref<32x128xf32, #tpu.memory_space<vmem>>, %arg8: memref<1x128xf32, #tpu.memory_space<vmem>>, %arg9: memref<32x32xf32, #tpu.memory_space<vmem>>, %arg10: memref<1x32xf32, #tpu.memory_space<vmem>>, %arg11: memref<32x32xf32, #tpu.memory_space<vmem>>, %arg12: memref<32x32xf32, #tpu.memory_space<vmem>>, %arg13: memref<1x32xf32, #tpu.memory_space<vmem>>, %arg14: memref<32x16xf32, #tpu.memory_space<vmem>>, %arg15: memref<1x16xf32, #tpu.memory_space<vmem>>, %arg16: memref<6x4x16xf32, #tpu.memory_space<vmem>>, %arg17: memref<4x32xf32, #tpu.memory_space<vmem>>, %arg18: memref<4x32xf32, #tpu.memory_space<vmem>>, %arg19: memref<6x4x32xf32, #tpu.memory_space<vmem>>, %arg20: memref<6x4x32xf32, #tpu.memory_space<vmem>>) attributes {dimension_semantics = [#tpu.dimension_semantics<arbitrary>], iteration_bounds = array<i64: 1>, scalar_prefetch = 0 : i64, scratch_operands = 2 : i64, tpu.core_type = #tpu.core_type<tc>, window_params = [{pipeline_mode = #tpu.pipeline_mode<synchronous>, transform_indices = @transform_0, window_bounds = array<i64: 6, 4, 16>}, {pipeline_mode = #tpu.pipeline_mode<synchronous>, transform_indices = @transform_1, window_bounds = array<i64: 6, 4>}, {pipeline_mode = #tpu.pipeline_mode<synchronous>, transform_indices = @transform_2, window_bounds = array<i64: 4, 32>}, {pipeline_mode = #tpu.pipeline_mode<synchronous>, transform_indices = @transform_3, window_bounds = array<i64: 4, 32>}, {pipeline_mode = #tpu.pipeline_mode<synchronous>, transform_indices = @transform_4, window_bounds = array<i64: 16, 128>}, {pipeline_mode = #tpu.pipeline_mode<synchronous>, transform_indices = @transform_5, window_bounds = array<i64: 32, 128>}, {pipeline_mode = #tpu.pipeline_mode<synchronous>, transform_indices = @transform_6, window_bounds = array<i64: 32, 128>}, {pipeline_mode = #tpu.pipeline_mode<synchronous>, transform_indices = @transform_7, window_bounds = array<i64: 1, 128>}, {pipeline_mode = #tpu.pipeline_mode<synchronous>, transform_indices = @transform_8, window_bounds = array<i64: 32, 32>}, {pipeline_mode = #tpu.pipeline_mode<synchronous>, transform_indices = @transform_9, window_bounds = array<i64: 1, 32>}, {pipeline_mode = #tpu.pipeline_mode<synchronous>, transform_indices = @transform_10, window_bounds = array<i64: 32, 32>}, {pipeline_mode = #tpu.pipeline_mode<synchronous>, transform_indices = @transform_11, window_bounds = array<i64: 32, 32>}, {pipeline_mode = #tpu.pipeline_mode<synchronous>, transform_indices = @transform_12, window_bounds = array<i64: 1, 32>}, {pipeline_mode = #tpu.pipeline_mode<synchronous>, transform_indices = @transform_13, window_bounds = array<i64: 32, 16>}, {pipeline_mode = #tpu.pipeline_mode<synchronous>, transform_indices = @transform_14, window_bounds = array<i64: 1, 16>}, {pipeline_mode = #tpu.pipeline_mode<synchronous>, transform_indices = @transform_15, window_bounds = array<i64: 6, 4, 16>}, {pipeline_mode = #tpu.pipeline_mode<synchronous>, transform_indices = @transform_16, window_bounds = array<i64: 4, 32>}, {pipeline_mode = #tpu.pipeline_mode<synchronous>, transform_indices = @transform_17, window_bounds = array<i64: 4, 32>}]} {
    %cst = arith.constant 0.000000e+00 : f32
    %0 = vector.broadcast %cst : f32 to vector<6x4x32xf32>
    %c0 = arith.constant 0 : index
    %c0_0 = arith.constant 0 : index
    %c0_1 = arith.constant 0 : index
    %1 = vector.load %arg19[%c0, %c0_0, %c0_1] : memref<6x4x32xf32, #tpu.memory_space<vmem>>, vector<6x4x32xf32>
    tpu.vector_store %arg19[%c0, %c0_0, %c0_1], %0 {strides = array<i32>} : memref<6x4x32xf32, #tpu.memory_space<vmem>>, vector<6x4x32xf32>,
    %cst_2 = arith.constant 0.000000e+00 : f32
    %2 = vector.broadcast %cst_2 : f32 to vector<6x4x32xf32>
    %c0_3 = arith.constant 0 : index
    %c0_4 = arith.constant 0 : index
    %c0_5 = arith.constant 0 : index
    %3 = vector.load %arg20[%c0_3, %c0_4, %c0_5] : memref<6x4x32xf32, #tpu.memory_space<vmem>>, vector<6x4x32xf32>
    tpu.vector_store %arg20[%c0_3, %c0_4, %c0_5], %2 {strides = array<i32>} : memref<6x4x32xf32, #tpu.memory_space<vmem>>, vector<6x4x32xf32>,
    %c0_6 = arith.constant 0 : index
    %c0_7 = arith.constant 0 : index
    %4 = vector.load %arg2[%c0_6, %c0_7] : memref<6x4xf32, #tpu.memory_space<vmem>>, vector<6x4xf32>
    %cst_8 = arith.constant -9.999900e+04 : f32
    %5 = vector.broadcast %cst_8 : f32 to vector<6x4xf32>
    %6 = arith.mulf %4, %5 : vector<6x4xf32>
    %7 = tpu.iota {dimensions = array<i32: 0>} : vector<6x4xi32>
    %c0_9 = arith.constant 0 : index
    %c0_10 = arith.constant 0 : index
    %8 = vector.load %arg3[%c0_9, %c0_10] : memref<4x32xf32, #tpu.memory_space<vmem>>, vector<4x32xf32>
    %c0_11 = arith.constant 0 : index
    %c0_12 = arith.constant 0 : index
    %9 = vector.load %arg4[%c0_11, %c0_12] : memref<4x32xf32, #tpu.memory_space<vmem>>, vector<4x32xf32>
    %cst_13 = arith.constant 0.000000e+00 : f32
    %10 = vector.broadcast %cst_13 : f32 to vector<4x32xf32>
    %cst_14 = arith.constant 0xFF800000 : f32
    %c0_i32 = arith.constant 0 : i32
    %11 = arith.index_cast %c0_i32 : i32 to index
    %c0_15 = arith.constant 0 : index
    %c0_16 = arith.constant 0 : index
    %12 = vector.load %arg1[%11, %c0_15, %c0_16] : memref<6x4x16xf32, #tpu.memory_space<vmem>>, vector<1x4x16xf32>
    %13 = vector.shape_cast %12 : vector<1x4x16xf32> to vector<4x16xf32>
    %c0_17 = arith.constant 0 : index
    %c0_18 = arith.constant 0 : index
    %14 = vector.load %arg5[%c0_17, %c0_18] : memref<16x128xf32, #tpu.memory_space<vmem>>, vector<16x128xf32>
    %cst_19 = arith.constant dense<0.000000e+00> : vector<4x128xf32>
    %15 = tpu.matmul %13, %14, %cst_19 {dimension_numbers = #tpu.dot_dimension_numbers<[1], [0], [0], [1], [0, 0, 1, 1], [], []>} : vector<4x16xf32>, vector<16x128xf32>, vector<4x128xf32> -> vector<4x128xf32>
    %c0_20 = arith.constant 0 : index
    %c0_21 = arith.constant 0 : index
    %16 = vector.load %arg6[%c0_20, %c0_21] : memref<32x128xf32, #tpu.memory_space<vmem>>, vector<32x128xf32>
    %cst_22 = arith.constant dense<0.000000e+00> : vector<4x128xf32>
    %17 = tpu.matmul %10, %16, %cst_22 {dimension_numbers = #tpu.dot_dimension_numbers<[1], [0], [0], [1], [0, 0, 1, 1], [], []>} : vector<4x32xf32>, vector<32x128xf32>, vector<4x128xf32> -> vector<4x128xf32>
    %18 = arith.addf %15, %17 : vector<4x128xf32>
    %c0_23 = arith.constant 0 : index
    %c0_24 = arith.constant 0 : index
    %19 = vector.load %arg7[%c0_23, %c0_24] : memref<32x128xf32, #tpu.memory_space<vmem>>, vector<32x128xf32>
    %cst_25 = arith.constant dense<0.000000e+00> : vector<4x128xf32>
    %20 = tpu.matmul %8, %19, %cst_25 {dimension_numbers = #tpu.dot_dimension_numbers<[1], [0], [0], [1], [0, 0, 1, 1], [], []>} : vector<4x32xf32>, vector<32x128xf32>, vector<4x128xf32> -> vector<4x128xf32>
    %21 = arith.addf %18, %20 : vector<4x128xf32>
    %c0_26 = arith.constant 0 : index
    %c0_27 = arith.constant 0 : index
    %22 = vector.load %arg8[%c0_26, %c0_27] : memref<1x128xf32, #tpu.memory_space<vmem>>, vector<1x128xf32>
    %23 = vector.broadcast %22 : vector<1x128xf32> to vector<4x128xf32>
    %24 = arith.addf %21, %23 : vector<4x128xf32>
    %25 = vector.extract_strided_slice %24 {offsets = [0, 0], sizes = [4, 32], strides = [1, 1]} : vector<4x128xf32> to vector<4x32xf32>
    %26 = arith.negf %25 : vector<4x32xf32>
    %27 = math.exp %26 : vector<4x32xf32>
    %cst_28 = arith.constant 1.000000e+00 : f32
    %28 = vector.broadcast %cst_28 : f32 to vector<4x32xf32>
    %29 = arith.addf %28, %27 : vector<4x32xf32>
    %30 = arith.divf %28, %29 : vector<4x32xf32>
    %31 = vector.extract_strided_slice %24 {offsets = [0, 32], sizes = [4, 32], strides = [1, 1]} : vector<4x128xf32> to vector<4x32xf32>
    %32 = arith.negf %31 : vector<4x32xf32>
    %33 = math.exp %32 : vector<4x32xf32>
    %cst_29 = arith.constant 1.000000e+00 : f32
    %34 = vector.broadcast %cst_29 : f32 to vector<4x32xf32>
    %35 = arith.addf %34, %33 : vector<4x32xf32>
    %36 = arith.divf %34, %35 : vector<4x32xf32>
    %37 = vector.extract_strided_slice %24 {offsets = [0, 64], sizes = [4, 32], strides = [1, 1]} : vector<4x128xf32> to vector<4x32xf32>
    %38 = math.tanh %37 : vector<4x32xf32>
    %39 = vector.extract_strided_slice %24 {offsets = [0, 96], sizes = [4, 32], strides = [1, 1]} : vector<4x128xf32> to vector<4x32xf32>
    %40 = arith.negf %39 : vector<4x32xf32>
    %41 = math.exp %40 : vector<4x32xf32>
    %cst_30 = arith.constant 1.000000e+00 : f32
    %42 = vector.broadcast %cst_30 : f32 to vector<4x32xf32>
    %43 = arith.addf %42, %41 : vector<4x32xf32>
    %44 = arith.divf %42, %43 : vector<4x32xf32>
    %45 = arith.mulf %36, %9 : vector<4x32xf32>
    %46 = arith.mulf %30, %38 : vector<4x32xf32>
    %47 = arith.addf %45, %46 : vector<4x32xf32>
    %48 = math.tanh %47 : vector<4x32xf32>
    %49 = arith.mulf %44, %48 : vector<4x32xf32>
    %50 = arith.index_cast %c0_i32 : i32 to index
    %c0_31 = arith.constant 0 : index
    %c0_32 = arith.constant 0 : index
    %51 = vector.load %arg19[%50, %c0_31, %c0_32] : memref<6x4x32xf32, #tpu.memory_space<vmem>>, vector<1x4x32xf32>
    %52 = vector.shape_cast %51 : vector<1x4x32xf32> to vector<4x32xf32>
    %53 = vector.shape_cast %49 : vector<4x32xf32> to vector<1x4x32xf32>
    tpu.vector_store %arg19[%50, %c0_31, %c0_32], %53 {strides = array<i32>} : memref<6x4x32xf32, #tpu.memory_space<vmem>>, vector<1x4x32xf32>,
    %c0_33 = arith.constant 0 : index
    %c0_34 = arith.constant 0 : index
    %54 = vector.load %arg9[%c0_33, %c0_34] : memref<32x32xf32, #tpu.memory_space<vmem>>, vector<32x32xf32>
    %cst_35 = arith.constant dense<0.000000e+00> : vector<4x32xf32>
    %55 = tpu.matmul %49, %54, %cst_35 {dimension_numbers = #tpu.dot_dimension_numbers<[1], [0], [0], [1], [0, 0, 1, 1], [], []>} : vector<4x32xf32>, vector<32x32xf32>, vector<4x32xf32> -> vector<4x32xf32>
    %c0_36 = arith.constant 0 : index
    %c0_37 = arith.constant 0 : index
    %56 = vector.load %arg10[%c0_36, %c0_37] : memref<1x32xf32, #tpu.memory_space<vmem>>, vector<1x32xf32>
    %57 = vector.broadcast %56 : vector<1x32xf32> to vector<4x32xf32>
    %58 = arith.addf %55, %57 : vector<4x32xf32>
    %59 = arith.index_cast %c0_i32 : i32 to index
    %c0_38 = arith.constant 0 : index
    %c0_39 = arith.constant 0 : index
    %60 = vector.load %arg20[%59, %c0_38, %c0_39] : memref<6x4x32xf32, #tpu.memory_space<vmem>>, vector<1x4x32xf32>
    %61 = vector.shape_cast %60 : vector<1x4x32xf32> to vector<4x32xf32>
    %62 = vector.shape_cast %58 : vector<4x32xf32> to vector<1x4x32xf32>
    tpu.vector_store %arg20[%59, %c0_38, %c0_39], %62 {strides = array<i32>} : memref<6x4x32xf32, #tpu.memory_space<vmem>>, vector<1x4x32xf32>,
    %c0_40 = arith.constant 0 : index
    %c0_41 = arith.constant 0 : index
    %c0_42 = arith.constant 0 : index
    %63 = vector.load %arg20[%c0_40, %c0_41, %c0_42] : memref<6x4x32xf32, #tpu.memory_space<vmem>>, vector<6x4x32xf32>
    %64 = vector.shape_cast %49 : vector<4x32xf32> to vector<1x4x32xf32>
    %65 = vector.broadcast %64 : vector<1x4x32xf32> to vector<6x4x32xf32>
    %66 = arith.mulf %63, %65 : vector<6x4x32xf32>
    %cst_43 = arith.constant dense<0.000000e+00> : vector<6x4xf32>
    %67 = vector.multi_reduction <add>, %66, %cst_43 [2] : vector<6x4x32xf32> to vector<6x4xf32>
    %68 = vector.broadcast %c0_i32 : i32 to vector<6x4xi32>
    %69 = arith.cmpi sle, %7, %68 : vector<6x4xi32>
    %70 = arith.addf %67, %6 : vector<6x4xf32>
    %71 = vector.broadcast %cst_14 : f32 to vector<6x4xf32>
    %72 = arith.select %69, %70, %71 : vector<6x4xi1>, vector<6x4xf32>
    %cst_44 = arith.constant dense<0xFF800000> : vector<4xf32>
    %73 = vector.multi_reduction <maximumf>, %72, %cst_44 [0] : vector<6x4xf32> to vector<4xf32>
    %74 = vector.shape_cast %73 : vector<4xf32> to vector<1x4xf32>
    %75 = vector.broadcast %74 : vector<1x4xf32> to vector<6x4xf32>
    %76 = arith.subf %72, %75 : vector<6x4xf32>
    %77 = math.exp %76 : vector<6x4xf32>
    %cst_45 = arith.constant dense<0.000000e+00> : vector<4xf32>
    %78 = vector.multi_reduction <add>, %77, %cst_45 [0] : vector<6x4xf32> to vector<4xf32>
    %79 = vector.shape_cast %78 : vector<4xf32> to vector<1x4xf32>
    %80 = tpu.reciprocal %79 {approx = true} : vector<1x4xf32> -> vector<1x4xf32>
    %81 = vector.broadcast %80 : vector<1x4xf32> to vector<6x4xf32>
    %82 = arith.mulf %77, %81 : vector<6x4xf32>
    %c0_46 = arith.constant 0 : index
    %c0_47 = arith.constant 0 : index
    %c0_48 = arith.constant 0 : index
    %83 = vector.load %arg19[%c0_46, %c0_47, %c0_48] : memref<6x4x32xf32, #tpu.memory_space<vmem>>, vector<6x4x32xf32>
    %84 = vector.shape_cast %82 : vector<6x4xf32> to vector<6x4x1xf32>
    %85 = vector.broadcast %84 : vector<6x4x1xf32> to vector<6x4x32xf32>
    %86 = arith.mulf %83, %85 : vector<6x4x32xf32>
    %cst_49 = arith.constant dense<0.000000e+00> : vector<4x32xf32>
    %87 = vector.multi_reduction <add>, %86, %cst_49 [0] : vector<6x4x32xf32> to vector<4x32xf32>
    %c0_50 = arith.constant 0 : index
    %c0_51 = arith.constant 0 : index
    %88 = vector.load %arg11[%c0_50, %c0_51] : memref<32x32xf32, #tpu.memory_space<vmem>>, vector<32x32xf32>
    %cst_52 = arith.constant dense<0.000000e+00> : vector<4x32xf32>
    %89 = tpu.matmul %49, %88, %cst_52 {dimension_numbers = #tpu.dot_dimension_numbers<[1], [0], [0], [1], [0, 0, 1, 1], [], []>} : vector<4x32xf32>, vector<32x32xf32>, vector<4x32xf32> -> vector<4x32xf32>
    %c0_53 = arith.constant 0 : index
    %c0_54 = arith.constant 0 : index
    %90 = vector.load %arg12[%c0_53, %c0_54] : memref<32x32xf32, #tpu.memory_space<vmem>>, vector<32x32xf32>
    %cst_55 = arith.constant dense<0.000000e+00> : vector<4x32xf32>
    %91 = tpu.matmul %87, %90, %cst_55 {dimension_numbers = #tpu.dot_dimension_numbers<[1], [0], [0], [1], [0, 0, 1, 1], [], []>} : vector<4x32xf32>, vector<32x32xf32>, vector<4x32xf32> -> vector<4x32xf32>
    %92 = arith.addf %89, %91 : vector<4x32xf32>
    %c0_56 = arith.constant 0 : index
    %c0_57 = arith.constant 0 : index
    %93 = vector.load %arg13[%c0_56, %c0_57] : memref<1x32xf32, #tpu.memory_space<vmem>>, vector<1x32xf32>
    %94 = vector.broadcast %93 : vector<1x32xf32> to vector<4x32xf32>
    %95 = arith.addf %92, %94 : vector<4x32xf32>
    %c0_58 = arith.constant 0 : index
    %c0_59 = arith.constant 0 : index
    %96 = vector.load %arg14[%c0_58, %c0_59] : memref<32x16xf32, #tpu.memory_space<vmem>>, vector<32x16xf32>
    %cst_60 = arith.constant dense<0.000000e+00> : vector<4x16xf32>
    %97 = tpu.matmul %95, %96, %cst_60 {dimension_numbers = #tpu.dot_dimension_numbers<[1], [0], [0], [1], [0, 0, 1, 1], [], []>} : vector<4x32xf32>, vector<32x16xf32>, vector<4x16xf32> -> vector<4x16xf32>
    %c0_61 = arith.constant 0 : index
    %c0_62 = arith.constant 0 : index
    %98 = vector.load %arg15[%c0_61, %c0_62] : memref<1x16xf32, #tpu.memory_space<vmem>>, vector<1x16xf32>
    %99 = vector.broadcast %98 : vector<1x16xf32> to vector<4x16xf32>
    %100 = arith.addf %97, %99 : vector<4x16xf32>
    %101 = arith.index_cast %c0_i32 : i32 to index
    %c0_63 = arith.constant 0 : index
    %c0_64 = arith.constant 0 : index
    %102 = vector.load %arg16[%101, %c0_63, %c0_64] : memref<6x4x16xf32, #tpu.memory_space<vmem>>, vector<1x4x16xf32>
    %103 = vector.shape_cast %102 : vector<1x4x16xf32> to vector<4x16xf32>
    %104 = vector.shape_cast %100 : vector<4x16xf32> to vector<1x4x16xf32>
    tpu.vector_store %arg16[%101, %c0_63, %c0_64], %104 {strides = array<i32>} : memref<6x4x16xf32, #tpu.memory_space<vmem>>, vector<1x4x16xf32>,
    %c1_i32 = arith.constant 1 : i32
    %105 = arith.index_cast %c1_i32 : i32 to index
    %c0_65 = arith.constant 0 : index
    %c0_66 = arith.constant 0 : index
    %106 = vector.load %arg1[%105, %c0_65, %c0_66] : memref<6x4x16xf32, #tpu.memory_space<vmem>>, vector<1x4x16xf32>
    %107 = vector.shape_cast %106 : vector<1x4x16xf32> to vector<4x16xf32>
    %c0_67 = arith.constant 0 : index
    %c0_68 = arith.constant 0 : index
    %108 = vector.load %arg5[%c0_67, %c0_68] : memref<16x128xf32, #tpu.memory_space<vmem>>, vector<16x128xf32>
    %cst_69 = arith.constant dense<0.000000e+00> : vector<4x128xf32>
    %109 = tpu.matmul %107, %108, %cst_69 {dimension_numbers = #tpu.dot_dimension_numbers<[1], [0], [0], [1], [0, 0, 1, 1], [], []>} : vector<4x16xf32>, vector<16x128xf32>, vector<4x128xf32> -> vector<4x128xf32>
    %c0_70 = arith.constant 0 : index
    %c0_71 = arith.constant 0 : index
    %110 = vector.load %arg6[%c0_70, %c0_71] : memref<32x128xf32, #tpu.memory_space<vmem>>, vector<32x128xf32>
    %cst_72 = arith.constant dense<0.000000e+00> : vector<4x128xf32>
    %111 = tpu.matmul %95, %110, %cst_72 {dimension_numbers = #tpu.dot_dimension_numbers<[1], [0], [0], [1], [0, 0, 1, 1], [], []>} : vector<4x32xf32>, vector<32x128xf32>, vector<4x128xf32> -> vector<4x128xf32>
    %112 = arith.addf %109, %111 : vector<4x128xf32>
    %c0_73 = arith.constant 0 : index
    %c0_74 = arith.constant 0 : index
    %113 = vector.load %arg7[%c0_73, %c0_74] : memref<32x128xf32, #tpu.memory_space<vmem>>, vector<32x128xf32>
    %cst_75 = arith.constant dense<0.000000e+00> : vector<4x128xf32>
    %114 = tpu.matmul %49, %113, %cst_75 {dimension_numbers = #tpu.dot_dimension_numbers<[1], [0], [0], [1], [0, 0, 1, 1], [], []>} : vector<4x32xf32>, vector<32x128xf32>, vector<4x128xf32> -> vector<4x128xf32>
    %115 = arith.addf %112, %114 : vector<4x128xf32>
    %c0_76 = arith.constant 0 : index
    %c0_77 = arith.constant 0 : index
    %116 = vector.load %arg8[%c0_76, %c0_77] : memref<1x128xf32, #tpu.memory_space<vmem>>, vector<1x128xf32>
    %117 = vector.broadcast %116 : vector<1x128xf32> to vector<4x128xf32>
    %118 = arith.addf %115, %117 : vector<4x128xf32>
    %119 = vector.extract_strided_slice %118 {offsets = [0, 0], sizes = [4, 32], strides = [1, 1]} : vector<4x128xf32> to vector<4x32xf32>
    %120 = arith.negf %119 : vector<4x32xf32>
    %121 = math.exp %120 : vector<4x32xf32>
    %cst_78 = arith.constant 1.000000e+00 : f32
    %122 = vector.broadcast %cst_78 : f32 to vector<4x32xf32>
    %123 = arith.addf %122, %121 : vector<4x32xf32>
    %124 = arith.divf %122, %123 : vector<4x32xf32>
    %125 = vector.extract_strided_slice %118 {offsets = [0, 32], sizes = [4, 32], strides = [1, 1]} : vector<4x128xf32> to vector<4x32xf32>
    %126 = arith.negf %125 : vector<4x32xf32>
    %127 = math.exp %126 : vector<4x32xf32>
    %cst_79 = arith.constant 1.000000e+00 : f32
    %128 = vector.broadcast %cst_79 : f32 to vector<4x32xf32>
    %129 = arith.addf %128, %127 : vector<4x32xf32>
    %130 = arith.divf %128, %129 : vector<4x32xf32>
    %131 = vector.extract_strided_slice %118 {offsets = [0, 64], sizes = [4, 32], strides = [1, 1]} : vector<4x128xf32> to vector<4x32xf32>
    %132 = math.tanh %131 : vector<4x32xf32>
    %133 = vector.extract_strided_slice %118 {offsets = [0, 96], sizes = [4, 32], strides = [1, 1]} : vector<4x128xf32> to vector<4x32xf32>
    %134 = arith.negf %133 : vector<4x32xf32>
    %135 = math.exp %134 : vector<4x32xf32>
    %cst_80 = arith.constant 1.000000e+00 : f32
    %136 = vector.broadcast %cst_80 : f32 to vector<4x32xf32>
    %137 = arith.addf %136, %135 : vector<4x32xf32>
    %138 = arith.divf %136, %137 : vector<4x32xf32>
    %139 = arith.mulf %130, %47 : vector<4x32xf32>
    %140 = arith.mulf %124, %132 : vector<4x32xf32>
    %141 = arith.addf %139, %140 : vector<4x32xf32>
    %142 = math.tanh %141 : vector<4x32xf32>
    %143 = arith.mulf %138, %142 : vector<4x32xf32>
    %144 = arith.index_cast %c1_i32 : i32 to index
    %c0_81 = arith.constant 0 : index
    %c0_82 = arith.constant 0 : index
    %145 = vector.load %arg19[%144, %c0_81, %c0_82] : memref<6x4x32xf32, #tpu.memory_space<vmem>>, vector<1x4x32xf32>
    %146 = vector.shape_cast %145 : vector<1x4x32xf32> to vector<4x32xf32>
    %147 = vector.shape_cast %143 : vector<4x32xf32> to vector<1x4x32xf32>
    tpu.vector_store %arg19[%144, %c0_81, %c0_82], %147 {strides = array<i32>} : memref<6x4x32xf32, #tpu.memory_space<vmem>>, vector<1x4x32xf32>,
    %c0_83 = arith.constant 0 : index
    %c0_84 = arith.constant 0 : index
    %148 = vector.load %arg9[%c0_83, %c0_84] : memref<32x32xf32, #tpu.memory_space<vmem>>, vector<32x32xf32>
    %cst_85 = arith.constant dense<0.000000e+00> : vector<4x32xf32>
    %149 = tpu.matmul %143, %148, %cst_85 {dimension_numbers = #tpu.dot_dimension_numbers<[1], [0], [0], [1], [0, 0, 1, 1], [], []>} : vector<4x32xf32>, vector<32x32xf32>, vector<4x32xf32> -> vector<4x32xf32>
    %c0_86 = arith.constant 0 : index
    %c0_87 = arith.constant 0 : index
    %150 = vector.load %arg10[%c0_86, %c0_87] : memref<1x32xf32, #tpu.memory_space<vmem>>, vector<1x32xf32>
    %151 = vector.broadcast %150 : vector<1x32xf32> to vector<4x32xf32>
    %152 = arith.addf %149, %151 : vector<4x32xf32>
    %153 = arith.index_cast %c1_i32 : i32 to index
    %c0_88 = arith.constant 0 : index
    %c0_89 = arith.constant 0 : index
    %154 = vector.load %arg20[%153, %c0_88, %c0_89] : memref<6x4x32xf32, #tpu.memory_space<vmem>>, vector<1x4x32xf32>
    %155 = vector.shape_cast %154 : vector<1x4x32xf32> to vector<4x32xf32>
    %156 = vector.shape_cast %152 : vector<4x32xf32> to vector<1x4x32xf32>
    tpu.vector_store %arg20[%153, %c0_88, %c0_89], %156 {strides = array<i32>} : memref<6x4x32xf32, #tpu.memory_space<vmem>>, vector<1x4x32xf32>,
    %c0_90 = arith.constant 0 : index
    %c0_91 = arith.constant 0 : index
    %c0_92 = arith.constant 0 : index
    %157 = vector.load %arg20[%c0_90, %c0_91, %c0_92] : memref<6x4x32xf32, #tpu.memory_space<vmem>>, vector<6x4x32xf32>
    %158 = vector.shape_cast %143 : vector<4x32xf32> to vector<1x4x32xf32>
    %159 = vector.broadcast %158 : vector<1x4x32xf32> to vector<6x4x32xf32>
    %160 = arith.mulf %157, %159 : vector<6x4x32xf32>
    %cst_93 = arith.constant dense<0.000000e+00> : vector<6x4xf32>
    %161 = vector.multi_reduction <add>, %160, %cst_93 [2] : vector<6x4x32xf32> to vector<6x4xf32>
    %162 = vector.broadcast %c1_i32 : i32 to vector<6x4xi32>
    %163 = arith.cmpi sle, %7, %162 : vector<6x4xi32>
    %164 = arith.addf %161, %6 : vector<6x4xf32>
    %165 = vector.broadcast %cst_14 : f32 to vector<6x4xf32>
    %166 = arith.select %163, %164, %165 : vector<6x4xi1>, vector<6x4xf32>
    %cst_94 = arith.constant dense<0xFF800000> : vector<4xf32>
    %167 = vector.multi_reduction <maximumf>, %166, %cst_94 [0] : vector<6x4xf32> to vector<4xf32>
    %168 = vector.shape_cast %167 : vector<4xf32> to vector<1x4xf32>
    %169 = vector.broadcast %168 : vector<1x4xf32> to vector<6x4xf32>
    %170 = arith.subf %166, %169 : vector<6x4xf32>
    %171 = math.exp %170 : vector<6x4xf32>
    %cst_95 = arith.constant dense<0.000000e+00> : vector<4xf32>
    %172 = vector.multi_reduction <add>, %171, %cst_95 [0] : vector<6x4xf32> to vector<4xf32>
    %173 = vector.shape_cast %172 : vector<4xf32> to vector<1x4xf32>
    %174 = tpu.reciprocal %173 {approx = true} : vector<1x4xf32> -> vector<1x4xf32>
    %175 = vector.broadcast %174 : vector<1x4xf32> to vector<6x4xf32>
    %176 = arith.mulf %171, %175 : vector<6x4xf32>
    %c0_96 = arith.constant 0 : index
    %c0_97 = arith.constant 0 : index
    %c0_98 = arith.constant 0 : index
    %177 = vector.load %arg19[%c0_96, %c0_97, %c0_98] : memref<6x4x32xf32, #tpu.memory_space<vmem>>, vector<6x4x32xf32>
    %178 = vector.shape_cast %176 : vector<6x4xf32> to vector<6x4x1xf32>
    %179 = vector.broadcast %178 : vector<6x4x1xf32> to vector<6x4x32xf32>
    %180 = arith.mulf %177, %179 : vector<6x4x32xf32>
    %cst_99 = arith.constant dense<0.000000e+00> : vector<4x32xf32>
    %181 = vector.multi_reduction <add>, %180, %cst_99 [0] : vector<6x4x32xf32> to vector<4x32xf32>
    %c0_100 = arith.constant 0 : index
    %c0_101 = arith.constant 0 : index
    %182 = vector.load %arg11[%c0_100, %c0_101] : memref<32x32xf32, #tpu.memory_space<vmem>>, vector<32x32xf32>
    %cst_102 = arith.constant dense<0.000000e+00> : vector<4x32xf32>
    %183 = tpu.matmul %143, %182, %cst_102 {dimension_numbers = #tpu.dot_dimension_numbers<[1], [0], [0], [1], [0, 0, 1, 1], [], []>} : vector<4x32xf32>, vector<32x32xf32>, vector<4x32xf32> -> vector<4x32xf32>
    %c0_103 = arith.constant 0 : index
    %c0_104 = arith.constant 0 : index
    %184 = vector.load %arg12[%c0_103, %c0_104] : memref<32x32xf32, #tpu.memory_space<vmem>>, vector<32x32xf32>
    %cst_105 = arith.constant dense<0.000000e+00> : vector<4x32xf32>
    %185 = tpu.matmul %181, %184, %cst_105 {dimension_numbers = #tpu.dot_dimension_numbers<[1], [0], [0], [1], [0, 0, 1, 1], [], []>} : vector<4x32xf32>, vector<32x32xf32>, vector<4x32xf32> -> vector<4x32xf32>
    %186 = arith.addf %183, %185 : vector<4x32xf32>
    %c0_106 = arith.constant 0 : index
    %c0_107 = arith.constant 0 : index
    %187 = vector.load %arg13[%c0_106, %c0_107] : memref<1x32xf32, #tpu.memory_space<vmem>>, vector<1x32xf32>
    %188 = vector.broadcast %187 : vector<1x32xf32> to vector<4x32xf32>
    %189 = arith.addf %186, %188 : vector<4x32xf32>
    %c0_108 = arith.constant 0 : index
    %c0_109 = arith.constant 0 : index
    %190 = vector.load %arg14[%c0_108, %c0_109] : memref<32x16xf32, #tpu.memory_space<vmem>>, vector<32x16xf32>
    %cst_110 = arith.constant dense<0.000000e+00> : vector<4x16xf32>
    %191 = tpu.matmul %189, %190, %cst_110 {dimension_numbers = #tpu.dot_dimension_numbers<[1], [0], [0], [1], [0, 0, 1, 1], [], []>} : vector<4x32xf32>, vector<32x16xf32>, vector<4x16xf32> -> vector<4x16xf32>
    %c0_111 = arith.constant 0 : index
    %c0_112 = arith.constant 0 : index
    %192 = vector.load %arg15[%c0_111, %c0_112] : memref<1x16xf32, #tpu.memory_space<vmem>>, vector<1x16xf32>
    %193 = vector.broadcast %192 : vector<1x16xf32> to vector<4x16xf32>
    %194 = arith.addf %191, %193 : vector<4x16xf32>
    %195 = arith.index_cast %c1_i32 : i32 to index
    %c0_113 = arith.constant 0 : index
    %c0_114 = arith.constant 0 : index
    %196 = vector.load %arg16[%195, %c0_113, %c0_114] : memref<6x4x16xf32, #tpu.memory_space<vmem>>, vector<1x4x16xf32>
    %197 = vector.shape_cast %196 : vector<1x4x16xf32> to vector<4x16xf32>
    %198 = vector.shape_cast %194 : vector<4x16xf32> to vector<1x4x16xf32>
    tpu.vector_store %arg16[%195, %c0_113, %c0_114], %198 {strides = array<i32>} : memref<6x4x16xf32, #tpu.memory_space<vmem>>, vector<1x4x16xf32>,
    %c2_i32 = arith.constant 2 : i32
    %199 = arith.index_cast %c2_i32 : i32 to index
    %c0_115 = arith.constant 0 : index
    %c0_116 = arith.constant 0 : index
    %200 = vector.load %arg1[%199, %c0_115, %c0_116] : memref<6x4x16xf32, #tpu.memory_space<vmem>>, vector<1x4x16xf32>
    %201 = vector.shape_cast %200 : vector<1x4x16xf32> to vector<4x16xf32>
    %c0_117 = arith.constant 0 : index
    %c0_118 = arith.constant 0 : index
    %202 = vector.load %arg5[%c0_117, %c0_118] : memref<16x128xf32, #tpu.memory_space<vmem>>, vector<16x128xf32>
    %cst_119 = arith.constant dense<0.000000e+00> : vector<4x128xf32>
    %203 = tpu.matmul %201, %202, %cst_119 {dimension_numbers = #tpu.dot_dimension_numbers<[1], [0], [0], [1], [0, 0, 1, 1], [], []>} : vector<4x16xf32>, vector<16x128xf32>, vector<4x128xf32> -> vector<4x128xf32>
    %c0_120 = arith.constant 0 : index
    %c0_121 = arith.constant 0 : index
    %204 = vector.load %arg6[%c0_120, %c0_121] : memref<32x128xf32, #tpu.memory_space<vmem>>, vector<32x128xf32>
    %cst_122 = arith.constant dense<0.000000e+00> : vector<4x128xf32>
    %205 = tpu.matmul %189, %204, %cst_122 {dimension_numbers = #tpu.dot_dimension_numbers<[1], [0], [0], [1], [0, 0, 1, 1], [], []>} : vector<4x32xf32>, vector<32x128xf32>, vector<4x128xf32> -> vector<4x128xf32>
    %206 = arith.addf %203, %205 : vector<4x128xf32>
    %c0_123 = arith.constant 0 : index
    %c0_124 = arith.constant 0 : index
    %207 = vector.load %arg7[%c0_123, %c0_124] : memref<32x128xf32, #tpu.memory_space<vmem>>, vector<32x128xf32>
    %cst_125 = arith.constant dense<0.000000e+00> : vector<4x128xf32>
    %208 = tpu.matmul %143, %207, %cst_125 {dimension_numbers = #tpu.dot_dimension_numbers<[1], [0], [0], [1], [0, 0, 1, 1], [], []>} : vector<4x32xf32>, vector<32x128xf32>, vector<4x128xf32> -> vector<4x128xf32>
    %209 = arith.addf %206, %208 : vector<4x128xf32>
    %c0_126 = arith.constant 0 : index
    %c0_127 = arith.constant 0 : index
    %210 = vector.load %arg8[%c0_126, %c0_127] : memref<1x128xf32, #tpu.memory_space<vmem>>, vector<1x128xf32>
    %211 = vector.broadcast %210 : vector<1x128xf32> to vector<4x128xf32>
    %212 = arith.addf %209, %211 : vector<4x128xf32>
    %213 = vector.extract_strided_slice %212 {offsets = [0, 0], sizes = [4, 32], strides = [1, 1]} : vector<4x128xf32> to vector<4x32xf32>
    %214 = arith.negf %213 : vector<4x32xf32>
    %215 = math.exp %214 : vector<4x32xf32>
    %cst_128 = arith.constant 1.000000e+00 : f32
    %216 = vector.broadcast %cst_128 : f32 to vector<4x32xf32>
    %217 = arith.addf %216, %215 : vector<4x32xf32>
    %218 = arith.divf %216, %217 : vector<4x32xf32>
    %219 = vector.extract_strided_slice %212 {offsets = [0, 32], sizes = [4, 32], strides = [1, 1]} : vector<4x128xf32> to vector<4x32xf32>
    %220 = arith.negf %219 : vector<4x32xf32>
    %221 = math.exp %220 : vector<4x32xf32>
    %cst_129 = arith.constant 1.000000e+00 : f32
    %222 = vector.broadcast %cst_129 : f32 to vector<4x32xf32>
    %223 = arith.addf %222, %221 : vector<4x32xf32>
    %224 = arith.divf %222, %223 : vector<4x32xf32>
    %225 = vector.extract_strided_slice %212 {offsets = [0, 64], sizes = [4, 32], strides = [1, 1]} : vector<4x128xf32> to vector<4x32xf32>
    %226 = math.tanh %225 : vector<4x32xf32>
    %227 = vector.extract_strided_slice %212 {offsets = [0, 96], sizes = [4, 32], strides = [1, 1]} : vector<4x128xf32> to vector<4x32xf32>
    %228 = arith.negf %227 : vector<4x32xf32>
    %229 = math.exp %228 : vector<4x32xf32>
    %cst_130 = arith.constant 1.000000e+00 : f32
    %230 = vector.broadcast %cst_130 : f32 to vector<4x32xf32>
    %231 = arith.addf %230, %229 : vector<4x32xf32>
    %232 = arith.divf %230, %231 : vector<4x32xf32>
    %233 = arith.mulf %224, %141 : vector<4x32xf32>
    %234 = arith.mulf %218, %226 : vector<4x32xf32>
    %235 = arith.addf %233, %234 : vector<4x32xf32>
    %236 = math.tanh %235 : vector<4x32xf32>
    %237 = arith.mulf %232, %236 : vector<4x32xf32>
    %238 = arith.index_cast %c2_i32 : i32 to index
    %c0_131 = arith.constant 0 : index
    %c0_132 = arith.constant 0 : index
    %239 = vector.load %arg19[%238, %c0_131, %c0_132] : memref<6x4x32xf32, #tpu.memory_space<vmem>>, vector<1x4x32xf32>
    %240 = vector.shape_cast %239 : vector<1x4x32xf32> to vector<4x32xf32>
    %241 = vector.shape_cast %237 : vector<4x32xf32> to vector<1x4x32xf32>
    tpu.vector_store %arg19[%238, %c0_131, %c0_132], %241 {strides = array<i32>} : memref<6x4x32xf32, #tpu.memory_space<vmem>>, vector<1x4x32xf32>,
    %c0_133 = arith.constant 0 : index
    %c0_134 = arith.constant 0 : index
    %242 = vector.load %arg9[%c0_133, %c0_134] : memref<32x32xf32, #tpu.memory_space<vmem>>, vector<32x32xf32>
    %cst_135 = arith.constant dense<0.000000e+00> : vector<4x32xf32>
    %243 = tpu.matmul %237, %242, %cst_135 {dimension_numbers = #tpu.dot_dimension_numbers<[1], [0], [0], [1], [0, 0, 1, 1], [], []>} : vector<4x32xf32>, vector<32x32xf32>, vector<4x32xf32> -> vector<4x32xf32>
    %c0_136 = arith.constant 0 : index
    %c0_137 = arith.constant 0 : index
    %244 = vector.load %arg10[%c0_136, %c0_137] : memref<1x32xf32, #tpu.memory_space<vmem>>, vector<1x32xf32>
    %245 = vector.broadcast %244 : vector<1x32xf32> to vector<4x32xf32>
    %246 = arith.addf %243, %245 : vector<4x32xf32>
    %247 = arith.index_cast %c2_i32 : i32 to index
    %c0_138 = arith.constant 0 : index
    %c0_139 = arith.constant 0 : index
    %248 = vector.load %arg20[%247, %c0_138, %c0_139] : memref<6x4x32xf32, #tpu.memory_space<vmem>>, vector<1x4x32xf32>
    %249 = vector.shape_cast %248 : vector<1x4x32xf32> to vector<4x32xf32>
    %250 = vector.shape_cast %246 : vector<4x32xf32> to vector<1x4x32xf32>
    tpu.vector_store %arg20[%247, %c0_138, %c0_139], %250 {strides = array<i32>} : memref<6x4x32xf32, #tpu.memory_space<vmem>>, vector<1x4x32xf32>,
    %c0_140 = arith.constant 0 : index
    %c0_141 = arith.constant 0 : index
    %c0_142 = arith.constant 0 : index
    %251 = vector.load %arg20[%c0_140, %c0_141, %c0_142] : memref<6x4x32xf32, #tpu.memory_space<vmem>>, vector<6x4x32xf32>
    %252 = vector.shape_cast %237 : vector<4x32xf32> to vector<1x4x32xf32>
    %253 = vector.broadcast %252 : vector<1x4x32xf32> to vector<6x4x32xf32>
    %254 = arith.mulf %251, %253 : vector<6x4x32xf32>
    %cst_143 = arith.constant dense<0.000000e+00> : vector<6x4xf32>
    %255 = vector.multi_reduction <add>, %254, %cst_143 [2] : vector<6x4x32xf32> to vector<6x4xf32>
    %256 = vector.broadcast %c2_i32 : i32 to vector<6x4xi32>
    %257 = arith.cmpi sle, %7, %256 : vector<6x4xi32>
    %258 = arith.addf %255, %6 : vector<6x4xf32>
    %259 = vector.broadcast %cst_14 : f32 to vector<6x4xf32>
    %260 = arith.select %257, %258, %259 : vector<6x4xi1>, vector<6x4xf32>
    %cst_144 = arith.constant dense<0xFF800000> : vector<4xf32>
    %261 = vector.multi_reduction <maximumf>, %260, %cst_144 [0] : vector<6x4xf32> to vector<4xf32>
    %262 = vector.shape_cast %261 : vector<4xf32> to vector<1x4xf32>
    %263 = vector.broadcast %262 : vector<1x4xf32> to vector<6x4xf32>
    %264 = arith.subf %260, %263 : vector<6x4xf32>
    %265 = math.exp %264 : vector<6x4xf32>
    %cst_145 = arith.constant dense<0.000000e+00> : vector<4xf32>
    %266 = vector.multi_reduction <add>, %265, %cst_145 [0] : vector<6x4xf32> to vector<4xf32>
    %267 = vector.shape_cast %266 : vector<4xf32> to vector<1x4xf32>
    %268 = tpu.reciprocal %267 {approx = true} : vector<1x4xf32> -> vector<1x4xf32>
    %269 = vector.broadcast %268 : vector<1x4xf32> to vector<6x4xf32>
    %270 = arith.mulf %265, %269 : vector<6x4xf32>
    %c0_146 = arith.constant 0 : index
    %c0_147 = arith.constant 0 : index
    %c0_148 = arith.constant 0 : index
    %271 = vector.load %arg19[%c0_146, %c0_147, %c0_148] : memref<6x4x32xf32, #tpu.memory_space<vmem>>, vector<6x4x32xf32>
    %272 = vector.shape_cast %270 : vector<6x4xf32> to vector<6x4x1xf32>
    %273 = vector.broadcast %272 : vector<6x4x1xf32> to vector<6x4x32xf32>
    %274 = arith.mulf %271, %273 : vector<6x4x32xf32>
    %cst_149 = arith.constant dense<0.000000e+00> : vector<4x32xf32>
    %275 = vector.multi_reduction <add>, %274, %cst_149 [0] : vector<6x4x32xf32> to vector<4x32xf32>
    %c0_150 = arith.constant 0 : index
    %c0_151 = arith.constant 0 : index
    %276 = vector.load %arg11[%c0_150, %c0_151] : memref<32x32xf32, #tpu.memory_space<vmem>>, vector<32x32xf32>
    %cst_152 = arith.constant dense<0.000000e+00> : vector<4x32xf32>
    %277 = tpu.matmul %237, %276, %cst_152 {dimension_numbers = #tpu.dot_dimension_numbers<[1], [0], [0], [1], [0, 0, 1, 1], [], []>} : vector<4x32xf32>, vector<32x32xf32>, vector<4x32xf32> -> vector<4x32xf32>
    %c0_153 = arith.constant 0 : index
    %c0_154 = arith.constant 0 : index
    %278 = vector.load %arg12[%c0_153, %c0_154] : memref<32x32xf32, #tpu.memory_space<vmem>>, vector<32x32xf32>
    %cst_155 = arith.constant dense<0.000000e+00> : vector<4x32xf32>
    %279 = tpu.matmul %275, %278, %cst_155 {dimension_numbers = #tpu.dot_dimension_numbers<[1], [0], [0], [1], [0, 0, 1, 1], [], []>} : vector<4x32xf32>, vector<32x32xf32>, vector<4x32xf32> -> vector<4x32xf32>
    %280 = arith.addf %277, %279 : vector<4x32xf32>
    %c0_156 = arith.constant 0 : index
    %c0_157 = arith.constant 0 : index
    %281 = vector.load %arg13[%c0_156, %c0_157] : memref<1x32xf32, #tpu.memory_space<vmem>>, vector<1x32xf32>
    %282 = vector.broadcast %281 : vector<1x32xf32> to vector<4x32xf32>
    %283 = arith.addf %280, %282 : vector<4x32xf32>
    %c0_158 = arith.constant 0 : index
    %c0_159 = arith.constant 0 : index
    %284 = vector.load %arg14[%c0_158, %c0_159] : memref<32x16xf32, #tpu.memory_space<vmem>>, vector<32x16xf32>
    %cst_160 = arith.constant dense<0.000000e+00> : vector<4x16xf32>
    %285 = tpu.matmul %283, %284, %cst_160 {dimension_numbers = #tpu.dot_dimension_numbers<[1], [0], [0], [1], [0, 0, 1, 1], [], []>} : vector<4x32xf32>, vector<32x16xf32>, vector<4x16xf32> -> vector<4x16xf32>
    %c0_161 = arith.constant 0 : index
    %c0_162 = arith.constant 0 : index
    %286 = vector.load %arg15[%c0_161, %c0_162] : memref<1x16xf32, #tpu.memory_space<vmem>>, vector<1x16xf32>
    %287 = vector.broadcast %286 : vector<1x16xf32> to vector<4x16xf32>
    %288 = arith.addf %285, %287 : vector<4x16xf32>
    %289 = arith.index_cast %c2_i32 : i32 to index
    %c0_163 = arith.constant 0 : index
    %c0_164 = arith.constant 0 : index
    %290 = vector.load %arg16[%289, %c0_163, %c0_164] : memref<6x4x16xf32, #tpu.memory_space<vmem>>, vector<1x4x16xf32>
    %291 = vector.shape_cast %290 : vector<1x4x16xf32> to vector<4x16xf32>
    %292 = vector.shape_cast %288 : vector<4x16xf32> to vector<1x4x16xf32>
    tpu.vector_store %arg16[%289, %c0_163, %c0_164], %292 {strides = array<i32>} : memref<6x4x16xf32, #tpu.memory_space<vmem>>, vector<1x4x16xf32>,
    %c3_i32 = arith.constant 3 : i32
    %293 = arith.index_cast %c3_i32 : i32 to index
    %c0_165 = arith.constant 0 : index
    %c0_166 = arith.constant 0 : index
    %294 = vector.load %arg1[%293, %c0_165, %c0_166] : memref<6x4x16xf32, #tpu.memory_space<vmem>>, vector<1x4x16xf32>
    %295 = vector.shape_cast %294 : vector<1x4x16xf32> to vector<4x16xf32>
    %c0_167 = arith.constant 0 : index
    %c0_168 = arith.constant 0 : index
    %296 = vector.load %arg5[%c0_167, %c0_168] : memref<16x128xf32, #tpu.memory_space<vmem>>, vector<16x128xf32>
    %cst_169 = arith.constant dense<0.000000e+00> : vector<4x128xf32>
    %297 = tpu.matmul %295, %296, %cst_169 {dimension_numbers = #tpu.dot_dimension_numbers<[1], [0], [0], [1], [0, 0, 1, 1], [], []>} : vector<4x16xf32>, vector<16x128xf32>, vector<4x128xf32> -> vector<4x128xf32>
    %c0_170 = arith.constant 0 : index
    %c0_171 = arith.constant 0 : index
    %298 = vector.load %arg6[%c0_170, %c0_171] : memref<32x128xf32, #tpu.memory_space<vmem>>, vector<32x128xf32>
    %cst_172 = arith.constant dense<0.000000e+00> : vector<4x128xf32>
    %299 = tpu.matmul %283, %298, %cst_172 {dimension_numbers = #tpu.dot_dimension_numbers<[1], [0], [0], [1], [0, 0, 1, 1], [], []>} : vector<4x32xf32>, vector<32x128xf32>, vector<4x128xf32> -> vector<4x128xf32>
    %300 = arith.addf %297, %299 : vector<4x128xf32>
    %c0_173 = arith.constant 0 : index
    %c0_174 = arith.constant 0 : index
    %301 = vector.load %arg7[%c0_173, %c0_174] : memref<32x128xf32, #tpu.memory_space<vmem>>, vector<32x128xf32>
    %cst_175 = arith.constant dense<0.000000e+00> : vector<4x128xf32>
    %302 = tpu.matmul %237, %301, %cst_175 {dimension_numbers = #tpu.dot_dimension_numbers<[1], [0], [0], [1], [0, 0, 1, 1], [], []>} : vector<4x32xf32>, vector<32x128xf32>, vector<4x128xf32> -> vector<4x128xf32>
    %303 = arith.addf %300, %302 : vector<4x128xf32>
    %c0_176 = arith.constant 0 : index
    %c0_177 = arith.constant 0 : index
    %304 = vector.load %arg8[%c0_176, %c0_177] : memref<1x128xf32, #tpu.memory_space<vmem>>, vector<1x128xf32>
    %305 = vector.broadcast %304 : vector<1x128xf32> to vector<4x128xf32>
    %306 = arith.addf %303, %305 : vector<4x128xf32>
    %307 = vector.extract_strided_slice %306 {offsets = [0, 0], sizes = [4, 32], strides = [1, 1]} : vector<4x128xf32> to vector<4x32xf32>
    %308 = arith.negf %307 : vector<4x32xf32>
    %309 = math.exp %308 : vector<4x32xf32>
    %cst_178 = arith.constant 1.000000e+00 : f32
    %310 = vector.broadcast %cst_178 : f32 to vector<4x32xf32>
    %311 = arith.addf %310, %309 : vector<4x32xf32>
    %312 = arith.divf %310, %311 : vector<4x32xf32>
    %313 = vector.extract_strided_slice %306 {offsets = [0, 32], sizes = [4, 32], strides = [1, 1]} : vector<4x128xf32> to vector<4x32xf32>
    %314 = arith.negf %313 : vector<4x32xf32>
    %315 = math.exp %314 : vector<4x32xf32>
    %cst_179 = arith.constant 1.000000e+00 : f32
    %316 = vector.broadcast %cst_179 : f32 to vector<4x32xf32>
    %317 = arith.addf %316, %315 : vector<4x32xf32>
    %318 = arith.divf %316, %317 : vector<4x32xf32>
    %319 = vector.extract_strided_slice %306 {offsets = [0, 64], sizes = [4, 32], strides = [1, 1]} : vector<4x128xf32> to vector<4x32xf32>
    %320 = math.tanh %319 : vector<4x32xf32>
    %321 = vector.extract_strided_slice %306 {offsets = [0, 96], sizes = [4, 32], strides = [1, 1]} : vector<4x128xf32> to vector<4x32xf32>
    %322 = arith.negf %321 : vector<4x32xf32>
    %323 = math.exp %322 : vector<4x32xf32>
    %cst_180 = arith.constant 1.000000e+00 : f32
    %324 = vector.broadcast %cst_180 : f32 to vector<4x32xf32>
    %325 = arith.addf %324, %323 : vector<4x32xf32>
    %326 = arith.divf %324, %325 : vector<4x32xf32>
    %327 = arith.mulf %318, %235 : vector<4x32xf32>
    %328 = arith.mulf %312, %320 : vector<4x32xf32>
    %329 = arith.addf %327, %328 : vector<4x32xf32>
    %330 = math.tanh %329 : vector<4x32xf32>
    %331 = arith.mulf %326, %330 : vector<4x32xf32>
    %332 = arith.index_cast %c3_i32 : i32 to index
    %c0_181 = arith.constant 0 : index
    %c0_182 = arith.constant 0 : index
    %333 = vector.load %arg19[%332, %c0_181, %c0_182] : memref<6x4x32xf32, #tpu.memory_space<vmem>>, vector<1x4x32xf32>
    %334 = vector.shape_cast %333 : vector<1x4x32xf32> to vector<4x32xf32>
    %335 = vector.shape_cast %331 : vector<4x32xf32> to vector<1x4x32xf32>
    tpu.vector_store %arg19[%332, %c0_181, %c0_182], %335 {strides = array<i32>} : memref<6x4x32xf32, #tpu.memory_space<vmem>>, vector<1x4x32xf32>,
    %c0_183 = arith.constant 0 : index
    %c0_184 = arith.constant 0 : index
    %336 = vector.load %arg9[%c0_183, %c0_184] : memref<32x32xf32, #tpu.memory_space<vmem>>, vector<32x32xf32>
    %cst_185 = arith.constant dense<0.000000e+00> : vector<4x32xf32>
    %337 = tpu.matmul %331, %336, %cst_185 {dimension_numbers = #tpu.dot_dimension_numbers<[1], [0], [0], [1], [0, 0, 1, 1], [], []>} : vector<4x32xf32>, vector<32x32xf32>, vector<4x32xf32> -> vector<4x32xf32>
    %c0_186 = arith.constant 0 : index
    %c0_187 = arith.constant 0 : index
    %338 = vector.load %arg10[%c0_186, %c0_187] : memref<1x32xf32, #tpu.memory_space<vmem>>, vector<1x32xf32>
    %339 = vector.broadcast %338 : vector<1x32xf32> to vector<4x32xf32>
    %340 = arith.addf %337, %339 : vector<4x32xf32>
    %341 = arith.index_cast %c3_i32 : i32 to index
    %c0_188 = arith.constant 0 : index
    %c0_189 = arith.constant 0 : index
    %342 = vector.load %arg20[%341, %c0_188, %c0_189] : memref<6x4x32xf32, #tpu.memory_space<vmem>>, vector<1x4x32xf32>
    %343 = vector.shape_cast %342 : vector<1x4x32xf32> to vector<4x32xf32>
    %344 = vector.shape_cast %340 : vector<4x32xf32> to vector<1x4x32xf32>
    tpu.vector_store %arg20[%341, %c0_188, %c0_189], %344 {strides = array<i32>} : memref<6x4x32xf32, #tpu.memory_space<vmem>>, vector<1x4x32xf32>,
    %c0_190 = arith.constant 0 : index
    %c0_191 = arith.constant 0 : index
    %c0_192 = arith.constant 0 : index
    %345 = vector.load %arg20[%c0_190, %c0_191, %c0_192] : memref<6x4x32xf32, #tpu.memory_space<vmem>>, vector<6x4x32xf32>
    %346 = vector.shape_cast %331 : vector<4x32xf32> to vector<1x4x32xf32>
    %347 = vector.broadcast %346 : vector<1x4x32xf32> to vector<6x4x32xf32>
    %348 = arith.mulf %345, %347 : vector<6x4x32xf32>
    %cst_193 = arith.constant dense<0.000000e+00> : vector<6x4xf32>
    %349 = vector.multi_reduction <add>, %348, %cst_193 [2] : vector<6x4x32xf32> to vector<6x4xf32>
    %350 = vector.broadcast %c3_i32 : i32 to vector<6x4xi32>
    %351 = arith.cmpi sle, %7, %350 : vector<6x4xi32>
    %352 = arith.addf %349, %6 : vector<6x4xf32>
    %353 = vector.broadcast %cst_14 : f32 to vector<6x4xf32>
    %354 = arith.select %351, %352, %353 : vector<6x4xi1>, vector<6x4xf32>
    %cst_194 = arith.constant dense<0xFF800000> : vector<4xf32>
    %355 = vector.multi_reduction <maximumf>, %354, %cst_194 [0] : vector<6x4xf32> to vector<4xf32>
    %356 = vector.shape_cast %355 : vector<4xf32> to vector<1x4xf32>
    %357 = vector.broadcast %356 : vector<1x4xf32> to vector<6x4xf32>
    %358 = arith.subf %354, %357 : vector<6x4xf32>
    %359 = math.exp %358 : vector<6x4xf32>
    %cst_195 = arith.constant dense<0.000000e+00> : vector<4xf32>
    %360 = vector.multi_reduction <add>, %359, %cst_195 [0] : vector<6x4xf32> to vector<4xf32>
    %361 = vector.shape_cast %360 : vector<4xf32> to vector<1x4xf32>
    %362 = tpu.reciprocal %361 {approx = true} : vector<1x4xf32> -> vector<1x4xf32>
    %363 = vector.broadcast %362 : vector<1x4xf32> to vector<6x4xf32>
    %364 = arith.mulf %359, %363 : vector<6x4xf32>
    %c0_196 = arith.constant 0 : index
    %c0_197 = arith.constant 0 : index
    %c0_198 = arith.constant 0 : index
    %365 = vector.load %arg19[%c0_196, %c0_197, %c0_198] : memref<6x4x32xf32, #tpu.memory_space<vmem>>, vector<6x4x32xf32>
    %366 = vector.shape_cast %364 : vector<6x4xf32> to vector<6x4x1xf32>
    %367 = vector.broadcast %366 : vector<6x4x1xf32> to vector<6x4x32xf32>
    %368 = arith.mulf %365, %367 : vector<6x4x32xf32>
    %cst_199 = arith.constant dense<0.000000e+00> : vector<4x32xf32>
    %369 = vector.multi_reduction <add>, %368, %cst_199 [0] : vector<6x4x32xf32> to vector<4x32xf32>
    %c0_200 = arith.constant 0 : index
    %c0_201 = arith.constant 0 : index
    %370 = vector.load %arg11[%c0_200, %c0_201] : memref<32x32xf32, #tpu.memory_space<vmem>>, vector<32x32xf32>
    %cst_202 = arith.constant dense<0.000000e+00> : vector<4x32xf32>
    %371 = tpu.matmul %331, %370, %cst_202 {dimension_numbers = #tpu.dot_dimension_numbers<[1], [0], [0], [1], [0, 0, 1, 1], [], []>} : vector<4x32xf32>, vector<32x32xf32>, vector<4x32xf32> -> vector<4x32xf32>
    %c0_203 = arith.constant 0 : index
    %c0_204 = arith.constant 0 : index
    %372 = vector.load %arg12[%c0_203, %c0_204] : memref<32x32xf32, #tpu.memory_space<vmem>>, vector<32x32xf32>
    %cst_205 = arith.constant dense<0.000000e+00> : vector<4x32xf32>
    %373 = tpu.matmul %369, %372, %cst_205 {dimension_numbers = #tpu.dot_dimension_numbers<[1], [0], [0], [1], [0, 0, 1, 1], [], []>} : vector<4x32xf32>, vector<32x32xf32>, vector<4x32xf32> -> vector<4x32xf32>
    %374 = arith.addf %371, %373 : vector<4x32xf32>
    %c0_206 = arith.constant 0 : index
    %c0_207 = arith.constant 0 : index
    %375 = vector.load %arg13[%c0_206, %c0_207] : memref<1x32xf32, #tpu.memory_space<vmem>>, vector<1x32xf32>
    %376 = vector.broadcast %375 : vector<1x32xf32> to vector<4x32xf32>
    %377 = arith.addf %374, %376 : vector<4x32xf32>
    %c0_208 = arith.constant 0 : index
    %c0_209 = arith.constant 0 : index
    %378 = vector.load %arg14[%c0_208, %c0_209] : memref<32x16xf32, #tpu.memory_space<vmem>>, vector<32x16xf32>
    %cst_210 = arith.constant dense<0.000000e+00> : vector<4x16xf32>
    %379 = tpu.matmul %377, %378, %cst_210 {dimension_numbers = #tpu.dot_dimension_numbers<[1], [0], [0], [1], [0, 0, 1, 1], [], []>} : vector<4x32xf32>, vector<32x16xf32>, vector<4x16xf32> -> vector<4x16xf32>
    %c0_211 = arith.constant 0 : index
    %c0_212 = arith.constant 0 : index
    %380 = vector.load %arg15[%c0_211, %c0_212] : memref<1x16xf32, #tpu.memory_space<vmem>>, vector<1x16xf32>
    %381 = vector.broadcast %380 : vector<1x16xf32> to vector<4x16xf32>
    %382 = arith.addf %379, %381 : vector<4x16xf32>
    %383 = arith.index_cast %c3_i32 : i32 to index
    %c0_213 = arith.constant 0 : index
    %c0_214 = arith.constant 0 : index
    %384 = vector.load %arg16[%383, %c0_213, %c0_214] : memref<6x4x16xf32, #tpu.memory_space<vmem>>, vector<1x4x16xf32>
    %385 = vector.shape_cast %384 : vector<1x4x16xf32> to vector<4x16xf32>
    %386 = vector.shape_cast %382 : vector<4x16xf32> to vector<1x4x16xf32>
    tpu.vector_store %arg16[%383, %c0_213, %c0_214], %386 {strides = array<i32>} : memref<6x4x16xf32, #tpu.memory_space<vmem>>, vector<1x4x16xf32>,
    %c4_i32 = arith.constant 4 : i32
    %387 = arith.index_cast %c4_i32 : i32 to index
    %c0_215 = arith.constant 0 : index
    %c0_216 = arith.constant 0 : index
    %388 = vector.load %arg1[%387, %c0_215, %c0_216] : memref<6x4x16xf32, #tpu.memory_space<vmem>>, vector<1x4x16xf32>
    %389 = vector.shape_cast %388 : vector<1x4x16xf32> to vector<4x16xf32>
    %c0_217 = arith.constant 0 : index
    %c0_218 = arith.constant 0 : index
    %390 = vector.load %arg5[%c0_217, %c0_218] : memref<16x128xf32, #tpu.memory_space<vmem>>, vector<16x128xf32>
    %cst_219 = arith.constant dense<0.000000e+00> : vector<4x128xf32>
    %391 = tpu.matmul %389, %390, %cst_219 {dimension_numbers = #tpu.dot_dimension_numbers<[1], [0], [0], [1], [0, 0, 1, 1], [], []>} : vector<4x16xf32>, vector<16x128xf32>, vector<4x128xf32> -> vector<4x128xf32>
    %c0_220 = arith.constant 0 : index
    %c0_221 = arith.constant 0 : index
    %392 = vector.load %arg6[%c0_220, %c0_221] : memref<32x128xf32, #tpu.memory_space<vmem>>, vector<32x128xf32>
    %cst_222 = arith.constant dense<0.000000e+00> : vector<4x128xf32>
    %393 = tpu.matmul %377, %392, %cst_222 {dimension_numbers = #tpu.dot_dimension_numbers<[1], [0], [0], [1], [0, 0, 1, 1], [], []>} : vector<4x32xf32>, vector<32x128xf32>, vector<4x128xf32> -> vector<4x128xf32>
    %394 = arith.addf %391, %393 : vector<4x128xf32>
    %c0_223 = arith.constant 0 : index
    %c0_224 = arith.constant 0 : index
    %395 = vector.load %arg7[%c0_223, %c0_224] : memref<32x128xf32, #tpu.memory_space<vmem>>, vector<32x128xf32>
    %cst_225 = arith.constant dense<0.000000e+00> : vector<4x128xf32>
    %396 = tpu.matmul %331, %395, %cst_225 {dimension_numbers = #tpu.dot_dimension_numbers<[1], [0], [0], [1], [0, 0, 1, 1], [], []>} : vector<4x32xf32>, vector<32x128xf32>, vector<4x128xf32> -> vector<4x128xf32>
    %397 = arith.addf %394, %396 : vector<4x128xf32>
    %c0_226 = arith.constant 0 : index
    %c0_227 = arith.constant 0 : index
    %398 = vector.load %arg8[%c0_226, %c0_227] : memref<1x128xf32, #tpu.memory_space<vmem>>, vector<1x128xf32>
    %399 = vector.broadcast %398 : vector<1x128xf32> to vector<4x128xf32>
    %400 = arith.addf %397, %399 : vector<4x128xf32>
    %401 = vector.extract_strided_slice %400 {offsets = [0, 0], sizes = [4, 32], strides = [1, 1]} : vector<4x128xf32> to vector<4x32xf32>
    %402 = arith.negf %401 : vector<4x32xf32>
    %403 = math.exp %402 : vector<4x32xf32>
    %cst_228 = arith.constant 1.000000e+00 : f32
    %404 = vector.broadcast %cst_228 : f32 to vector<4x32xf32>
    %405 = arith.addf %404, %403 : vector<4x32xf32>
    %406 = arith.divf %404, %405 : vector<4x32xf32>
    %407 = vector.extract_strided_slice %400 {offsets = [0, 32], sizes = [4, 32], strides = [1, 1]} : vector<4x128xf32> to vector<4x32xf32>
    %408 = arith.negf %407 : vector<4x32xf32>
    %409 = math.exp %408 : vector<4x32xf32>
    %cst_229 = arith.constant 1.000000e+00 : f32
    %410 = vector.broadcast %cst_229 : f32 to vector<4x32xf32>
    %411 = arith.addf %410, %409 : vector<4x32xf32>
    %412 = arith.divf %410, %411 : vector<4x32xf32>
    %413 = vector.extract_strided_slice %400 {offsets = [0, 64], sizes = [4, 32], strides = [1, 1]} : vector<4x128xf32> to vector<4x32xf32>
    %414 = math.tanh %413 : vector<4x32xf32>
    %415 = vector.extract_strided_slice %400 {offsets = [0, 96], sizes = [4, 32], strides = [1, 1]} : vector<4x128xf32> to vector<4x32xf32>
    %416 = arith.negf %415 : vector<4x32xf32>
    %417 = math.exp %416 : vector<4x32xf32>
    %cst_230 = arith.constant 1.000000e+00 : f32
    %418 = vector.broadcast %cst_230 : f32 to vector<4x32xf32>
    %419 = arith.addf %418, %417 : vector<4x32xf32>
    %420 = arith.divf %418, %419 : vector<4x32xf32>
    %421 = arith.mulf %412, %329 : vector<4x32xf32>
    %422 = arith.mulf %406, %414 : vector<4x32xf32>
    %423 = arith.addf %421, %422 : vector<4x32xf32>
    %424 = math.tanh %423 : vector<4x32xf32>
    %425 = arith.mulf %420, %424 : vector<4x32xf32>
    %426 = arith.index_cast %c4_i32 : i32 to index
    %c0_231 = arith.constant 0 : index
    %c0_232 = arith.constant 0 : index
    %427 = vector.load %arg19[%426, %c0_231, %c0_232] : memref<6x4x32xf32, #tpu.memory_space<vmem>>, vector<1x4x32xf32>
    %428 = vector.shape_cast %427 : vector<1x4x32xf32> to vector<4x32xf32>
    %429 = vector.shape_cast %425 : vector<4x32xf32> to vector<1x4x32xf32>
    tpu.vector_store %arg19[%426, %c0_231, %c0_232], %429 {strides = array<i32>} : memref<6x4x32xf32, #tpu.memory_space<vmem>>, vector<1x4x32xf32>,
    %c0_233 = arith.constant 0 : index
    %c0_234 = arith.constant 0 : index
    %430 = vector.load %arg9[%c0_233, %c0_234] : memref<32x32xf32, #tpu.memory_space<vmem>>, vector<32x32xf32>
    %cst_235 = arith.constant dense<0.000000e+00> : vector<4x32xf32>
    %431 = tpu.matmul %425, %430, %cst_235 {dimension_numbers = #tpu.dot_dimension_numbers<[1], [0], [0], [1], [0, 0, 1, 1], [], []>} : vector<4x32xf32>, vector<32x32xf32>, vector<4x32xf32> -> vector<4x32xf32>
    %c0_236 = arith.constant 0 : index
    %c0_237 = arith.constant 0 : index
    %432 = vector.load %arg10[%c0_236, %c0_237] : memref<1x32xf32, #tpu.memory_space<vmem>>, vector<1x32xf32>
    %433 = vector.broadcast %432 : vector<1x32xf32> to vector<4x32xf32>
    %434 = arith.addf %431, %433 : vector<4x32xf32>
    %435 = arith.index_cast %c4_i32 : i32 to index
    %c0_238 = arith.constant 0 : index
    %c0_239 = arith.constant 0 : index
    %436 = vector.load %arg20[%435, %c0_238, %c0_239] : memref<6x4x32xf32, #tpu.memory_space<vmem>>, vector<1x4x32xf32>
    %437 = vector.shape_cast %436 : vector<1x4x32xf32> to vector<4x32xf32>
    %438 = vector.shape_cast %434 : vector<4x32xf32> to vector<1x4x32xf32>
    tpu.vector_store %arg20[%435, %c0_238, %c0_239], %438 {strides = array<i32>} : memref<6x4x32xf32, #tpu.memory_space<vmem>>, vector<1x4x32xf32>,
    %c0_240 = arith.constant 0 : index
    %c0_241 = arith.constant 0 : index
    %c0_242 = arith.constant 0 : index
    %439 = vector.load %arg20[%c0_240, %c0_241, %c0_242] : memref<6x4x32xf32, #tpu.memory_space<vmem>>, vector<6x4x32xf32>
    %440 = vector.shape_cast %425 : vector<4x32xf32> to vector<1x4x32xf32>
    %441 = vector.broadcast %440 : vector<1x4x32xf32> to vector<6x4x32xf32>
    %442 = arith.mulf %439, %441 : vector<6x4x32xf32>
    %cst_243 = arith.constant dense<0.000000e+00> : vector<6x4xf32>
    %443 = vector.multi_reduction <add>, %442, %cst_243 [2] : vector<6x4x32xf32> to vector<6x4xf32>
    %444 = vector.broadcast %c4_i32 : i32 to vector<6x4xi32>
    %445 = arith.cmpi sle, %7, %444 : vector<6x4xi32>
    %446 = arith.addf %443, %6 : vector<6x4xf32>
    %447 = vector.broadcast %cst_14 : f32 to vector<6x4xf32>
    %448 = arith.select %445, %446, %447 : vector<6x4xi1>, vector<6x4xf32>
    %cst_244 = arith.constant dense<0xFF800000> : vector<4xf32>
    %449 = vector.multi_reduction <maximumf>, %448, %cst_244 [0] : vector<6x4xf32> to vector<4xf32>
    %450 = vector.shape_cast %449 : vector<4xf32> to vector<1x4xf32>
    %451 = vector.broadcast %450 : vector<1x4xf32> to vector<6x4xf32>
    %452 = arith.subf %448, %451 : vector<6x4xf32>
    %453 = math.exp %452 : vector<6x4xf32>
    %cst_245 = arith.constant dense<0.000000e+00> : vector<4xf32>
    %454 = vector.multi_reduction <add>, %453, %cst_245 [0] : vector<6x4xf32> to vector<4xf32>
    %455 = vector.shape_cast %454 : vector<4xf32> to vector<1x4xf32>
    %456 = tpu.reciprocal %455 {approx = true} : vector<1x4xf32> -> vector<1x4xf32>
    %457 = vector.broadcast %456 : vector<1x4xf32> to vector<6x4xf32>
    %458 = arith.mulf %453, %457 : vector<6x4xf32>
    %c0_246 = arith.constant 0 : index
    %c0_247 = arith.constant 0 : index
    %c0_248 = arith.constant 0 : index
    %459 = vector.load %arg19[%c0_246, %c0_247, %c0_248] : memref<6x4x32xf32, #tpu.memory_space<vmem>>, vector<6x4x32xf32>
    %460 = vector.shape_cast %458 : vector<6x4xf32> to vector<6x4x1xf32>
    %461 = vector.broadcast %460 : vector<6x4x1xf32> to vector<6x4x32xf32>
    %462 = arith.mulf %459, %461 : vector<6x4x32xf32>
    %cst_249 = arith.constant dense<0.000000e+00> : vector<4x32xf32>
    %463 = vector.multi_reduction <add>, %462, %cst_249 [0] : vector<6x4x32xf32> to vector<4x32xf32>
    %c0_250 = arith.constant 0 : index
    %c0_251 = arith.constant 0 : index
    %464 = vector.load %arg11[%c0_250, %c0_251] : memref<32x32xf32, #tpu.memory_space<vmem>>, vector<32x32xf32>
    %cst_252 = arith.constant dense<0.000000e+00> : vector<4x32xf32>
    %465 = tpu.matmul %425, %464, %cst_252 {dimension_numbers = #tpu.dot_dimension_numbers<[1], [0], [0], [1], [0, 0, 1, 1], [], []>} : vector<4x32xf32>, vector<32x32xf32>, vector<4x32xf32> -> vector<4x32xf32>
    %c0_253 = arith.constant 0 : index
    %c0_254 = arith.constant 0 : index
    %466 = vector.load %arg12[%c0_253, %c0_254] : memref<32x32xf32, #tpu.memory_space<vmem>>, vector<32x32xf32>
    %cst_255 = arith.constant dense<0.000000e+00> : vector<4x32xf32>
    %467 = tpu.matmul %463, %466, %cst_255 {dimension_numbers = #tpu.dot_dimension_numbers<[1], [0], [0], [1], [0, 0, 1, 1], [], []>} : vector<4x32xf32>, vector<32x32xf32>, vector<4x32xf32> -> vector<4x32xf32>
    %468 = arith.addf %465, %467 : vector<4x32xf32>
    %c0_256 = arith.constant 0 : index
    %c0_257 = arith.constant 0 : index
    %469 = vector.load %arg13[%c0_256, %c0_257] : memref<1x32xf32, #tpu.memory_space<vmem>>, vector<1x32xf32>
    %470 = vector.broadcast %469 : vector<1x32xf32> to vector<4x32xf32>
    %471 = arith.addf %468, %470 : vector<4x32xf32>
    %c0_258 = arith.constant 0 : index
    %c0_259 = arith.constant 0 : index
    %472 = vector.load %arg14[%c0_258, %c0_259] : memref<32x16xf32, #tpu.memory_space<vmem>>, vector<32x16xf32>
    %cst_260 = arith.constant dense<0.000000e+00> : vector<4x16xf32>
    %473 = tpu.matmul %471, %472, %cst_260 {dimension_numbers = #tpu.dot_dimension_numbers<[1], [0], [0], [1], [0, 0, 1, 1], [], []>} : vector<4x32xf32>, vector<32x16xf32>, vector<4x16xf32> -> vector<4x16xf32>
    %c0_261 = arith.constant 0 : index
    %c0_262 = arith.constant 0 : index
    %474 = vector.load %arg15[%c0_261, %c0_262] : memref<1x16xf32, #tpu.memory_space<vmem>>, vector<1x16xf32>
    %475 = vector.broadcast %474 : vector<1x16xf32> to vector<4x16xf32>
    %476 = arith.addf %473, %475 : vector<4x16xf32>
    %477 = arith.index_cast %c4_i32 : i32 to index
    %c0_263 = arith.constant 0 : index
    %c0_264 = arith.constant 0 : index
    %478 = vector.load %arg16[%477, %c0_263, %c0_264] : memref<6x4x16xf32, #tpu.memory_space<vmem>>, vector<1x4x16xf32>
    %479 = vector.shape_cast %478 : vector<1x4x16xf32> to vector<4x16xf32>
    %480 = vector.shape_cast %476 : vector<4x16xf32> to vector<1x4x16xf32>
    tpu.vector_store %arg16[%477, %c0_263, %c0_264], %480 {strides = array<i32>} : memref<6x4x16xf32, #tpu.memory_space<vmem>>, vector<1x4x16xf32>,
    %c5_i32 = arith.constant 5 : i32
    %481 = arith.index_cast %c5_i32 : i32 to index
    %c0_265 = arith.constant 0 : index
    %c0_266 = arith.constant 0 : index
    %482 = vector.load %arg1[%481, %c0_265, %c0_266] : memref<6x4x16xf32, #tpu.memory_space<vmem>>, vector<1x4x16xf32>
    %483 = vector.shape_cast %482 : vector<1x4x16xf32> to vector<4x16xf32>
    %c0_267 = arith.constant 0 : index
    %c0_268 = arith.constant 0 : index
    %484 = vector.load %arg5[%c0_267, %c0_268] : memref<16x128xf32, #tpu.memory_space<vmem>>, vector<16x128xf32>
    %cst_269 = arith.constant dense<0.000000e+00> : vector<4x128xf32>
    %485 = tpu.matmul %483, %484, %cst_269 {dimension_numbers = #tpu.dot_dimension_numbers<[1], [0], [0], [1], [0, 0, 1, 1], [], []>} : vector<4x16xf32>, vector<16x128xf32>, vector<4x128xf32> -> vector<4x128xf32>
    %c0_270 = arith.constant 0 : index
    %c0_271 = arith.constant 0 : index
    %486 = vector.load %arg6[%c0_270, %c0_271] : memref<32x128xf32, #tpu.memory_space<vmem>>, vector<32x128xf32>
    %cst_272 = arith.constant dense<0.000000e+00> : vector<4x128xf32>
    %487 = tpu.matmul %471, %486, %cst_272 {dimension_numbers = #tpu.dot_dimension_numbers<[1], [0], [0], [1], [0, 0, 1, 1], [], []>} : vector<4x32xf32>, vector<32x128xf32>, vector<4x128xf32> -> vector<4x128xf32>
    %488 = arith.addf %485, %487 : vector<4x128xf32>
    %c0_273 = arith.constant 0 : index
    %c0_274 = arith.constant 0 : index
    %489 = vector.load %arg7[%c0_273, %c0_274] : memref<32x128xf32, #tpu.memory_space<vmem>>, vector<32x128xf32>
    %cst_275 = arith.constant dense<0.000000e+00> : vector<4x128xf32>
    %490 = tpu.matmul %425, %489, %cst_275 {dimension_numbers = #tpu.dot_dimension_numbers<[1], [0], [0], [1], [0, 0, 1, 1], [], []>} : vector<4x32xf32>, vector<32x128xf32>, vector<4x128xf32> -> vector<4x128xf32>
    %491 = arith.addf %488, %490 : vector<4x128xf32>
    %c0_276 = arith.constant 0 : index
    %c0_277 = arith.constant 0 : index
    %492 = vector.load %arg8[%c0_276, %c0_277] : memref<1x128xf32, #tpu.memory_space<vmem>>, vector<1x128xf32>
    %493 = vector.broadcast %492 : vector<1x128xf32> to vector<4x128xf32>
    %494 = arith.addf %491, %493 : vector<4x128xf32>
    %495 = vector.extract_strided_slice %494 {offsets = [0, 0], sizes = [4, 32], strides = [1, 1]} : vector<4x128xf32> to vector<4x32xf32>
    %496 = arith.negf %495 : vector<4x32xf32>
    %497 = math.exp %496 : vector<4x32xf32>
    %cst_278 = arith.constant 1.000000e+00 : f32
    %498 = vector.broadcast %cst_278 : f32 to vector<4x32xf32>
    %499 = arith.addf %498, %497 : vector<4x32xf32>
    %500 = arith.divf %498, %499 : vector<4x32xf32>
    %501 = vector.extract_strided_slice %494 {offsets = [0, 32], sizes = [4, 32], strides = [1, 1]} : vector<4x128xf32> to vector<4x32xf32>
    %502 = arith.negf %501 : vector<4x32xf32>
    %503 = math.exp %502 : vector<4x32xf32>
    %cst_279 = arith.constant 1.000000e+00 : f32
    %504 = vector.broadcast %cst_279 : f32 to vector<4x32xf32>
    %505 = arith.addf %504, %503 : vector<4x32xf32>
    %506 = arith.divf %504, %505 : vector<4x32xf32>
    %507 = vector.extract_strided_slice %494 {offsets = [0, 64], sizes = [4, 32], strides = [1, 1]} : vector<4x128xf32> to vector<4x32xf32>
    %508 = math.tanh %507 : vector<4x32xf32>
    %509 = vector.extract_strided_slice %494 {offsets = [0, 96], sizes = [4, 32], strides = [1, 1]} : vector<4x128xf32> to vector<4x32xf32>
    %510 = arith.negf %509 : vector<4x32xf32>
    %511 = math.exp %510 : vector<4x32xf32>
    %cst_280 = arith.constant 1.000000e+00 : f32
    %512 = vector.broadcast %cst_280 : f32 to vector<4x32xf32>
    %513 = arith.addf %512, %511 : vector<4x32xf32>
    %514 = arith.divf %512, %513 : vector<4x32xf32>
    %515 = arith.mulf %506, %423 : vector<4x32xf32>
    %516 = arith.mulf %500, %508 : vector<4x32xf32>
    %517 = arith.addf %515, %516 : vector<4x32xf32>
    %518 = math.tanh %517 : vector<4x32xf32>
    %519 = arith.mulf %514, %518 : vector<4x32xf32>
    %520 = arith.index_cast %c5_i32 : i32 to index
    %c0_281 = arith.constant 0 : index
    %c0_282 = arith.constant 0 : index
    %521 = vector.load %arg19[%520, %c0_281, %c0_282] : memref<6x4x32xf32, #tpu.memory_space<vmem>>, vector<1x4x32xf32>
    %522 = vector.shape_cast %521 : vector<1x4x32xf32> to vector<4x32xf32>
    %523 = vector.shape_cast %519 : vector<4x32xf32> to vector<1x4x32xf32>
    tpu.vector_store %arg19[%520, %c0_281, %c0_282], %523 {strides = array<i32>} : memref<6x4x32xf32, #tpu.memory_space<vmem>>, vector<1x4x32xf32>,
    %c0_283 = arith.constant 0 : index
    %c0_284 = arith.constant 0 : index
    %524 = vector.load %arg9[%c0_283, %c0_284] : memref<32x32xf32, #tpu.memory_space<vmem>>, vector<32x32xf32>
    %cst_285 = arith.constant dense<0.000000e+00> : vector<4x32xf32>
    %525 = tpu.matmul %519, %524, %cst_285 {dimension_numbers = #tpu.dot_dimension_numbers<[1], [0], [0], [1], [0, 0, 1, 1], [], []>} : vector<4x32xf32>, vector<32x32xf32>, vector<4x32xf32> -> vector<4x32xf32>
    %c0_286 = arith.constant 0 : index
    %c0_287 = arith.constant 0 : index
    %526 = vector.load %arg10[%c0_286, %c0_287] : memref<1x32xf32, #tpu.memory_space<vmem>>, vector<1x32xf32>
    %527 = vector.broadcast %526 : vector<1x32xf32> to vector<4x32xf32>
    %528 = arith.addf %525, %527 : vector<4x32xf32>
    %529 = arith.index_cast %c5_i32 : i32 to index
    %c0_288 = arith.constant 0 : index
    %c0_289 = arith.constant 0 : index
    %530 = vector.load %arg20[%529, %c0_288, %c0_289] : memref<6x4x32xf32, #tpu.memory_space<vmem>>, vector<1x4x32xf32>
    %531 = vector.shape_cast %530 : vector<1x4x32xf32> to vector<4x32xf32>
    %532 = vector.shape_cast %528 : vector<4x32xf32> to vector<1x4x32xf32>
    tpu.vector_store %arg20[%529, %c0_288, %c0_289], %532 {strides = array<i32>} : memref<6x4x32xf32, #tpu.memory_space<vmem>>, vector<1x4x32xf32>,
    %c0_290 = arith.constant 0 : index
    %c0_291 = arith.constant 0 : index
    %c0_292 = arith.constant 0 : index
    %533 = vector.load %arg20[%c0_290, %c0_291, %c0_292] : memref<6x4x32xf32, #tpu.memory_space<vmem>>, vector<6x4x32xf32>
    %534 = vector.shape_cast %519 : vector<4x32xf32> to vector<1x4x32xf32>
    %535 = vector.broadcast %534 : vector<1x4x32xf32> to vector<6x4x32xf32>
    %536 = arith.mulf %533, %535 : vector<6x4x32xf32>
    %cst_293 = arith.constant dense<0.000000e+00> : vector<6x4xf32>
    %537 = vector.multi_reduction <add>, %536, %cst_293 [2] : vector<6x4x32xf32> to vector<6x4xf32>
    %538 = vector.broadcast %c5_i32 : i32 to vector<6x4xi32>
    %539 = arith.cmpi sle, %7, %538 : vector<6x4xi32>
    %540 = arith.addf %537, %6 : vector<6x4xf32>
    %541 = vector.broadcast %cst_14 : f32 to vector<6x4xf32>
    %542 = arith.select %539, %540, %541 : vector<6x4xi1>, vector<6x4xf32>
    %cst_294 = arith.constant dense<0xFF800000> : vector<4xf32>
    %543 = vector.multi_reduction <maximumf>, %542, %cst_294 [0] : vector<6x4xf32> to vector<4xf32>
    %544 = vector.shape_cast %543 : vector<4xf32> to vector<1x4xf32>
    %545 = vector.broadcast %544 : vector<1x4xf32> to vector<6x4xf32>
    %546 = arith.subf %542, %545 : vector<6x4xf32>
    %547 = math.exp %546 : vector<6x4xf32>
    %cst_295 = arith.constant dense<0.000000e+00> : vector<4xf32>
    %548 = vector.multi_reduction <add>, %547, %cst_295 [0] : vector<6x4xf32> to vector<4xf32>
    %549 = vector.shape_cast %548 : vector<4xf32> to vector<1x4xf32>
    %550 = tpu.reciprocal %549 {approx = true} : vector<1x4xf32> -> vector<1x4xf32>
    %551 = vector.broadcast %550 : vector<1x4xf32> to vector<6x4xf32>
    %552 = arith.mulf %547, %551 : vector<6x4xf32>
    %c0_296 = arith.constant 0 : index
    %c0_297 = arith.constant 0 : index
    %c0_298 = arith.constant 0 : index
    %553 = vector.load %arg19[%c0_296, %c0_297, %c0_298] : memref<6x4x32xf32, #tpu.memory_space<vmem>>, vector<6x4x32xf32>
    %554 = vector.shape_cast %552 : vector<6x4xf32> to vector<6x4x1xf32>
    %555 = vector.broadcast %554 : vector<6x4x1xf32> to vector<6x4x32xf32>
    %556 = arith.mulf %553, %555 : vector<6x4x32xf32>
    %cst_299 = arith.constant dense<0.000000e+00> : vector<4x32xf32>
    %557 = vector.multi_reduction <add>, %556, %cst_299 [0] : vector<6x4x32xf32> to vector<4x32xf32>
    %c0_300 = arith.constant 0 : index
    %c0_301 = arith.constant 0 : index
    %558 = vector.load %arg11[%c0_300, %c0_301] : memref<32x32xf32, #tpu.memory_space<vmem>>, vector<32x32xf32>
    %cst_302 = arith.constant dense<0.000000e+00> : vector<4x32xf32>
    %559 = tpu.matmul %519, %558, %cst_302 {dimension_numbers = #tpu.dot_dimension_numbers<[1], [0], [0], [1], [0, 0, 1, 1], [], []>} : vector<4x32xf32>, vector<32x32xf32>, vector<4x32xf32> -> vector<4x32xf32>
    %c0_303 = arith.constant 0 : index
    %c0_304 = arith.constant 0 : index
    %560 = vector.load %arg12[%c0_303, %c0_304] : memref<32x32xf32, #tpu.memory_space<vmem>>, vector<32x32xf32>
    %cst_305 = arith.constant dense<0.000000e+00> : vector<4x32xf32>
    %561 = tpu.matmul %557, %560, %cst_305 {dimension_numbers = #tpu.dot_dimension_numbers<[1], [0], [0], [1], [0, 0, 1, 1], [], []>} : vector<4x32xf32>, vector<32x32xf32>, vector<4x32xf32> -> vector<4x32xf32>
    %562 = arith.addf %559, %561 : vector<4x32xf32>
    %c0_306 = arith.constant 0 : index
    %c0_307 = arith.constant 0 : index
    %563 = vector.load %arg13[%c0_306, %c0_307] : memref<1x32xf32, #tpu.memory_space<vmem>>, vector<1x32xf32>
    %564 = vector.broadcast %563 : vector<1x32xf32> to vector<4x32xf32>
    %565 = arith.addf %562, %564 : vector<4x32xf32>
    %c0_308 = arith.constant 0 : index
    %c0_309 = arith.constant 0 : index
    %566 = vector.load %arg14[%c0_308, %c0_309] : memref<32x16xf32, #tpu.memory_space<vmem>>, vector<32x16xf32>
    %cst_310 = arith.constant dense<0.000000e+00> : vector<4x16xf32>
    %567 = tpu.matmul %565, %566, %cst_310 {dimension_numbers = #tpu.dot_dimension_numbers<[1], [0], [0], [1], [0, 0, 1, 1], [], []>} : vector<4x32xf32>, vector<32x16xf32>, vector<4x16xf32> -> vector<4x16xf32>
    %c0_311 = arith.constant 0 : index
    %c0_312 = arith.constant 0 : index
    %568 = vector.load %arg15[%c0_311, %c0_312] : memref<1x16xf32, #tpu.memory_space<vmem>>, vector<1x16xf32>
    %569 = vector.broadcast %568 : vector<1x16xf32> to vector<4x16xf32>
    %570 = arith.addf %567, %569 : vector<4x16xf32>
    %571 = arith.index_cast %c5_i32 : i32 to index
    %c0_313 = arith.constant 0 : index
    %c0_314 = arith.constant 0 : index
    %572 = vector.load %arg16[%571, %c0_313, %c0_314] : memref<6x4x16xf32, #tpu.memory_space<vmem>>, vector<1x4x16xf32>
    %573 = vector.shape_cast %572 : vector<1x4x16xf32> to vector<4x16xf32>
    %574 = vector.shape_cast %570 : vector<4x16xf32> to vector<1x4x16xf32>
    tpu.vector_store %arg16[%571, %c0_313, %c0_314], %574 {strides = array<i32>} : memref<6x4x16xf32, #tpu.memory_space<vmem>>, vector<1x4x16xf32>,
    %c6_i32 = arith.constant 6 : i32
    %c0_315 = arith.constant 0 : index
    %c0_316 = arith.constant 0 : index
    %575 = vector.load %arg17[%c0_315, %c0_316] : memref<4x32xf32, #tpu.memory_space<vmem>>, vector<4x32xf32>
    tpu.vector_store %arg17[%c0_315, %c0_316], %519 {strides = array<i32>} : memref<4x32xf32, #tpu.memory_space<vmem>>, vector<4x32xf32>,
    %c0_317 = arith.constant 0 : index
    %c0_318 = arith.constant 0 : index
    %576 = vector.load %arg18[%c0_317, %c0_318] : memref<4x32xf32, #tpu.memory_space<vmem>>, vector<4x32xf32>
    tpu.vector_store %arg18[%c0_317, %c0_318], %517 {strides = array<i32>} : memref<4x32xf32, #tpu.memory_space<vmem>>, vector<4x32xf32>,
    return
  }
  func.func @transform_0(%arg0: i32) -> (i32, i32, i32) {
    %c0_i32 = arith.constant 0 : i32
    %c0_i32_0 = arith.constant 0 : i32
    %c0_i32_1 = arith.constant 0 : i32
    %c0_i32_2 = arith.constant 0 : i32
    return %c0_i32, %c0_i32_0, %c0_i32_1 : i32, i32, i32
  }
  func.func @transform_1(%arg0: i32) -> (i32, i32) {
    %c0_i32 = arith.constant 0 : i32
    %c0_i32_0 = arith.constant 0 : i32
    %c0_i32_1 = arith.constant 0 : i32
    return %c0_i32, %c0_i32_0 : i32, i32
  }
  func.func @transform_2(%arg0: i32) -> (i32, i32) {
    %c0_i32 = arith.constant 0 : i32
    %c0_i32_0 = arith.constant 0 : i32
    %c0_i32_1 = arith.constant 0 : i32
    return %c0_i32, %c0_i32_0 : i32, i32
  }
  func.func @transform_3(%arg0: i32) -> (i32, i32) {
    %c0_i32 = arith.constant 0 : i32
    %c0_i32_0 = arith.constant 0 : i32
    %c0_i32_1 = arith.constant 0 : i32
    return %c0_i32, %c0_i32_0 : i32, i32
  }
  func.func @transform_4(%arg0: i32) -> (i32, i32) {
    %c0_i32 = arith.constant 0 : i32
    %c0_i32_0 = arith.constant 0 : i32
    %c0_i32_1 = arith.constant 0 : i32
    return %c0_i32, %c0_i32_0 : i32, i32
  }
  func.func @transform_5(%arg0: i32) -> (i32, i32) {
    %c0_i32 = arith.constant 0 : i32
    %c0_i32_0 = arith.constant 0 : i32
    %c0_i32_1 = arith.constant 0 : i32
    return %c0_i32, %c0_i32_0 : i32, i32
  }
  func.func @transform_6(%arg0: i32) -> (i32, i32) {
    %c0_i32 = arith.constant 0 : i32
    %c0_i32_0 = arith.constant 0 : i32
    %c0_i32_1 = arith.constant 0 : i32
    return %c0_i32, %c0_i32_0 : i32, i32
  }
  func.func @transform_7(%arg0: i32) -> (i32, i32) {
    %c0_i32 = arith.constant 0 : i32
    %c0_i32_0 = arith.constant 0 : i32
    %c0_i32_1 = arith.constant 0 : i32
    return %c0_i32, %c0_i32_0 : i32, i32
  }
  func.func @transform_8(%arg0: i32) -> (i32, i32) {
    %c0_i32 = arith.constant 0 : i32
    %c0_i32_0 = arith.constant 0 : i32
    %c0_i32_1 = arith.constant 0 : i32
    return %c0_i32, %c0_i32_0 : i32, i32
  }
  func.func @transform_9(%arg0: i32) -> (i32, i32) {
    %c0_i32 = arith.constant 0 : i32
    %c0_i32_0 = arith.constant 0 : i32
    %c0_i32_1 = arith.constant 0 : i32
    return %c0_i32, %c0_i32_0 : i32, i32
  }
  func.func @transform_10(%arg0: i32) -> (i32, i32) {
    %c0_i32 = arith.constant 0 : i32
    %c0_i32_0 = arith.constant 0 : i32
    %c0_i32_1 = arith.constant 0 : i32
    return %c0_i32, %c0_i32_0 : i32, i32
  }
  func.func @transform_11(%arg0: i32) -> (i32, i32) {
    %c0_i32 = arith.constant 0 : i32
    %c0_i32_0 = arith.constant 0 : i32
    %c0_i32_1 = arith.constant 0 : i32
    return %c0_i32, %c0_i32_0 : i32, i32
  }
  func.func @transform_12(%arg0: i32) -> (i32, i32) {
    %c0_i32 = arith.constant 0 : i32
    %c0_i32_0 = arith.constant 0 : i32
    %c0_i32_1 = arith.constant 0 : i32
    return %c0_i32, %c0_i32_0 : i32, i32
  }
  func.func @transform_13(%arg0: i32) -> (i32, i32) {
    %c0_i32 = arith.constant 0 : i32
    %c0_i32_0 = arith.constant 0 : i32
    %c0_i32_1 = arith.constant 0 : i32
    return %c0_i32, %c0_i32_0 : i32, i32
  }
  func.func @transform_14(%arg0: i32) -> (i32, i32) {
    %c0_i32 = arith.constant 0 : i32
    %c0_i32_0 = arith.constant 0 : i32
    %c0_i32_1 = arith.constant 0 : i32
    return %c0_i32, %c0_i32_0 : i32, i32
  }
  func.func @transform_15(%arg0: i32) -> (i32, i32, i32) {
    %c0_i32 = arith.constant 0 : i32
    %c0_i32_0 = arith.constant 0 : i32
    %c0_i32_1 = arith.constant 0 : i32
    %c0_i32_2 = arith.constant 0 : i32
    return %c0_i32, %c0_i32_0, %c0_i32_1 : i32, i32, i32
  }
  func.func @transform_16(%arg0: i32) -> (i32, i32) {
    %c0_i32 = arith.constant 0 : i32
    %c0_i32_0 = arith.constant 0 : i32
    %c0_i32_1 = arith.constant 0 : i32
    return %c0_i32, %c0_i32_0 : i32, i32
  }
  func.func @transform_17(%arg0: i32) -> (i32, i32) {
    %c0_i32 = arith.constant 0 : i32
    %c0_i32_0 = arith.constant 0 : i32
    %c0_i32_1 = arith.constant 0 : i32
    return %c0_i32, %c0_i32_0 : i32, i32
  }
}

</mosaic_0001>

<bundles_post_ra>
// kernel: decoder_forward.1
= control target key start
LH: loop header
LB: loop body
LE: loop exit
PB: predicated region body
PF: predicated region fallthrough
CT: control target
= control target key end

     0   :  { %s7526_s0 = inlined_call_operand.hbm [shape: f32[6,4,16], index: 0, kind: input, shape index: {}]   ;;  %s7527_s1 = inlined_call_operand.vmem [shape: f32[6,4], index: 1, kind: input, shape index: {}]   ;;  %s7528_s2 = inlined_call_operand.hbm [shape: f32[4,32], index: 2, kind: input, shape index: {}]   ;;  %s7529_s3 = inlined_call_operand.hbm [shape: f32[4,32], index: 3, kind: input, shape index: {}]   ;;  %s7530_s4 = inlined_call_operand.hbm [shape: f32[16,128], index: 4, kind: input, shape index: {}]   ;;  %s7531_s5 = inlined_call_operand.vmem [shape: f32[32,128], index: 5, kind: input, shape index: {}]   ;;  %s7532_s6 = inlined_call_operand.vmem [shape: f32[32,128], index: 6, kind: input, shape index: {}]   ;;  %s7533_s7 = inlined_call_operand.hbm [shape: f32[1,128], index: 7, kind: input, shape index: {}]   ;;  %s7534_s8 = inlined_call_operand.vmem [shape: f32[32,32], index: 8, kind: input, shape index: {}]   ;;  %s7535_s9 = inlined_call_operand.hbm [shape: f32[1,32], index: 9, kind: input, shape index: {}]   ;;  %s7536_s10 = inlined_call_operand.hbm [shape: f32[32,32], index: 10, kind: input, shape index: {}]   ;;  %s7537_s11 = inlined_call_operand.hbm [shape: f32[32,32], index: 11, kind: input, shape index: {}]   ;;  %s7538_s12 = inlined_call_operand.hbm [shape: f32[1,32], index: 12, kind: input, shape index: {}]   ;;  %s7539_s13 = inlined_call_operand.vmem [shape: f32[32,16], index: 13, kind: input, shape index: {}]   ;;  %s7540_s14 = inlined_call_operand.hbm [shape: f32[1,16], index: 14, kind: input, shape index: {}]   ;;  %s7541_s15 = inlined_call_operand.hbm [shape: f32[6,4,16], index: 15, kind: output, shape index: {0}]   ;;  %s7542_s16 = inlined_call_operand.hbm [shape: f32[4,32], index: 16, kind: output, shape index: {1}]   ;;  %s7543_s17 = inlined_call_operand.hbm [shape: f32[4,32], index: 17, kind: output, shape index: {2}]  }
   0x1   :  { %7545 = sst [smem:[#allocation33_spill]] %s7526_s0 }
   0x2   :  { %7546 = sst [smem:[#allocation34_spill]] %s7527_s1 }
   0x3   :  { %23 = vsyncpa [#allocation5], 0 }
   0x4   :  { %24 = vsyncpa [#allocation8], 0 }
   0x5   :  { %25 = vsyncpa [#allocation11], 0 }
   0x6   :  { %26 = vsyncpa [#allocation14], 0 }
   0x7   :  { %27 = vsyncpa [#allocation17], 0 }
   0x8   :  { %28 = vsyncpa [#allocation20], 0 }
   0x9   :  { %29 = vsyncpa [#allocation6], 0 }
   0xa   :  { %30 = vsyncpa [#allocation23], 0  ;;  %s6279_s24 = smov [#allocation7]   ;;  %s6280_s26 = smov [#allocation10]  }
   0xb   :  { %s51_s25 = sshll.u32 %s6279_s24, 4  ;;  %s70_s27 = sshll.u32 %s6280_s26, 4  ;;  %s52_s25 = int_to_ptr.vmem [resolvable:$true] %s51_s25  ;;  %s6392_s27 = int_to_ptr.vmem [resolvable:$true] %s70_s27 }
   0xc   :  { %s5977_s0 = scalar_lea.hbm %s7528_s2, 64 }
   0xd   :  { %p5978_p0 = scmp.ne.s32.totalorder %s7528_s2, %s5977_s0  ;;  %p5981_p1 = scmp.lt.u32.totalorder %s5977_s0, %s7528_s2 }
   0xf   :  { %p5983_p2 = pnand %p5981_p1, %p5978_p0 }
  0x11   :  { %5986 = shalt.err (!%p5983_p2)
}
  0x12   :  { %s5987_s20 = scalar_lea.vmem %s52_s25, 64  ;;  %p5992_p4 = scmp.lt.s32.totalorder %s52_s25, %s52_s25 }
  0x13   :  { %p5988_p3 = scmp.ne.s32.totalorder %s52_s25, %s5987_s20  ;;  %p5993_p5 = scmp.lt.s32.totalorder %s5987_s20, %s5987_s20 }
  0x15   :  { %p5994_p6 = por %p5993_p5, %p5992_p4 }
  0x17   :  { %p5995_p7 = pnand %p5994_p6, %p5988_p3 }
  0x19   :  { %5998 = shalt.err (!%p5995_p7)
}
  0x1a   :  { %54 = dma.hbm_to_vmem [thread:$0]  %s7528_s2, 64, %s52_s25, [#allocation8]  }
  0x1b   :  { %s5999_s26 = scalar_lea.hbm %s7530_s4, 256 }
  0x1c   :  { %p6000_p8 = scmp.ne.s32.totalorder %s7530_s4, %s5999_s26  ;;  %p6003_p9 = scmp.lt.u32.totalorder %s5999_s26, %s7530_s4 }
  0x1e   :  { %p6005_p10 = pnand %p6003_p9, %p6000_p8 }
  0x20   :  { %6008 = shalt.err (!%p6005_p10)
}
  0x21   :  { %s6009_s18 = scalar_lea.vmem %s6392_s27, 256  ;;  %p6014_p12 = scmp.lt.s32.totalorder %s6392_s27, %s6392_s27 }
  0x22   :  { %p6010_p11 = scmp.ne.s32.totalorder %s6392_s27, %s6009_s18  ;;  %p6015_p13 = scmp.lt.s32.totalorder %s6009_s18, %s6009_s18 }
  0x24   :  { %p6016_p0 = por %p6015_p13, %p6014_p12 }
  0x26   :  { %p6017_p1 = pnand %p6016_p0, %p6010_p11 }
  0x28   :  { %6020 = shalt.err (!%p6017_p1)
}
  0x29   :  { %s6281_s2 = smov 128   ;;  %s6282_s25 = smov 8  }
  0x2a   :  { %76 = dma.hbm_to_vmem [thread:$0]  %s7530_s4, 256, %s6392_s27, [#allocation11], %s6281_s2, %s6281_s2, %s6282_s25  }
  0x2b   :  { %s6283_s20 = smov [#allocation13]   ;;  %s6284_s22 = smov [#allocation16]  }
  0x2c   :  { %s99_s21 = sshll.u32 %s6283_s20, 4  ;;  %s120_s23 = sshll.u32 %s6284_s22, 4  ;;  %s100_s21 = int_to_ptr.vmem [resolvable:$true] %s99_s21  ;;  %s6426_s23 = int_to_ptr.vmem [resolvable:$true] %s120_s23 }
  0x2d   :  { %s6021_s28 = scalar_lea.hbm %s7535_s9, 16 }
  0x2e   :  { %p6022_p2 = scmp.ne.s32.totalorder %s7535_s9, %s6021_s28  ;;  %p6025_p3 = scmp.lt.u32.totalorder %s6021_s28, %s7535_s9 }
  0x30   :  { %p6027_p4 = pnand %p6025_p3, %p6022_p2 }
  0x32   :  { %6030 = shalt.err (!%p6027_p4)
}
  0x33   :  { %s6031_s4 = scalar_lea.vmem %s100_s21, 16  ;;  %s6035_s27 = scalar_lea.vmem %s100_s21, 32 }
  0x34   :  { %p6032_p5 = scmp.ne.s32.totalorder %s100_s21, %s6031_s4  ;;  %p6036_p6 = scmp.lt.s32.totalorder %s100_s21, %s100_s21 }
  0x35   :  { %p6037_p7 = scmp.lt.s32.totalorder %s6035_s27, %s6031_s4 }
  0x37   :  { %p6038_p8 = por %p6037_p7, %p6036_p6 }
  0x39   :  { %p6039_p9 = pnand %p6038_p8, %p6032_p5 }
  0x3b   :  { %6042 = shalt.err (!%p6039_p9)
}
  0x3c   :  { %102 = dma.hbm_to_vmem [thread:$0]  %s7535_s9, 16, %s100_s21, [#allocation14]  }
  0x3d   :  { %s6043_s24 = scalar_lea.hbm %s7537_s11, 512 }
  0x3e   :  { %p6044_p10 = scmp.ne.s32.totalorder %s7537_s11, %s6043_s24  ;;  %p6047_p11 = scmp.lt.u32.totalorder %s6043_s24, %s7537_s11 }
  0x40   :  { %p6049_p12 = pnand %p6047_p11, %p6044_p10 }
  0x42   :  { %6052 = shalt.err (!%p6049_p12)
}
  0x43   :  { %s6053_s30 = scalar_lea.vmem %s6426_s23, 512  ;;  %p6058_p0 = scmp.lt.s32.totalorder %s6426_s23, %s6426_s23 }
  0x44   :  { %p6054_p13 = scmp.ne.s32.totalorder %s6426_s23, %s6053_s30  ;;  %p6059_p1 = scmp.lt.s32.totalorder %s6053_s30, %s6053_s30 }
  0x46   :  { %p6060_p2 = por %p6059_p1, %p6058_p0 }
  0x48   :  { %p6061_p3 = pnand %p6060_p2, %p6054_p13 }
  0x4a   :  { %6064 = shalt.err (!%p6061_p3)
}
  0x4b   :  { %126 = dma.hbm_to_vmem [thread:$0]  %s7537_s11, 512, %s6426_s23, [#allocation17], %s6281_s2, %s6281_s2, %s6282_s25  }
  0x4c   :  { %s6285_s18 = smov [#allocation4]   ;;  %s7547_s1 = sld [smem:[#allocation33_spill]] }
  0x4d   :  { %s36_s4 = sshll.u32 %s6285_s18, 4  ;;  %s37_s4 = int_to_ptr.vmem [resolvable:$true] %s36_s4 }
  0x52   :  { %s6065_s20 = scalar_lea.hbm %s7547_s1, 384 }
  0x53   :  { %p6066_p4 = scmp.ne.s32.totalorder %s7547_s1, %s6065_s20  ;;  %p6069_p5 = scmp.lt.u32.totalorder %s6065_s20, %s7547_s1 }
  0x55   :  { %p6071_p6 = pnand %p6069_p5, %p6066_p4 }
  0x57   :  { %6074 = shalt.err (!%p6071_p6)
}
  0x58   :  { %s6075_s29 = scalar_lea.vmem %s37_s4, 384  ;;  %p6080_p8 = scmp.lt.s32.totalorder %s37_s4, %s37_s4 }
  0x59   :  { %p6076_p7 = scmp.ne.s32.totalorder %s37_s4, %s6075_s29  ;;  %p6081_p9 = scmp.lt.s32.totalorder %s6075_s29, %s6075_s29 }
  0x5b   :  { %p6082_p10 = por %p6081_p9, %p6080_p8 }
  0x5d   :  { %p6083_p11 = pnand %p6082_p10, %p6076_p7 }
  0x5f   :  { %6086 = shalt.err (!%p6083_p11)
}
  0x60   :  { %s6286_s11 = smov 64   ;;  %s6287_s23 = smov 4  }
  0x61   :  { %42 = dma.hbm_to_vmem [thread:$0]  %s7547_s1, 384, %s37_s4, [#allocation5], %s6286_s11, %s6286_s11, %s6287_s23  }
  0x62   :  { %s6288_s9 = smov [#allocation9]   ;;  %s6289_s18 = smov [#allocation12]  }
  0x63   :  { %s61_s21 = sshll.u32 %s6288_s9, 4  ;;  %s87_s27 = sshll.u32 %s6289_s18, 4  ;;  %s62_s21 = int_to_ptr.vmem [resolvable:$true] %s61_s21  ;;  %s88_s27 = int_to_ptr.vmem [resolvable:$true] %s87_s27 }
  0x64   :  { %s6087_s22 = scalar_lea.hbm %s7529_s3, 64 }
  0x65   :  { %p6088_p12 = scmp.ne.s32.totalorder %s7529_s3, %s6087_s22  ;;  %p6091_p13 = scmp.lt.u32.totalorder %s6087_s22, %s7529_s3 }
  0x67   :  { %p6093_p0 = pnand %p6091_p13, %p6088_p12 }
  0x69   :  { %6096 = shalt.err (!%p6093_p0)
}
  0x6a   :  { %s6097_s4 = scalar_lea.vmem %s62_s21, 64  ;;  %p6102_p2 = scmp.lt.s32.totalorder %s62_s21, %s62_s21 }
  0x6b   :  { %p6098_p1 = scmp.ne.s32.totalorder %s62_s21, %s6097_s4  ;;  %p6103_p3 = scmp.lt.s32.totalorder %s6097_s4, %s6097_s4 }
  0x6d   :  { %p6104_p4 = por %p6103_p3, %p6102_p2 }
  0x6f   :  { %p6105_p5 = pnand %p6104_p4, %p6098_p1 }
  0x71   :  { %6108 = shalt.err (!%p6105_p5)
}
  0x72   :  { %64 = dma.hbm_to_vmem [thread:$0]  %s7529_s3, 64, %s62_s21, [#allocation8]  }
  0x73   :  { %s6109_s18 = scalar_lea.hbm %s7533_s7, 16 }
  0x74   :  { %p6110_p6 = scmp.ne.s32.totalorder %s7533_s7, %s6109_s18  ;;  %p6113_p7 = scmp.lt.u32.totalorder %s6109_s18, %s7533_s7 }
  0x76   :  { %p6115_p8 = pnand %p6113_p7, %p6110_p6 }
  0x78   :  { %6118 = shalt.err (!%p6115_p8)
}
  0x79   :  { %s6119_s26 = scalar_lea.vmem %s88_s27, 16  ;;  %s6123_s28 = scalar_lea.vmem %s88_s27, 32 }
  0x7a   :  { %p6120_p9 = scmp.ne.s32.totalorder %s88_s27, %s6119_s26  ;;  %p6124_p10 = scmp.lt.s32.totalorder %s88_s27, %s88_s27 }
  0x7b   :  { %p6125_p11 = scmp.lt.s32.totalorder %s6123_s28, %s6119_s26 }
  0x7d   :  { %p6126_p12 = por %p6125_p11, %p6124_p10 }
  0x7f   :  { %p6127_p13 = pnand %p6126_p12, %p6120_p9 }
  0x81   :  { %6130 = shalt.err (!%p6127_p13)
}
  0x82   :  { %90 = dma.hbm_to_vmem [thread:$0]  %s7533_s7, 16, %s88_s27, [#allocation11]  }
  0x83   :  { %s6290_s29 = smov [#allocation15]   ;;  %s6291_s1 = smov [#allocation18]  }
  0x84   :  { %s108_s4 = sshll.u32 %s6290_s29, 4  ;;  %s133_s0 = sshll.u32 %s6291_s1, 4  ;;  %s109_s4 = int_to_ptr.vmem [resolvable:$true] %s108_s4  ;;  %s134_s0 = int_to_ptr.vmem [resolvable:$true] %s133_s0 }
  0x85   :  { %s6131_s18 = scalar_lea.hbm %s7536_s10, 512 }
  0x86   :  { %p6132_p0 = scmp.ne.s32.totalorder %s7536_s10, %s6131_s18  ;;  %p6135_p1 = scmp.lt.u32.totalorder %s6131_s18, %s7536_s10 }
  0x88   :  { %p6137_p2 = pnand %p6135_p1, %p6132_p0 }
  0x8a   :  { %6140 = shalt.err (!%p6137_p2)
}
  0x8b   :  { %s6141_s7 = scalar_lea.vmem %s109_s4, 512  ;;  %p6146_p4 = scmp.lt.s32.totalorder %s109_s4, %s109_s4 }
  0x8c   :  { %p6142_p3 = scmp.ne.s32.totalorder %s109_s4, %s6141_s7  ;;  %p6147_p5 = scmp.lt.s32.totalorder %s6141_s7, %s6141_s7 }
  0x8e   :  { %p6148_p6 = por %p6147_p5, %p6146_p4 }
  0x90   :  { %p6149_p7 = pnand %p6148_p6, %p6142_p3 }
  0x92   :  { %6152 = shalt.err (!%p6149_p7)
}
  0x93   :  { %114 = dma.hbm_to_vmem [thread:$0]  %s7536_s10, 512, %s109_s4, [#allocation14], %s6281_s2, %s6281_s2, %s6282_s25  }
  0x94   :  { %s6153_s21 = scalar_lea.hbm %s7538_s12, 16 }
  0x95   :  { %p6154_p8 = scmp.ne.s32.totalorder %s7538_s12, %s6153_s21  ;;  %p6157_p9 = scmp.lt.u32.totalorder %s6153_s21, %s7538_s12 }
  0x97   :  { %p6159_p10 = pnand %p6157_p9, %p6154_p8 }
  0x99   :  { %6162 = shalt.err (!%p6159_p10)
}
  0x9a   :  { %s6163_s18 = scalar_lea.vmem %s134_s0, 16  ;;  %s6167_s19 = scalar_lea.vmem %s134_s0, 32 }
  0x9b   :  { %p6164_p11 = scmp.ne.s32.totalorder %s134_s0, %s6163_s18  ;;  %p6168_p12 = scmp.lt.s32.totalorder %s134_s0, %s134_s0 }
  0x9c   :  { %p6169_p13 = scmp.lt.s32.totalorder %s6167_s19, %s6163_s18 }
  0x9e   :  { %p6170_p0 = por %p6169_p13, %p6168_p12 }
  0xa0   :  { %p6171_p1 = pnand %p6170_p0, %p6164_p11 }
  0xa2   :  { %6174 = shalt.err (!%p6171_p1)
}
  0xa3   :  { %136 = dma.hbm_to_vmem [thread:$0]  %s7538_s12, 16, %s134_s0, [#allocation17]  }
  0xa4   :  { %s6292_s25 = smov [#allocation19]   ;;  %s6175_s24 = scalar_lea.hbm %s7540_s14, 16 }
  0xa5   :  { %s145_s4 = sshll.u32 %s6292_s25, 4  ;;  %p6176_p2 = scmp.ne.s32.totalorder %s7540_s14, %s6175_s24  ;;  %s146_s4 = int_to_ptr.vmem [resolvable:$true] %s145_s4 }
  0xa6   :  { %p6179_p3 = scmp.lt.u32.totalorder %s6175_s24, %s7540_s14 }
  0xa8   :  { %p6181_p4 = pnand %p6179_p3, %p6176_p2 }
  0xaa   :  { %6184 = shalt.err (!%p6181_p4)
}
  0xab   :  { %s6185_s3 = scalar_lea.vmem %s146_s4, 16  ;;  %s6189_s12 = scalar_lea.vmem %s146_s4, 32 }
  0xac   :  { %p6186_p5 = scmp.ne.s32.totalorder %s146_s4, %s6185_s3  ;;  %p6190_p6 = scmp.lt.s32.totalorder %s146_s4, %s146_s4 }
  0xad   :  { %p6191_p7 = scmp.lt.s32.totalorder %s6189_s12, %s6185_s3 }
  0xaf   :  { %p6192_p8 = por %p6191_p7, %p6190_p6 }
  0xb1   :  { %p6193_p9 = pnand %p6192_p8, %p6186_p5 }
  0xb3   :  { %6196 = shalt.err (!%p6193_p9)
}
  0xb4   :  { %148 = dma.hbm_to_vmem [thread:$0]  %s7540_s14, 16, %s146_s4, [#allocation20]  }
  0xb5   :  { %6263 = dma.done.wait [#allocation5], 384  }
  0xb6   :  { %6264 = vsyncadd [#allocation5], 4294966912 }
  0xb7   :  { %6265 = dma.done.wait [#allocation8], 128  }
  0xb8   :  { %6266 = vsyncadd [#allocation8], 4294967168 }
  0xb9   :  { %6267 = dma.done.wait [#allocation11], 272  }
  0xba   :  { %6268 = vsyncadd [#allocation11], 4294967024 }
  0xbb   :  { %6269 = dma.done.wait [#allocation14], 528  }
  0xbc   :  { %6270 = vsyncadd [#allocation14], 4294966768 }
  0xbd   :  { %6271 = dma.done.wait [#allocation17], 528  }
  0xbe   :  { %6272 = vsyncadd [#allocation17], 4294966768 }
  0xbf   :  { %6273 = dma.done.wait [#allocation20], 16  }
  0xc0   :  { %6274 = vsyncadd [#allocation20], 4294967280  ;;  %v6293_v0 = vmov 0.0|0.0   ;;  %vm6294_vm0 = vmmov 0   ;;  %v6295_v1 = vmov 0.0   ;;  %v201_v2 = vld [vmem:[%s7531_s5] sm:$0xff]  ;;  %v194_v41 = vlaneseq }
  0xc1   :  { %5646 = vmatprep.subr.bf16.mxu0 %v6293_v0  ;;  %5652 = vmatprep.subr.bf16.mxu1 %v6293_v0  ;;  %v202_v3 = vld [vmem:[%s7531_s5 + $0x8] sm:$0xff]  ;;  %v199_v4 = vld [vmem:[#allocation10] sm:$0xff]  ;;  %v200_v6 = vld [vmem:[#allocation10 + $0x8] sm:$0xff]  ;;  %vm279_vm1 = vcmask 130048   ;;  %vm205_vm2 = vcmask 261120   ;;  %s6296_s26 = smov 32  }
  0xc2   :  { %5223 = vmatprep.mubr.msk.f32.mxu1 %vm6294_vm0, %v6295_v1  ;;  %5216 = vmatprep.mubr.msk.f32.mxu0 %vm6294_vm0, %v6295_v1  ;;  %v6550_v5 = vpack.c.bf16 %v202_v3, %v201_v2  ;;  %v203_v7 = vld [vmem:[%s7531_s5 + $0x10] sm:$0xff]  ;;  %v6555_v8 = vpack.c.bf16 %v200_v6, %v199_v4  ;;  %v204_v9 = vld [vmem:[%s7531_s5 + $0x18] sm:$0xff]  ;;  %v353_v10 = vld [vmem:[%s7532_s6] sm:$0xff]  ;;  %v6607_v42 = vshrl.u32 %v194_v41, 7  ;;  %s7548_s12 = sld [smem:[#allocation34_spill]]  ;;  %vm179_vm3 = vcmask 257024  }
  0xc3   :  { %v354_v11 = vld [vmem:[%s7532_s6 + $0x8] sm:$0xff]  ;;  %v6567_v12 = vpack.c.bf16 %v204_v9, %v203_v7  ;;  %v198_v13 = vld [vmem:[#allocation4] sm:$0xf]  ;;  %v356_v16 = vld [vmem:[%s7532_s6 + $0x18] sm:$0xff]  ;;  %189 = vst.msk [vmem:[#allocation3 + $0xc] sm:$0xf] %vm179_vm3, %v6295_v1 }
  0xc4   :  { %5648 = vmatpush3.bf16.msra.mxu0 %v6550_v5  ;;  %5654 = vmatpush3.bf16.msra.mxu1 %v6555_v8  ;;  %v6571_v14 = vpack.c.bf16 %v354_v11, %v353_v10  ;;  %v355_v15 = vld [vmem:[%s7532_s6 + $0x10] sm:$0xff]  ;;  %v196_v18 = vld [vmem:[#allocation7] sm:$0xf]  ;;  %v6597_v25 = vld [vmem:[#allocation12] ss:$0 sm:$0xff]  ;;  %v6615_v45 = vsub.s32 1, %v6607_v42 }
  0xc5   :  { %5649 = vmatprep.subr.bf16.mxu0 %v6293_v0  ;;  %5655 = vmatprep.subr.bf16.mxu1 %v6293_v0  ;;  %v6583_v17 = vpack.c.bf16 %v356_v16, %v355_v15  ;;  %v197_v30 = vld [vmem:[#allocation9] sm:$0xf]  ;;  %v472_v46 = vld [vmem:[%s7534_s8] sm:$0xff]  ;;  %v474_v48 = vld [vmem:[%s7534_s8 + $0x10] sm:$0xff]  ;;  %v6635_v53 = vsub.s32 2, %v6607_v42  ;;  %v6670_v56 = vsub.s32 0, %v6607_v42 }
  0xc6   :  { %v473_v47 = vld [vmem:[%s7534_s8 + $0x8] sm:$0xff]  ;;  %v475_v50 = vld [vmem:[%s7534_s8 + $0x18] sm:$0xff]  ;;  %180 = vst.msk [vmem:[#allocation2] sm:$0xf] %vm179_vm3, %v6295_v1  ;;  %181 = vst.msk [vmem:[#allocation2 + $0x4] sm:$0xf] %vm179_vm3, %v6295_v1 }
  0xc7   :  { %5224 = vmatmul.mubr.msk.f32.vlgmr.msra.gmra.mrb[0].mxu1 %vm279_vm1, %v198_v13  ;;  %v6626_v49 = vpack.c.bf16 %v473_v47, %v472_v46  ;;  %v6638_v54 = vpack.c.bf16 %v475_v50, %v474_v48  ;;  %182 = vst.msk [vmem:[#allocation2 + $0x8] sm:$0xf] %vm179_vm3, %v6295_v1  ;;  %183 = vst.msk [vmem:[#allocation2 + $0xc] sm:$0xf] %vm179_vm3, %v6295_v1  ;;  %v6676_v60 = vsub.s32 3, %v6607_v42  ;;  %v789_v62 = vld [vmem:[#allocation15] sm:$0xff] }
  0xc8   :  { %5651 = vmatpush3.bf16.msra.mxu0 %v6567_v12  ;;  %5657 = vmatpush3.bf16.msra.mxu1 %v6571_v14  ;;  %v192_v43 = vld [vmem:[%s7548_s12] sm:$0x3f]  ;;  %184 = vst.msk [vmem:[#allocation2 + $0x10] sm:$0xf] %vm179_vm3, %v6295_v1  ;;  %185 = vst.msk [vmem:[#allocation2 + $0x14] sm:$0xf] %vm179_vm3, %v6295_v1 }
  0xc9   :  { %5234 = vmatprep.mubr.msk.f32.mxu1 %vm6294_vm0, %v6295_v1  ;;  %5658 = vmatprep.subr.bf16.mxu1 %v6293_v0  ;;  %v6612_v44 = vmul.f32 -99999.0, %v192_v43  ;;  %186 = vst.msk [vmem:[#allocation3] sm:$0xf] %vm179_vm3, %v6295_v1  ;;  %187 = vst.msk [vmem:[#allocation3 + $0x4] sm:$0xf] %vm179_vm3, %v6295_v1 }
  0xca   :  { %5661 = vmatprep.subr.bf16.mxu0 %v6293_v0  ;;  %188 = vst.msk [vmem:[#allocation3 + $0x8] sm:$0xf] %vm179_vm3, %v6295_v1  ;;  %190 = vst.msk [vmem:[#allocation3 + $0x10] sm:$0xf] %vm179_vm3, %v6295_v1  ;;  %v790_v63 = vld [vmem:[#allocation15 + $0x8] sm:$0xff]  ;;  %v791_v6 = vld [vmem:[#allocation15 + $0x10] sm:$0xff] }
  0xcb   :  { %5217 = vmatmul.mubr.f32.vlgmr.msra.gmra.mrb[0].mxu0 %v6295_v1  ;;  %v598_v52 = vrot.slane %v6612_v44, %v6615_v45  ;;  %v605_v55 = vrot.slane %v6612_v44, %v6635_v53  ;;  %191 = vst.msk [vmem:[#allocation3 + $0x14] sm:$0xf] %vm179_vm3, %v6295_v1  ;;  %v591_v59 = vrot.slane %v6612_v44, %v6670_v56  ;;  %v559_v3 = vld [vmem:[#allocation3 + $0xc] sm:$0xf]  ;;  %v792_v7 = vld [vmem:[#allocation15 + $0x18] sm:$0xff]  ;;  %v6735_v48 = vsub.s32 4, %v6607_v42 }
  0xcc   :  { %5245 = vmatprep.mubr.msk.f32.mxu0 %vm6294_vm0, %v6295_v1  ;;  %5660 = vmatpush3.bf16.msra.mxu1 %v6583_v17  ;;  %v612_v61 = vrot.slane %v6612_v44, %v6676_v60  ;;  %v6680_v2 = vpack.c.bf16 %v790_v63, %v789_v62  ;;  %v6691_v16 = vpack.c.bf16 %v792_v7, %v791_v6  ;;  %vm692_vm4 = vcmask 1041409  }
  0xcd   :  { %5667 = vmatprep.subr.bf16.mxu1 %v6293_v0  ;;  %5663 = vmatpush3.bf16.msra.mxu0 %v6626_v49  ;;  %v619_v50 = vrot.slane %v6612_v44, %v6735_v48  ;;  %vm694_vm5 = vcmask 1042434   ;;  %vm696_vm6 = vcmask 1043459   ;;  %vm698_vm7 = vcmask 1044484  }
  0xce   :  { %5664 = vmatprep.subr.bf16.mxu0 %v6293_v0  ;;  %vm700_vm8 = vcmask 1045509   ;;  %vm586_vm9 = vcmp.le.s32.totalorder %v6607_v42, 0  ;;  %vm704_vm10 = vcmask 29696   ;;  %vm1032_vm11 = vcmask 125952  }
  0xcf   :  { %5235 = vmatmul.mubr.msk.f32.vlgmr.msra.gmra.mrb[2].mxu1 %vm205_vm2, %v196_v18  ;;  %vm1413_vm12 = vcmp.le.s32.totalorder %v6607_v42, 1  ;;  %vm2183_vm13 = vcmp.le.s32.totalorder %v6607_v42, 2  ;;  %vm2953_vm14 = vcmp.le.s32.totalorder %v6607_v42, 3  ;;  %vm3723_vm15 = vcmp.le.s32.totalorder %v6607_v42, 4 }
  0xd0   :  { %5256 = vmatprep.mubr.msk.f32.mxu1 %vm6294_vm0, %v6295_v1  ;;  %v557_v4 = vld [vmem:[#allocation3 + $0x4] sm:$0xf] }
  0xd1   :  { %5666 = vmatpush3.bf16.msra.mxu0 %v6638_v54  ;;  %v558_v11 = vld [vmem:[#allocation3 + $0x8] sm:$0xf] }
  0xd2   :  { %5673 = vmatprep.subr.bf16.mxu0 %v6293_v0  ;;  %v561_v10 = vld [vmem:[#allocation3 + $0x14] sm:$0xf] }
 0x19a   :  { %v349_v19 = vpop.f32.mrb[0].mxu1 }
 0x19b   :  { %v5225_v20 = vpop.f32.mrb[1].mxu1 }
 0x19e   :  { %v275_v21 = vpop.f32.mrb[0].mxu0 }
 0x19f   :  { %v350_v22 = vadd.f32 %v349_v19, %v275_v21  ;;  %v5218_v23 = vpop.f32.mrb[1].mxu0 }
 0x1a2   :  { %v426_v24 = vpop.f32.mrb[2].mxu1 }
 0x1a3   :  { %v430_v26 = vadd.f32 %v426_v24, %v350_v22  ;;  %v5236_v27 = vpop.f32.mrb[3].mxu1  ;;  %v560_v22 = vld [vmem:[#allocation3 + $0x10] sm:$0xf] }
 0x1a5   :  { %v438_v28 = vadd.f32 %v6597_v25, %v430_v26 }
 0x1a7   :  { %5905 = vtanh.f32 %v438_v28  ;;  %v4942_v31 = vmul.f32 -1.442695, %v438_v28  ;;  %v6297_v28 = vmov 0  }
 0x1a8   :  { %5903 = vset.pattern.permute.xlu0 %v6297_v28  ;;  %5904 = vset.pattern.permute.xlu1 %v6297_v28 }
 0x1a9   :  { %5907 = vpow2.f32 %v4942_v31 }
 0x1b1   :  { %v5906_v29 = vpop.eup %5905 }
 0x1b2   :  { %452 = vrot.lane.b32.xlu0 %v5906_v29, %s6286_s11  ;;  %v6715_v29 = vsub.s32 5, %v6607_v42 }
 0x1b3   :  { %v5908_v32 = vpop.eup %5907 }
 0x1b4   :  { %v442_v33 = vadd.f32 1.0, %v5908_v32 }
 0x1b6   :  { %447 = vrot.lane.b32.xlu0 %v197_v30, %s6296_s26  ;;  %5909 = vrcp.f32 %v442_v33 }
 0x1c0   :  { %v5910_v34 = vpop.eup %5909 }
 0x224   :  { %v453_v35 = vpop.permute.xlu0 %452 }
 0x225   :  { %v455_v36 = vmul.f32 %v5910_v34, %v453_v35 }
 0x227   :  { %457 = vrot.lane.b32.xlu1 %v455_v36, %s6296_s26 }
 0x228   :  { %v448_v37 = vpop.permute.xlu0 %447 }
 0x229   :  { %v450_v38 = vmul.f32 %v5910_v34, %v448_v37 }
 0x299   :  { %v458_v39 = vpop.permute.xlu1 %457 }
 0x29a   :  { %v6603_v40 = vadd.f32 %v458_v39, %v450_v38 }
 0x29c   :  { %5911 = vtanh.f32 %v6603_v40 }
 0x2a6   :  { %v5912_v51 = vpop.eup %5911 }
 0x2a7   :  { %463 = vrot.lane.b32.xlu1 %v5912_v51, %s6286_s11 }
 0x2ab   :  { %600 = vbcast.lane.b32.xlu1 %v598_v52, 256 }
 0x2af   :  { %607 = vbcast.lane.b32.xlu1 %v605_v55, 256 }
 0x319   :  { %v464_v57 = vpop.permute.xlu1 %463 }
 0x31a   :  { %v466_v58 = vmul.f32 %v5910_v34, %v464_v57  ;;  %v6726_v34 = vld [vmem:[#allocation13] ss:$0 sm:$0xff] }
 0x31c   :  { %468 = vrot.lane.b32.xlu0 %v466_v58, %s6296_s26 }
 0x31d   :  { %v6723_v32 = vpop.permute.xlu1 %600 }
 0x320   :  { %593 = vbcast.lane.b32.xlu0 %v591_v59, 256 }
 0x321   :  { %v6739_v51 = vpop.permute.xlu1 %607 }
 0x324   :  { %614 = vbcast.lane.b32.xlu0 %v612_v61, 256 }
 0x38e   :  { %v6682_v9 = vpop.permute.xlu0 %468 }
 0x38f   :  { %5246 = vmatmul.mubr.msk.f32.vlgmr.msra.gmra.mrb[2].mxu0 %vm205_vm2, %v6682_v9  ;;  %v565_v13 = vmul.f32 %v559_v3, %v6682_v9  ;;  %v563_v15 = vmul.f32 %v557_v4, %v6682_v9  ;;  %471 = vst.msk [vmem:[#allocation2] sm:$0xf] %vm179_vm3, %v6682_v9  ;;  %v567_v20 = vmul.f32 %v561_v10, %v6682_v9  ;;  %v667_v10 = vand.u32 127, %v194_v41 }
 0x390   :  { %5675 = vmatpush3.bf16.msra.mxu0 %v6680_v2  ;;  %5267 = vmatprep.mubr.msk.f32.mxu0 %vm6294_vm0, %v6295_v1  ;;  %v564_v21 = vmul.f32 %v558_v11, %v6682_v9  ;;  %v566_v26 = vmul.f32 %v560_v22, %v6682_v9 }
 0x391   :  { %5676 = vmatprep.subr.bf16.mxu0 %v6293_v0  ;;  %v577_v18 = vsel %vm179_vm3, %v565_v13, 0.0  ;;  %v571_v19 = vsel %vm179_vm3, %v563_v15, 0.0  ;;  %v583_v23 = vsel %vm179_vm3, %v567_v20, 0.0  ;;  %v6752_v13 = vsub.s32 %v667_v10, %v6607_v42  ;;  %v794_v10 = vld [vmem:[#allocation16 + $0x8] sm:$0xff] }
 0x392   :  { %578 = vadd.xlane.f32.xlu1 %v577_v18  ;;  %572 = vadd.xlane.f32.xlu0 %v571_v19  ;;  %v574_v24 = vsel %vm179_vm3, %v564_v21, 0.0  ;;  %v580_v27 = vsel %vm179_vm3, %v566_v26, 0.0  ;;  %v6719_v30 = vpop.permute.xlu0 %593 }
 0x394   :  { %5678 = vmatpush3.bf16.msra.mxu0 %v6691_v16 }
 0x395   :  { %5685 = vmatprep.subr.bf16.mxu0 %v6293_v0 }
 0x396   :  { %584 = vadd.xlane.f32.xlu1 %v583_v23  ;;  %575 = vadd.xlane.f32.xlu0 %v574_v24  ;;  %v6721_v31 = vpop.permute.xlu0 %614 }
 0x397   :  { %5268 = vmatmul.mubr.msk.f32.vlgmr.msra.gmra.mrb[4].mxu0 %vm205_vm2, %v6682_v9 }
 0x398   :  { %5687 = vmatpush3.bf16.msra.mxu0 %v6550_v5  ;;  %5289 = vmatprep.mubr.msk.f32.mxu0 %vm6294_vm0, %v6295_v1  ;;  %v626_v5 = vrot.slane %v6612_v44, %v6715_v29 }
 0x399   :  { %5688 = vmatprep.subr.bf16.mxu0 %v6293_v0 }
 0x39a   :  { %581 = vadd.xlane.f32.xlu0 %v580_v27 }
 0x39c   :  { %5690 = vmatpush3.bf16.msra.mxu0 %v6567_v12 }
 0x39d   :  { %5694 = vmatprep.subr.bf16.mxu0 %v6293_v0 }
 0x3b0   :  { %628 = vbcast.lane.b32.xlu0 %v626_v5, 256 }
 0x41f   :  { %v573_v33 = vpop.xlane.xlu0 %572  ;;  %v579_v57 = vpop.xlane.xlu1 %578 }
 0x420   :  { %v637_v12 = vadd.f32 %v6723_v32, %v573_v33  ;;  %v639_v58 = vadd.f32 %v6721_v31, %v579_v57 }
 0x422   :  { %652 = vperm.xlu0 %5903, %v637_v12  }
 0x423   :  { %v576_v52 = vpop.xlane.xlu0 %575  ;;  %v585_v59 = vpop.xlane.xlu1 %584 }
 0x424   :  { %v638_v55 = vadd.f32 %v6739_v51, %v576_v52 }
 0x427   :  { %v582_v61 = vpop.xlane.xlu0 %581 }
 0x42b   :  { %v6744_v3 = vpop.permute.xlu0 %628 }
 0x42c   :  { %v641_v4 = vadd.f32 %v6744_v3, %v585_v59 }
 0x462   :  { %v551_v35 = vpop.f32.mrb[2].mxu0 }
 0x463   :  { %v552_v36 = vadd.f32 %v6726_v34, %v551_v35  ;;  %v5247_v37 = vpop.f32.mrb[3].mxu0 }
 0x465   :  { %555 = vst.msk [vmem:[#allocation3] sm:$0xf] %vm179_vm3, %v552_v36 }
 0x46a   :  { %v6730_v38 = vpop.f32.mrb[4].mxu0 }
 0x46b   :  { %v5269_v39 = vpop.f32.mrb[5].mxu0 }
 0x46c   :  { %v556_v43 = vld [vmem:[#allocation3] sm:$0xf] }
 0x46d   :  { %v562_v46 = vmul.f32 %v556_v43, %v6682_v9 }
 0x46f   :  { %v568_v47 = vsel %vm179_vm3, %v562_v46, 0.0 }
 0x470   :  { %569 = vadd.xlane.f32.xlu1 %v568_v47 }
 0x481   :  { %621 = vbcast.lane.b32.xlu1 %v619_v50, 256 }
 0x485   :  { %655 = vperm.xlu1 %5904, %v638_v55  }
 0x489   :  { %658 = vperm.xlu1 %5904, %v639_v58  }
 0x4a1   :  { %v653_v15 = vpop.permute.xlu0 %652 }
 0x4a2   :  { %v675_v19 = vrot.slane %v653_v15, %v6752_v13 }
 0x4fd   :  { %v570_v62 = vpop.xlane.xlu1 %569 }
 0x4fe   :  { %v636_v63 = vadd.f32 %v6719_v30, %v570_v62 }
 0x500   :  { %649 = vperm.xlu1 %5904, %v636_v63  }
 0x501   :  { %v6746_v44 = vpop.permute.xlu1 %621 }
 0x502   :  { %v640_v6 = vadd.f32 %v6746_v44, %v582_v61 }
 0x504   :  { %664 = vperm.xlu1 %5904, %v641_v4   ;;  %661 = vperm.xlu0 %5903, %v640_v6  }
 0x505   :  { %v656_v7 = vpop.permute.xlu1 %655 }
 0x506   :  { %v679_v21 = vrot.slane %v656_v7, %v6752_v13  ;;  %v793_v7 = vld [vmem:[#allocation16] sm:$0xff] }
 0x509   :  { %v659_v11 = vpop.permute.xlu1 %658 }
 0x50a   :  { %v683_v22 = vrot.slane %v659_v11, %v6752_v13  ;;  %v6768_v11 = vpack.c.bf16 %v794_v10, %v793_v7 }
 0x50c   :  { %5669 = vmatpush3.bf16.msra.mxu1 %v6768_v11 }
 0x50d   :  { %5670 = vmatprep.subr.bf16.mxu1 %v6293_v0 }
 0x57f   :  { %v650_v18 = vpop.permute.xlu1 %649 }
 0x580   :  { %v671_v20 = vrot.slane %v650_v18, %v6752_v13 }
 0x582   :  { %v693_v23 = vsel %vm692_vm4, %v675_v19, %v671_v20  ;;  %v795_v19 = vld [vmem:[#allocation16 + $0x10] sm:$0xff]  ;;  %v796_v20 = vld [vmem:[#allocation16 + $0x18] sm:$0xff] }
 0x583   :  { %v695_v41 = vsel %vm694_vm5, %v679_v21, %v693_v23  ;;  %v662_v24 = vpop.permute.xlu0 %661  ;;  %v665_v26 = vpop.permute.xlu1 %664  ;;  %v6774_v23 = vpack.c.bf16 %v796_v20, %v795_v19  ;;  %v949_v19 = vld [vmem:[%s7539_s13 + $0x8] sm:$0xff] }
 0x584   :  { %v687_v27 = vrot.slane %v662_v24, %v6752_v13  ;;  %v697_v28 = vsel %vm696_vm6, %v683_v22, %v695_v41  ;;  %v691_v5 = vrot.slane %v665_v26, %v6752_v13 }
 0x585   :  { %5672 = vmatpush3.bf16.msra.mxu1 %v6774_v23 }
 0x586   :  { %v699_v33 = vsel %vm698_vm7, %v687_v27, %v697_v28  ;;  %5679 = vmatprep.subr.bf16.mxu1 %v6293_v0  ;;  %v725_v28 = vld [vmem:[#allocation2 + $0x4] sm:$0xf] }
 0x587   :  { %v701_v12 = vsel %vm700_vm8, %v691_v5, %v699_v33 }
 0x588   :  { %v703_v35 = vsel %vm586_vm9, %v701_v12, -inf  ;;  %v724_v12 = vld [vmem:[#allocation2] sm:$0xf] }
 0x589   :  { %v705_v36 = vsel %vm704_vm10, %v703_v35, -inf }
 0x58a   :  { %v706_v37 = vrot.slane %v705_v36, 4 }
 0x58c   :  { %v707_v39 = vmax.f32 %v705_v36, %v706_v37  ;;  %v727_v37 = vld [vmem:[#allocation2 + $0xc] sm:$0xf] }
 0x58e   :  { %v708_v43 = vrot.slane %v707_v39, 2 }
 0x590   :  { %v709_v46 = vmax.f32 %v707_v39, %v708_v43  ;;  %v726_v39 = vld [vmem:[#allocation2 + $0x8] sm:$0xf] }
 0x592   :  { %v710_v47 = vrot.slane %v709_v46, 1 }
 0x594   :  { %v711_v50 = vmax.f32 %v709_v46, %v710_v47 }
 0x596   :  { %v712_v52 = vsub.f32 %v703_v35, %v711_v50 }
 0x598   :  { %v713_v55 = vmul.f32 1.442695, %v712_v52 }
 0x59a   :  { %5913 = vpow2.f32 %v713_v55 }
 0x5a4   :  { %v5914_v57 = vpop.eup %5913 }
 0x5a5   :  { %v715_v58 = vsel %vm704_vm10, %v5914_v57, 0.0 }
 0x5a6   :  { %v716_v59 = vrot.slane %v715_v58, 4 }
 0x5a8   :  { %v717_v61 = vadd.f32 %v716_v59, %v715_v58  ;;  %v729_v58 = vld [vmem:[#allocation2 + $0x14] sm:$0xf]  ;;  %v728_v59 = vld [vmem:[#allocation2 + $0x10] sm:$0xf] }
 0x5aa   :  { %v718_v62 = vrot.slane %v717_v61, 2 }
 0x5ac   :  { %v719_v63 = vadd.f32 %v718_v62, %v717_v61 }
 0x5ae   :  { %v720_v4 = vrot.slane %v719_v63, 1 }
 0x5b0   :  { %v721_v6 = vadd.f32 %v720_v4, %v719_v63 }
 0x5b2   :  { %5915 = vrcp.f32 %v721_v6 }
 0x5bc   :  { %v5916_v15 = vpop.eup %5915 }
 0x5bd   :  { %v723_v18 = vmul.f32 %v5916_v15, %v5914_v57 }
 0x5bf   :  { %v740_v21 = vrot.slane %v723_v18, %v6615_v45  ;;  %v733_v22 = vrot.slane %v723_v18, %v6670_v56  ;;  %v754_v41 = vrot.slane %v723_v18, %v6676_v60  ;;  %v747_v24 = vrot.slane %v723_v18, %v6635_v53 }
 0x5c0   :  { %v768_v26 = vrot.slane %v723_v18, %v6715_v29  ;;  %v761_v27 = vrot.slane %v723_v18, %v6735_v48  ;;  %v948_v18 = vld [vmem:[%s7539_s13] sm:$0xff] }
 0x5c1   :  { %742 = vbcast.lane.b32.xlu1 %v740_v21, 256  ;;  %735 = vbcast.lane.b32.xlu0 %v733_v22, 256 }
 0x5c5   :  { %756 = vbcast.lane.b32.xlu1 %v754_v41, 256  ;;  %749 = vbcast.lane.b32.xlu0 %v747_v24, 256  ;;  %v6794_v41 = vpack.c.bf16 %v949_v19, %v948_v18  ;;  %v1383_v19 = vld [vmem:[#allocation3] sm:$0xf] }
 0x5c9   :  { %770 = vbcast.lane.b32.xlu1 %v768_v26, 256  ;;  %763 = vbcast.lane.b32.xlu0 %v761_v27, 256  ;;  %v950_v26 = vld [vmem:[%s7539_s13 + $0x10] sm:$0xff]  ;;  %v951_v27 = vld [vmem:[%s7539_s13 + $0x18] sm:$0xff] }
 0x633   :  { %v743_v5 = vpop.permute.xlu1 %742  ;;  %v736_v33 = vpop.permute.xlu0 %735 }
 0x634   :  { %v773_v35 = vmul.f32 %v743_v5, %v725_v28  ;;  %v772_v36 = vmul.f32 %v736_v33, %v724_v12  ;;  %v6807_v28 = vpack.c.bf16 %v951_v27, %v950_v26  ;;  %v6811_v33 = vld [vmem:[#allocation18] ss:$0 sm:$0xff] }
 0x636   :  { %v779_v43 = vsel %vm179_vm3, %v773_v35, 0.0  ;;  %v778_v46 = vsel %vm179_vm3, %v772_v36, 0.0 }
 0x637   :  { %v757_v47 = vpop.permute.xlu1 %756  ;;  %v750_v50 = vpop.permute.xlu0 %749  ;;  %v780_v57 = vadd.f32 %v779_v43, %v778_v46 }
 0x638   :  { %v775_v52 = vmul.f32 %v757_v47, %v727_v37  ;;  %v774_v55 = vmul.f32 %v750_v50, %v726_v39  ;;  %v1035_v37 = vld [vmem:[#allocation4 + $0x4] sm:$0xf] }
 0x63a   :  { %v781_v61 = vsel %vm179_vm3, %v774_v55, 0.0  ;;  %v783_v6 = vsel %vm179_vm3, %v775_v52, 0.0 }
 0x63b   :  { %v782_v62 = vadd.f32 %v781_v61, %v780_v57  ;;  %v771_v63 = vpop.permute.xlu1 %770  ;;  %v764_v4 = vpop.permute.xlu0 %763 }
 0x63c   :  { %v777_v7 = vmul.f32 %v771_v63, %v729_v58  ;;  %v776_v10 = vmul.f32 %v764_v4, %v728_v59 }
 0x63d   :  { %v784_v15 = vadd.f32 %v783_v6, %v782_v62 }
 0x63e   :  { %v785_v20 = vsel %vm179_vm3, %v776_v10, 0.0  ;;  %v787_v22 = vsel %vm179_vm3, %v777_v7, 0.0 }
 0x63f   :  { %v786_v21 = vadd.f32 %v785_v20, %v784_v15  ;;  %v1385_v20 = vld [vmem:[#allocation3 + $0x8] sm:$0xf] }
 0x641   :  { %v788_v24 = vadd.f32 %v787_v22, %v786_v21 }
 0x643   :  { %5257 = vmatmul.mubr.msk.f32.vlgmr.msra.gmra.mrb[4].mxu1 %vm205_vm2, %v788_v24  ;;  %v1386_v24 = vld [vmem:[#allocation3 + $0xc] sm:$0xf] }
 0x644   :  { %5681 = vmatpush3.bf16.msra.mxu1 %v6794_v41  ;;  %5278 = vmatprep.mubr.msk.f32.mxu1 %vm6294_vm0, %v6295_v1 }
 0x645   :  { %5682 = vmatprep.subr.bf16.mxu1 %v6293_v0 }
 0x648   :  { %5684 = vmatpush3.bf16.msra.mxu1 %v6807_v28 }
 0x649   :  { %5691 = vmatprep.subr.bf16.mxu1 %v6293_v0 }
 0x716   :  { %v866_v5 = vpop.f32.mrb[4].mxu1 }
 0x717   :  { %v937_v12 = vadd.f32 %v6730_v38, %v866_v5  ;;  %v5258_v35 = vpop.f32.mrb[5].mxu1 }
 0x719   :  { %v947_v36 = vadd.f32 %v6811_v33, %v937_v12 }
 0x71b   :  { %5279 = vmatmul.mubr.msk.f32.vlgmr.msra.gmra.mrb[6].mxu1 %vm205_vm2, %v947_v36  ;;  %5290 = vmatmul.mubr.msk.f32.vlgmr.msra.gmra.mrb[6].mxu0 %vm205_vm2, %v947_v36 }
 0x71c   :  { %5696 = vmatpush3.bf16.msra.mxu0 %v6571_v14  ;;  %5693 = vmatpush3.bf16.msra.mxu1 %v6555_v8  ;;  %v6842_v8 = vld [vmem:[#allocation19] ss:$0 sm:$0xff] }
 0x71d   :  { %5296 = vmatprep.mubr.msk.f32.mxu1 %vm6294_vm0, %v6295_v1  ;;  %5697 = vmatprep.subr.bf16.mxu0 %v6293_v0 }
 0x71e   :  { %5307 = vmatprep.mubr.msk.f32.mxu0 %vm6294_vm0, %v6295_v1  ;;  %5700 = vmatprep.subr.bf16.mxu1 %v6293_v0 }
 0x71f   :  { %5297 = vmatmul.mubr.msk.f32.vlgmr.msra.gmra.mrb[8].mxu1 %vm279_vm1, %v1035_v37 }
 0x720   :  { %5699 = vmatpush3.bf16.msra.mxu0 %v6583_v17  ;;  %5702 = vmatpush3.bf16.msra.mxu1 %v6626_v49 }
 0x721   :  { %5703 = vmatprep.subr.bf16.mxu1 %v6293_v0  ;;  %5318 = vmatprep.mubr.msk.f32.mxu1 %vm6294_vm0, %v6295_v1 }
 0x722   :  { %5706 = vmatprep.subr.bf16.mxu0 %v6293_v0 }
 0x723   :  { %5308 = vmatmul.mubr.msk.f32.vlgmr.msra.gmra.mrb[8].mxu0 %vm205_vm2, %v6682_v9 }
 0x724   :  { %5705 = vmatpush3.bf16.msra.mxu1 %v6638_v54  ;;  %5708 = vmatpush3.bf16.msra.mxu0 %v6768_v11 }
 0x725   :  { %5712 = vmatprep.subr.bf16.mxu1 %v6293_v0  ;;  %5709 = vmatprep.subr.bf16.mxu0 %v6293_v0 }
 0x726   :  { %5329 = vmatprep.mubr.msk.f32.mxu0 %vm6294_vm0, %v6295_v1 }
 0x728   :  { %5711 = vmatpush3.bf16.msra.mxu0 %v6774_v23 }
 0x729   :  { %5718 = vmatprep.subr.bf16.mxu0 %v6293_v0 }
 0x7ee   :  { %v1028_v14 = vpop.f32.mrb[6].mxu1  ;;  %v1108_v17 = vpop.f32.mrb[6].mxu0 }
 0x7ef   :  { %v1029_v49 = vadd.f32 %v6842_v8, %v1028_v14  ;;  %v5280_v54 = vpop.f32.mrb[7].mxu1  ;;  %v5291_v9 = vpop.f32.mrb[7].mxu0 }
 0x7f0   :  { %v1387_v54 = vld [vmem:[#allocation3 + $0x10] sm:$0xf] }
 0x7f1   :  { %1033 = vst.msk [vmem:[#allocation21] sm:$0xf] %vm1032_vm11, %v1029_v49 }
 0x7f2   :  { %v1181_v38 = vpop.f32.mrb[8].mxu1 }
 0x7f3   :  { %v1182_v39 = vadd.f32 %v1181_v38, %v1108_v17  ;;  %v5298_v43 = vpop.f32.mrb[9].mxu1 }
 0x7f6   :  { %v1255_v46 = vpop.f32.mrb[8].mxu0 }
 0x7f7   :  { %v1259_v47 = vadd.f32 %v1255_v46, %v1182_v39  ;;  %v5309_v50 = vpop.f32.mrb[9].mxu0 }
 0x7f9   :  { %v1267_v52 = vadd.f32 %v6597_v25, %v1259_v47 }
 0x7fb   :  { %5917 = vtanh.f32 %v1267_v52  ;;  %v4954_v57 = vmul.f32 -1.442695, %v1267_v52 }
 0x7fd   :  { %5919 = vpow2.f32 %v4954_v57 }
 0x805   :  { %v5918_v55 = vpop.eup %5917 }
 0x806   :  { %1277 = vrot.lane.b32.xlu0 %v5918_v55, %s6286_s11 }
 0x807   :  { %v5920_v58 = vpop.eup %5919 }
 0x808   :  { %v1271_v59 = vadd.f32 1.0, %v5920_v58 }
 0x80a   :  { %5921 = vrcp.f32 %v1271_v59 }
 0x814   :  { %v5922_v61 = vpop.eup %5921 }
 0x815   :  { %v1275_v4 = vmul.f32 %v5922_v61, %v6603_v40 }
 0x878   :  { %v1278_v62 = vpop.permute.xlu0 %1277 }
 0x879   :  { %v1280_v63 = vmul.f32 %v5922_v61, %v1278_v62 }
 0x87b   :  { %1282 = vrot.lane.b32.xlu1 %v1280_v63, %s6296_s26 }
 0x8ed   :  { %v1283_v6 = vpop.permute.xlu1 %1282 }
 0x8ee   :  { %v6850_v7 = vadd.f32 %v1283_v6, %v1275_v4 }
 0x8f0   :  { %5923 = vtanh.f32 %v6850_v7 }
 0x8fa   :  { %v5924_v25 = vpop.eup %5923 }
 0x8fb   :  { %1288 = vrot.lane.b32.xlu0 %v5924_v25, %s6286_s11 }
 0x96d   :  { %v1289_v10 = vpop.permute.xlu0 %1288 }
 0x96e   :  { %v1291_v15 = vmul.f32 %v5922_v61, %v1289_v10 }
 0x970   :  { %1293 = vrot.lane.b32.xlu1 %v1291_v15, %s6296_s26 }
 0x9e2   :  { %v6855_v18 = vpop.permute.xlu1 %1293 }
 0x9e3   :  { %1297 = vst.msk [vmem:[#allocation2 + $0x4] sm:$0xf] %vm179_vm3, %v6855_v18  ;;  %5319 = vmatmul.mubr.msk.f32.vlgmr.msra.gmra.mrb[10].mxu1 %vm205_vm2, %v6855_v18  ;;  %v1389_v40 = vmul.f32 %v1383_v19, %v6855_v18  ;;  %v1391_v22 = vmul.f32 %v1385_v20, %v6855_v18  ;;  %v1392_v27 = vmul.f32 %v1386_v24, %v6855_v18 }
 0x9e4   :  { %5714 = vmatpush3.bf16.msra.mxu1 %v6680_v2  ;;  %5340 = vmatprep.mubr.msk.f32.mxu1 %vm6294_vm0, %v6295_v1  ;;  %v1388_v2 = vld [vmem:[#allocation3 + $0x14] sm:$0xf]  ;;  %v1393_v39 = vmul.f32 %v1387_v54, %v6855_v18 }
 0x9e5   :  { %5715 = vmatprep.subr.bf16.mxu1 %v6293_v0  ;;  %v1395_v21 = vsel %vm179_vm3, %v1389_v40, 0.0  ;;  %v1401_v26 = vsel %vm179_vm3, %v1391_v22, 0.0  ;;  %v1404_v5 = vsel %vm179_vm3, %v1392_v27, 0.0  ;;  %v1394_v12 = vmul.f32 %v1388_v2, %v6855_v18 }
 0x9e6   :  { %1396 = vadd.xlane.f32.xlu0 %v1395_v21  ;;  %v1407_v43 = vsel %vm179_vm3, %v1393_v39, 0.0 }
 0x9e8   :  { %5717 = vmatpush3.bf16.msra.mxu1 %v6691_v16  ;;  %v1410_v16 = vsel %vm179_vm3, %v1394_v12, 0.0 }
 0x9e9   :  { %5724 = vmatprep.subr.bf16.mxu1 %v6293_v0 }
 0x9ea   :  { %1402 = vadd.xlane.f32.xlu0 %v1401_v26 }
 0x9eb   :  { %5341 = vmatmul.mubr.msk.f32.vlgmr.msra.gmra.mrb[12].mxu1 %vm205_vm2, %v6855_v18 }
 0x9ec   :  { %5362 = vmatprep.mubr.msk.f32.mxu1 %vm6294_vm0, %v6295_v1 }
 0x9ee   :  { %1405 = vadd.xlane.f32.xlu0 %v1404_v5 }
 0x9f2   :  { %1411 = vadd.xlane.f32.xlu0 %v1410_v16 }
 0xa73   :  { %v1397_v46 = vpop.xlane.xlu0 %1396 }
 0xa74   :  { %v1414_v50 = vadd.f32 %v1397_v46, %v6719_v30 }
 0xa77   :  { %v1403_v47 = vpop.xlane.xlu0 %1402 }
 0xa78   :  { %v1416_v55 = vadd.f32 %v1403_v47, %v6739_v51 }
 0xa7b   :  { %v1406_v52 = vpop.xlane.xlu0 %1405 }
 0xa7c   :  { %v1417_v57 = vadd.f32 %v1406_v52, %v6721_v31 }
 0xa7f   :  { %v1412_v58 = vpop.xlane.xlu0 %1411 }
 0xa80   :  { %v1419_v59 = vadd.f32 %v1412_v58, %v6744_v3 }
 0xab6   :  { %v1377_v35 = vpop.f32.mrb[10].mxu1 }
 0xab7   :  { %v1378_v36 = vadd.f32 %v6726_v34, %v1377_v35  ;;  %v5320_v37 = vpop.f32.mrb[11].mxu1 }
 0xab9   :  { %1382 = vst.msk [vmem:[#allocation3 + $0x4] sm:$0xf] %vm179_vm3, %v1378_v36 }
 0xabe   :  { %v6881_v14 = vpop.f32.mrb[12].mxu1 }
 0xabf   :  { %v5342_v17 = vpop.f32.mrb[13].mxu1 }
 0xac0   :  { %v1384_v49 = vld [vmem:[#allocation3 + $0x4] sm:$0xf] }
 0xac1   :  { %v1390_v9 = vmul.f32 %v1384_v49, %v6855_v18 }
 0xac3   :  { %v1398_v38 = vsel %vm179_vm3, %v1390_v9, 0.0 }
 0xac4   :  { %1399 = vadd.xlane.f32.xlu1 %v1398_v38 }
 0xac8   :  { %1408 = vadd.xlane.f32.xlu1 %v1407_v43 }
 0xad9   :  { %1427 = vperm.xlu1 %5904, %v1414_v50  }
 0xadd   :  { %1433 = vperm.xlu1 %5904, %v1416_v55  }
 0xae1   :  { %1436 = vperm.xlu1 %5904, %v1417_v57  }
 0xae5   :  { %1442 = vperm.xlu1 %5904, %v1419_v59  }
 0xb51   :  { %v1400_v61 = vpop.xlane.xlu1 %1399 }
 0xb52   :  { %v1415_v62 = vadd.f32 %v1400_v61, %v6723_v32 }
 0xb54   :  { %1430 = vperm.xlu0 %5903, %v1415_v62  }
 0xb55   :  { %v1409_v63 = vpop.xlane.xlu1 %1408 }
 0xb56   :  { %v1418_v4 = vadd.f32 %v1409_v63, %v6746_v44 }
 0xb58   :  { %1439 = vperm.xlu0 %5903, %v1418_v4  }
 0xb59   :  { %v1428_v6 = vpop.permute.xlu1 %1427 }
 0xb5a   :  { %v1447_v19 = vrot.slane %v1428_v6, %v6752_v13 }
 0xb5d   :  { %v1434_v25 = vpop.permute.xlu1 %1433 }
 0xb5e   :  { %v1455_v40 = vrot.slane %v1434_v25, %v6752_v13 }
 0xb61   :  { %v1437_v10 = vpop.permute.xlu1 %1436 }
 0xb62   :  { %v1459_v21 = vrot.slane %v1437_v10, %v6752_v13 }
 0xb65   :  { %v1443_v22 = vpop.permute.xlu1 %1442 }
 0xb66   :  { %v1467_v12 = vrot.slane %v1443_v22, %v6752_v13  ;;  %v1495_v22 = vld [vmem:[#allocation2 + $0x4] sm:$0xf] }
 0xbd3   :  { %v1431_v15 = vpop.permute.xlu0 %1430 }
 0xbd4   :  { %v1451_v20 = vrot.slane %v1431_v15, %v6752_v13  ;;  %v1808_v15 = vld [vmem:[%s7531_s5] sm:$0xff] }
 0xbd6   :  { %v1468_v24 = vsel %vm692_vm4, %v1451_v20, %v1447_v19  ;;  %v1809_v19 = vld [vmem:[%s7531_s5 + $0x8] sm:$0xff] }
 0xbd7   :  { %v1469_v26 = vsel %vm694_vm5, %v1455_v40, %v1468_v24  ;;  %v1440_v27 = vpop.permute.xlu0 %1439  ;;  %v6917_v20 = vpack.c.bf16 %v1809_v19, %v1808_v15  ;;  %v1807_v15 = vld [vmem:[#allocation10 + $0x8] sm:$0xff] }
 0xbd8   :  { %v1463_v2 = vrot.slane %v1440_v27, %v6752_v13  ;;  %v1470_v5 = vsel %vm696_vm6, %v1459_v21, %v1469_v26  ;;  %v1494_v26 = vld [vmem:[#allocation2] sm:$0xf] }
 0xbd9   :  { %5726 = vmatpush3.bf16.msra.mxu1 %v6917_v20 }
 0xbda   :  { %v1471_v16 = vsel %vm698_vm7, %v1463_v2, %v1470_v5  ;;  %5727 = vmatprep.subr.bf16.mxu1 %v6293_v0 }
 0xbdb   :  { %v1472_v35 = vsel %vm700_vm8, %v1467_v12, %v1471_v16  ;;  %v1497_v12 = vld [vmem:[#allocation2 + $0xc] sm:$0xf]  ;;  %v1496_v16 = vld [vmem:[#allocation2 + $0x8] sm:$0xf] }
 0xbdc   :  { %v1474_v36 = vsel %vm1413_vm12, %v1472_v35, -inf }
 0xbdd   :  { %v1475_v37 = vsel %vm704_vm10, %v1474_v36, -inf }
 0xbde   :  { %v1476_v17 = vrot.slane %v1475_v37, 4 }
 0xbe0   :  { %v1477_v49 = vmax.f32 %v1475_v37, %v1476_v17 }
 0xbe2   :  { %v1478_v54 = vrot.slane %v1477_v49, 2 }
 0xbe4   :  { %v1479_v9 = vmax.f32 %v1477_v49, %v1478_v54 }
 0xbe6   :  { %v1480_v38 = vrot.slane %v1479_v9, 1 }
 0xbe8   :  { %v1481_v39 = vmax.f32 %v1479_v9, %v1480_v38  ;;  %v1499_v38 = vld [vmem:[#allocation2 + $0x14] sm:$0xf] }
 0xbea   :  { %v1482_v43 = vsub.f32 %v1474_v36, %v1481_v39  ;;  %v1498_v39 = vld [vmem:[#allocation2 + $0x10] sm:$0xf] }
 0xbec   :  { %v1483_v46 = vmul.f32 1.442695, %v1482_v43 }
 0xbee   :  { %5925 = vpow2.f32 %v1483_v46 }
 0xbf8   :  { %v5926_v47 = vpop.eup %5925 }
 0xbf9   :  { %v1485_v50 = vsel %vm704_vm10, %v5926_v47, 0.0 }
 0xbfa   :  { %v1486_v52 = vrot.slane %v1485_v50, 4 }
 0xbfc   :  { %v1487_v55 = vadd.f32 %v1486_v52, %v1485_v50 }
 0xbfe   :  { %v1488_v57 = vrot.slane %v1487_v55, 2 }
 0xc00   :  { %v1489_v58 = vadd.f32 %v1488_v57, %v1487_v55 }
 0xc02   :  { %v1490_v59 = vrot.slane %v1489_v58, 1 }
 0xc04   :  { %v1491_v61 = vadd.f32 %v1490_v59, %v1489_v58 }
 0xc06   :  { %5927 = vrcp.f32 %v1491_v61 }
 0xc10   :  { %v5928_v62 = vpop.eup %5927 }
 0xc11   :  { %v1493_v63 = vmul.f32 %v5928_v62, %v5926_v47 }
 0xc13   :  { %v1510_v4 = vrot.slane %v1493_v63, %v6615_v45  ;;  %v1503_v6 = vrot.slane %v1493_v63, %v6670_v56  ;;  %v1524_v25 = vrot.slane %v1493_v63, %v6676_v60  ;;  %v1517_v10 = vrot.slane %v1493_v63, %v6635_v53 }
 0xc14   :  { %v1538_v40 = vrot.slane %v1493_v63, %v6715_v29  ;;  %v1531_v21 = vrot.slane %v1493_v63, %v6735_v48 }
 0xc15   :  { %1512 = vbcast.lane.b32.xlu1 %v1510_v4, 256  ;;  %1505 = vbcast.lane.b32.xlu0 %v1503_v6, 256  ;;  %v1810_v4 = vld [vmem:[%s7531_s5 + $0x10] sm:$0xff]  ;;  %v1811_v6 = vld [vmem:[%s7531_s5 + $0x18] sm:$0xff] }
 0xc19   :  { %1526 = vbcast.lane.b32.xlu1 %v1524_v25, 256  ;;  %1519 = vbcast.lane.b32.xlu0 %v1517_v10, 256  ;;  %v6942_v25 = vpack.c.bf16 %v1811_v6, %v1810_v4  ;;  %v1806_v10 = vld [vmem:[#allocation10] sm:$0xff]  ;;  %v2069_v4 = vld [vmem:[%s7534_s8 + $0x8] sm:$0xff] }
 0xc1a   :  { %v2070_v6 = vld [vmem:[%s7534_s8 + $0x10] sm:$0xff] }
 0xc1b   :  { %5729 = vmatpush3.bf16.msra.mxu1 %v6942_v25 }
 0xc1c   :  { %5730 = vmatprep.subr.bf16.mxu1 %v6293_v0 }
 0xc1d   :  { %1540 = vbcast.lane.b32.xlu1 %v1538_v40, 256  ;;  %1533 = vbcast.lane.b32.xlu0 %v1531_v21, 256 }
 0xc87   :  { %v1513_v24 = vpop.permute.xlu1 %1512  ;;  %v1506_v27 = vpop.permute.xlu0 %1505 }
 0xc88   :  { %v1543_v2 = vmul.f32 %v1513_v24, %v1495_v22  ;;  %v1542_v5 = vmul.f32 %v1506_v27, %v1494_v26  ;;  %v6947_v22 = vpack.c.bf16 %v1807_v15, %v1806_v10  ;;  %v1955_v26 = vld [vmem:[%s7532_s6] sm:$0xff]  ;;  %v1956_v27 = vld [vmem:[%s7532_s6 + $0x8] sm:$0xff] }
 0xc8a   :  { %v1549_v35 = vsel %vm179_vm3, %v1543_v2, 0.0  ;;  %v1548_v36 = vsel %vm179_vm3, %v1542_v5, 0.0  ;;  %v6961_v2 = vpack.c.bf16 %v1956_v27, %v1955_v26  ;;  %v1957_v5 = vld [vmem:[%s7532_s6 + $0x10] sm:$0xff] }
 0xc8b   :  { %v1527_v37 = vpop.permute.xlu1 %1526  ;;  %v1520_v17 = vpop.permute.xlu0 %1519  ;;  %v1550_v9 = vadd.f32 %v1549_v35, %v1548_v36  ;;  %v2330_v26 = vld [vmem:[#allocation15 + $0x8] sm:$0xff] }
 0xc8c   :  { %v1545_v49 = vmul.f32 %v1527_v37, %v1497_v12  ;;  %v1544_v54 = vmul.f32 %v1520_v17, %v1496_v16  ;;  %v1958_v12 = vld [vmem:[%s7532_s6 + $0x18] sm:$0xff] }
 0xc8d   :  { %v6974_v16 = vpack.c.bf16 %v1958_v12, %v1957_v5  ;;  %v2331_v5 = vld [vmem:[#allocation15 + $0x10] sm:$0xff]  ;;  %v2332_v12 = vld [vmem:[#allocation15 + $0x18] sm:$0xff] }
 0xc8e   :  { %v1551_v43 = vsel %vm179_vm3, %v1544_v54, 0.0  ;;  %v1553_v52 = vsel %vm179_vm3, %v1545_v49, 0.0 }
 0xc8f   :  { %v1552_v46 = vadd.f32 %v1551_v43, %v1550_v9  ;;  %v1541_v47 = vpop.permute.xlu1 %1540  ;;  %v1534_v50 = vpop.permute.xlu0 %1533 }
 0xc90   :  { %v1547_v55 = vmul.f32 %v1541_v47, %v1499_v38  ;;  %v1546_v57 = vmul.f32 %v1534_v50, %v1498_v39  ;;  %v6991_v38 = vld [vmem:[#allocation12] ss:$0 sm:$0xff] }
 0xc91   :  { %v1554_v58 = vadd.f32 %v1553_v52, %v1552_v46 }
 0xc92   :  { %v1555_v59 = vsel %vm179_vm3, %v1546_v57, 0.0  ;;  %v1557_v62 = vsel %vm179_vm3, %v1547_v55, 0.0 }
 0xc93   :  { %v1556_v61 = vadd.f32 %v1555_v59, %v1554_v58 }
 0xc95   :  { %v1558_v63 = vadd.f32 %v1557_v62, %v1556_v61 }
 0xc97   :  { %5330 = vmatmul.mubr.msk.f32.vlgmr.msra.gmra.mrb[10].mxu0 %vm205_vm2, %v1558_v63  ;;  %v2068_v63 = vld [vmem:[%s7534_s8] sm:$0xff] }
 0xc98   :  { %5720 = vmatpush3.bf16.msra.mxu0 %v6794_v41  ;;  %5351 = vmatprep.mubr.msk.f32.mxu0 %vm6294_vm0, %v6295_v1  ;;  %v7009_v10 = vpack.c.bf16 %v2069_v4, %v2068_v63 }
 0xc99   :  { %5721 = vmatprep.subr.bf16.mxu0 %v6293_v0 }
 0xc9c   :  { %5723 = vmatpush3.bf16.msra.mxu0 %v6807_v28 }
 0xc9d   :  { %5739 = vmatprep.subr.bf16.mxu0 %v6293_v0 }
 0xd6a   :  { %v1636_v19 = vpop.f32.mrb[10].mxu0 }
 0xd6b   :  { %v1707_v40 = vadd.f32 %v6881_v14, %v1636_v19  ;;  %v5331_v21 = vpop.f32.mrb[11].mxu0  ;;  %v1805_v14 = vld [vmem:[#allocation4 + $0x8] sm:$0xf] }
 0xd6d   :  { %v1717_v24 = vadd.f32 %v6811_v33, %v1707_v40 }
 0xd6f   :  { %5352 = vmatmul.mubr.msk.f32.vlgmr.msra.gmra.mrb[12].mxu0 %vm205_vm2, %v1717_v24  ;;  %5363 = vmatmul.mubr.msk.f32.vlgmr.msra.gmra.mrb[14].mxu1 %vm205_vm2, %v1717_v24  ;;  %v2329_v24 = vld [vmem:[#allocation15] sm:$0xff] }
 0xd70   :  { %5732 = vmatpush3.bf16.msra.mxu1 %v6947_v22  ;;  %5369 = vmatprep.mubr.msk.f32.mxu1 %vm6294_vm0, %v6295_v1  ;;  %v7022_v27 = vpack.c.bf16 %v2330_v26, %v2329_v24 }
 0xd71   :  { %5733 = vmatprep.subr.bf16.mxu1 %v6293_v0  ;;  %5391 = vmatprep.mubr.msk.f32.mxu0 %vm6294_vm0, %v6295_v1 }
 0xd72   :  { %5741 = vmatpush3.bf16.msra.mxu0 %v7009_v10 }
 0xd73   :  { %5370 = vmatmul.mubr.msk.f32.vlgmr.msra.gmra.mrb[16].mxu1 %vm279_vm1, %v1805_v14  ;;  %5742 = vmatprep.subr.bf16.mxu0 %v6293_v0  ;;  %v2153_v14 = vld [vmem:[#allocation3] sm:$0xf] }
 0xd74   :  { %5735 = vmatpush3.bf16.msra.mxu1 %v6961_v2  ;;  %5380 = vmatprep.mubr.msk.f32.mxu1 %vm6294_vm0, %v6295_v1 }
 0xd75   :  { %5736 = vmatprep.subr.bf16.mxu1 %v6293_v0 }
 0xd78   :  { %5738 = vmatpush3.bf16.msra.mxu1 %v6974_v16 }
 0xd79   :  { %5745 = vmatprep.subr.bf16.mxu1 %v6293_v0 }
 0xd7b   :  { %5381 = vmatmul.mubr.msk.f32.vlgmr.msra.gmra.mrb[18].mxu1 %vm205_vm2, %v6855_v18 }
 0xd7c   :  { %5747 = vmatpush3.bf16.msra.mxu1 %v6768_v11  ;;  %5402 = vmatprep.mubr.msk.f32.mxu1 %vm6294_vm0, %v6295_v1 }
 0xd7d   :  { %5748 = vmatprep.subr.bf16.mxu1 %v6293_v0 }
 0xd80   :  { %5750 = vmatpush3.bf16.msra.mxu1 %v6774_v23 }
 0xd81   :  { %5757 = vmatprep.subr.bf16.mxu1 %v6293_v0 }
 0xe42   :  { %v1798_v35 = vpop.f32.mrb[12].mxu0  ;;  %v1878_v36 = vpop.f32.mrb[14].mxu1 }
 0xe43   :  { %v1799_v37 = vadd.f32 %v6842_v8, %v1798_v35  ;;  %v5353_v17 = vpop.f32.mrb[13].mxu0  ;;  %v5364_v49 = vpop.f32.mrb[15].mxu1 }
 0xe44   :  { %v2156_v17 = vld [vmem:[#allocation3 + $0xc] sm:$0xf] }
 0xe45   :  { %1803 = vst.msk [vmem:[#allocation21 + $0x4] sm:$0xf] %vm1032_vm11, %v1799_v37  ;;  %v2157_v37 = vld [vmem:[#allocation3 + $0x10] sm:$0xf] }
 0xe46   :  { %v1951_v18 = vpop.f32.mrb[16].mxu1 }
 0xe47   :  { %v1952_v54 = vadd.f32 %v1951_v18, %v1878_v36  ;;  %v5371_v11 = vpop.f32.mrb[17].mxu1  ;;  %v2154_v36 = vld [vmem:[#allocation3 + $0x4] sm:$0xf] }
 0xe4e   :  { %v2025_v9 = vpop.f32.mrb[18].mxu1 }
 0xe4f   :  { %v2029_v39 = vadd.f32 %v2025_v9, %v1952_v54  ;;  %v5382_v43 = vpop.f32.mrb[19].mxu1  ;;  %v7033_v54 = vpack.c.bf16 %v2332_v12, %v2331_v5 }
 0xe51   :  { %v2037_v23 = vadd.f32 %v6991_v38, %v2029_v39 }
 0xe53   :  { %5929 = vtanh.f32 %v2037_v23  ;;  %v4966_v47 = vmul.f32 -1.442695, %v2037_v23 }
 0xe55   :  { %5931 = vpow2.f32 %v4966_v47 }
 0xe5d   :  { %v5930_v46 = vpop.eup %5929 }
 0xe5e   :  { %2047 = vrot.lane.b32.xlu0 %v5930_v46, %s6286_s11 }
 0xe5f   :  { %v5932_v50 = vpop.eup %5931 }
 0xe60   :  { %v2041_v52 = vadd.f32 1.0, %v5932_v50 }
 0xe62   :  { %5933 = vrcp.f32 %v2041_v52 }
 0xe6c   :  { %v5934_v55 = vpop.eup %5933 }
 0xe6d   :  { %v2045_v59 = vmul.f32 %v5934_v55, %v6850_v7  ;;  %v2071_v7 = vld [vmem:[%s7534_s8 + $0x18] sm:$0xff] }
 0xe6e   :  { %v7015_v15 = vpack.c.bf16 %v2071_v7, %v2070_v6  ;;  %v2158_v6 = vld [vmem:[#allocation3 + $0x14] sm:$0xf] }
 0xe70   :  { %5744 = vmatpush3.bf16.msra.mxu0 %v7015_v15 }
 0xe71   :  { %5751 = vmatprep.subr.bf16.mxu0 %v6293_v0 }
 0xed0   :  { %v2048_v57 = vpop.permute.xlu0 %2047 }
 0xed1   :  { %v2050_v58 = vmul.f32 %v5934_v55, %v2048_v57 }
 0xed3   :  { %2052 = vrot.lane.b32.xlu1 %v2050_v58, %s6296_s26 }
 0xf45   :  { %v2053_v61 = vpop.permute.xlu1 %2052 }
 0xf46   :  { %v6997_v62 = vadd.f32 %v2053_v61, %v2045_v59 }
 0xf48   :  { %5935 = vtanh.f32 %v6997_v62 }
 0xf52   :  { %v5936_v19 = vpop.eup %5935 }
 0xf53   :  { %2058 = vrot.lane.b32.xlu0 %v5936_v19, %s6286_s11 }
 0xfc5   :  { %v2059_v40 = vpop.permute.xlu0 %2058 }
 0xfc6   :  { %v2061_v21 = vmul.f32 %v5934_v55, %v2059_v40 }
 0xfc8   :  { %2063 = vrot.lane.b32.xlu1 %v2061_v21, %s6296_s26 }
0x103a   :  { %v7024_v35 = vpop.permute.xlu1 %2063 }
0x103b   :  { %2067 = vst.msk [vmem:[#allocation2 + $0x8] sm:$0xf] %vm179_vm3, %v7024_v35  ;;  %5392 = vmatmul.mubr.msk.f32.vlgmr.msra.gmra.mrb[14].mxu0 %vm205_vm2, %v7024_v35  ;;  %v2160_v49 = vmul.f32 %v2154_v36, %v7024_v35  ;;  %v2159_v18 = vmul.f32 %v2153_v14, %v7024_v35  ;;  %v2163_v39 = vmul.f32 %v2157_v37, %v7024_v35 }
0x103c   :  { %5753 = vmatpush3.bf16.msra.mxu0 %v7022_v27  ;;  %5413 = vmatprep.mubr.msk.f32.mxu0 %vm6294_vm0, %v6295_v1  ;;  %v2162_v43 = vmul.f32 %v2156_v17, %v7024_v35  ;;  %v2164_v40 = vmul.f32 %v2158_v6, %v7024_v35 }
0x103d   :  { %5754 = vmatprep.subr.bf16.mxu0 %v6293_v0  ;;  %v2168_v11 = vsel %vm179_vm3, %v2160_v49, 0.0  ;;  %v2165_v9 = vsel %vm179_vm3, %v2159_v18, 0.0  ;;  %v2177_v23 = vsel %vm179_vm3, %v2163_v39, 0.0 }
0x103e   :  { %2169 = vadd.xlane.f32.xlu1 %v2168_v11  ;;  %2166 = vadd.xlane.f32.xlu0 %v2165_v9  ;;  %v2174_v46 = vsel %vm179_vm3, %v2162_v43, 0.0  ;;  %v2180_v21 = vsel %vm179_vm3, %v2164_v40, 0.0 }
0x1040   :  { %5756 = vmatpush3.bf16.msra.mxu0 %v7033_v54 }
0x1041   :  { %5763 = vmatprep.subr.bf16.mxu0 %v6293_v0 }
0x1042   :  { %2178 = vadd.xlane.f32.xlu1 %v2177_v23  ;;  %2175 = vadd.xlane.f32.xlu0 %v2174_v46 }
0x1043   :  { %5414 = vmatmul.mubr.msk.f32.vlgmr.msra.gmra.mrb[16].mxu0 %vm205_vm2, %v7024_v35 }
0x1044   :  { %5765 = vmatpush3.bf16.msra.mxu0 %v6917_v20  ;;  %5435 = vmatprep.mubr.msk.f32.mxu0 %vm6294_vm0, %v6295_v1 }
0x1045   :  { %5766 = vmatprep.subr.bf16.mxu0 %v6293_v0 }
0x1048   :  { %5768 = vmatpush3.bf16.msra.mxu0 %v6942_v25 }
0x1049   :  { %5772 = vmatprep.subr.bf16.mxu0 %v6293_v0 }
0x10cb   :  { %v2167_v47 = vpop.xlane.xlu0 %2166  ;;  %v2170_v24 = vpop.xlane.xlu1 %2169 }
0x10cc   :  { %v2184_v50 = vadd.f32 %v2167_v47, %v6719_v30 }
0x10ce   :  { %2197 = vperm.xlu1 %5904, %v2184_v50  }
0x10cf   :  { %v2176_v52 = vpop.xlane.xlu0 %2175  ;;  %v2179_v26 = vpop.xlane.xlu1 %2178 }
0x10d0   :  { %v2187_v55 = vadd.f32 %v2176_v52, %v6721_v31  ;;  %v2188_v14 = vadd.f32 %v2179_v26, %v6746_v44 }
0x10d2   :  { %2206 = vperm.xlu1 %5904, %v2187_v55  }
0x110e   :  { %v2147_v57 = vpop.f32.mrb[14].mxu0 }
0x110f   :  { %v2148_v58 = vadd.f32 %v6726_v34, %v2147_v57  ;;  %v5393_v59 = vpop.f32.mrb[15].mxu0  ;;  %v2185_v34 = vadd.f32 %v2170_v24, %v6723_v32 }
0x1111   :  { %2152 = vst.msk [vmem:[#allocation3 + $0x8] sm:$0xf] %vm179_vm3, %v2148_v58 }
0x1116   :  { %v7058_v61 = vpop.f32.mrb[16].mxu0 }
0x1117   :  { %v5415_v63 = vpop.f32.mrb[17].mxu0 }
0x1118   :  { %v2155_v4 = vld [vmem:[#allocation3 + $0x8] sm:$0xf] }
0x1119   :  { %v2161_v7 = vmul.f32 %v2155_v4, %v7024_v35 }
0x111b   :  { %v2171_v19 = vsel %vm179_vm3, %v2161_v7, 0.0 }
0x111c   :  { %2172 = vadd.xlane.f32.xlu0 %v2171_v19 }
0x1120   :  { %2181 = vadd.xlane.f32.xlu0 %v2180_v21 }
0x1136   :  { %2200 = vperm.xlu0 %5903, %v2185_v34  }
0x113a   :  { %2209 = vperm.xlu0 %5903, %v2188_v14  }
0x114d   :  { %v2198_v17 = vpop.permute.xlu1 %2197 }
0x114e   :  { %v2217_v9 = vrot.slane %v2198_v17, %v6752_v13 }
0x1151   :  { %v2207_v18 = vpop.permute.xlu1 %2206 }
0x1152   :  { %v2229_v46 = vrot.slane %v2207_v18, %v6752_v13 }
0x11a9   :  { %v2173_v5 = vpop.xlane.xlu0 %2172 }
0x11aa   :  { %v2186_v12 = vadd.f32 %v2173_v5, %v6739_v51 }
0x11ac   :  { %2203 = vperm.xlu1 %5904, %v2186_v12  }
0x11ad   :  { %v2182_v36 = vpop.xlane.xlu0 %2181 }
0x11ae   :  { %v2189_v37 = vadd.f32 %v2182_v36, %v6744_v3 }
0x11b0   :  { %2212 = vperm.xlu1 %5904, %v2189_v37  }
0x11b5   :  { %v2201_v49 = vpop.permute.xlu0 %2200 }
0x11b6   :  { %v2221_v11 = vrot.slane %v2201_v49, %v6752_v13 }
0x11b8   :  { %v2238_v47 = vsel %vm692_vm4, %v2221_v11, %v2217_v9 }
0x11b9   :  { %v2210_v39 = vpop.permute.xlu0 %2209 }
0x11ba   :  { %v2233_v50 = vrot.slane %v2210_v39, %v6752_v13 }
0x122b   :  { %v2204_v43 = vpop.permute.xlu1 %2203 }
0x122c   :  { %v2225_v23 = vrot.slane %v2204_v43, %v6752_v13 }
0x122e   :  { %v2239_v52 = vsel %vm694_vm5, %v2225_v23, %v2238_v47 }
0x122f   :  { %v2240_v55 = vsel %vm696_vm6, %v2229_v46, %v2239_v52  ;;  %v2213_v57 = vpop.permute.xlu1 %2212 }
0x1230   :  { %v2237_v58 = vrot.slane %v2213_v57, %v6752_v13  ;;  %v2241_v59 = vsel %vm698_vm7, %v2233_v50, %v2240_v55  ;;  %v2265_v55 = vld [vmem:[#allocation2 + $0x4] sm:$0xf] }
0x1232   :  { %v2242_v63 = vsel %vm700_vm8, %v2237_v58, %v2241_v59  ;;  %v2264_v58 = vld [vmem:[#allocation2] sm:$0xf] }
0x1233   :  { %v2244_v4 = vsel %vm2183_vm13, %v2242_v63, -inf }
0x1234   :  { %v2245_v6 = vsel %vm704_vm10, %v2244_v4, -inf }
0x1235   :  { %v2246_v7 = vrot.slane %v2245_v6, 4 }
0x1237   :  { %v2247_v19 = vmax.f32 %v2245_v6, %v2246_v7  ;;  %v2267_v6 = vld [vmem:[#allocation2 + $0xc] sm:$0xf] }
0x1239   :  { %v2248_v40 = vrot.slane %v2247_v19, 2 }
0x123b   :  { %v2249_v21 = vmax.f32 %v2247_v19, %v2248_v40 }
0x123d   :  { %v2250_v24 = vrot.slane %v2249_v21, 1 }
0x123f   :  { %v2251_v34 = vmax.f32 %v2249_v21, %v2250_v24  ;;  %v2266_v24 = vld [vmem:[#allocation2 + $0x8] sm:$0xf] }
0x1241   :  { %v2252_v26 = vsub.f32 %v2244_v4, %v2251_v34 }
0x1243   :  { %v2253_v14 = vmul.f32 1.442695, %v2252_v26 }
0x1245   :  { %5937 = vpow2.f32 %v2253_v14 }
0x124f   :  { %v5938_v5 = vpop.eup %5937 }
0x1250   :  { %v2255_v12 = vsel %vm704_vm10, %v5938_v5, 0.0 }
0x1251   :  { %v2256_v36 = vrot.slane %v2255_v12, 4 }
0x1253   :  { %v2257_v37 = vadd.f32 %v2256_v36, %v2255_v12  ;;  %v2268_v12 = vld [vmem:[#allocation2 + $0x10] sm:$0xf] }
0x1255   :  { %v2258_v17 = vrot.slane %v2257_v37, 2 }
0x1257   :  { %v2259_v49 = vadd.f32 %v2258_v17, %v2257_v37 }
0x1259   :  { %v2260_v18 = vrot.slane %v2259_v49, 1 }
0x125b   :  { %v2261_v11 = vadd.f32 %v2260_v18, %v2259_v49 }
0x125d   :  { %5939 = vrcp.f32 %v2261_v11 }
0x1267   :  { %v5940_v9 = vpop.eup %5939 }
0x1268   :  { %v2263_v39 = vmul.f32 %v5940_v9, %v5938_v5  ;;  %v2269_v5 = vld [vmem:[#allocation2 + $0x14] sm:$0xf] }
0x126a   :  { %v2280_v43 = vrot.slane %v2263_v39, %v6615_v45  ;;  %v2273_v23 = vrot.slane %v2263_v39, %v6670_v56  ;;  %v2294_v46 = vrot.slane %v2263_v39, %v6676_v60  ;;  %v2287_v47 = vrot.slane %v2263_v39, %v6635_v53 }
0x126b   :  { %v2308_v50 = vrot.slane %v2263_v39, %v6715_v29  ;;  %v2301_v52 = vrot.slane %v2263_v39, %v6735_v48 }
0x126c   :  { %2282 = vbcast.lane.b32.xlu1 %v2280_v43, 256  ;;  %2275 = vbcast.lane.b32.xlu0 %v2273_v23, 256 }
0x1270   :  { %2296 = vbcast.lane.b32.xlu1 %v2294_v46, 256  ;;  %2289 = vbcast.lane.b32.xlu0 %v2287_v47, 256 }
0x1274   :  { %2310 = vbcast.lane.b32.xlu1 %v2308_v50, 256  ;;  %2303 = vbcast.lane.b32.xlu0 %v2301_v52, 256 }
0x12de   :  { %v2283_v57 = vpop.permute.xlu1 %2282  ;;  %v2276_v59 = vpop.permute.xlu0 %2275 }
0x12df   :  { %v2313_v63 = vmul.f32 %v2283_v57, %v2265_v55  ;;  %v2312_v4 = vmul.f32 %v2276_v59, %v2264_v58 }
0x12e1   :  { %v2319_v7 = vsel %vm179_vm3, %v2313_v63, 0.0  ;;  %v2318_v19 = vsel %vm179_vm3, %v2312_v4, 0.0 }
0x12e2   :  { %v2297_v40 = vpop.permute.xlu1 %2296  ;;  %v2290_v21 = vpop.permute.xlu0 %2289  ;;  %v2320_v14 = vadd.f32 %v2319_v7, %v2318_v19 }
0x12e3   :  { %v2315_v34 = vmul.f32 %v2297_v40, %v2267_v6  ;;  %v2314_v26 = vmul.f32 %v2290_v21, %v2266_v24 }
0x12e5   :  { %v2321_v36 = vsel %vm179_vm3, %v2314_v26, 0.0  ;;  %v2323_v18 = vsel %vm179_vm3, %v2315_v34, 0.0 }
0x12e6   :  { %v2322_v37 = vadd.f32 %v2321_v36, %v2320_v14  ;;  %v2311_v17 = vpop.permute.xlu1 %2310  ;;  %v2304_v49 = vpop.permute.xlu0 %2303 }
0x12e7   :  { %v2317_v11 = vmul.f32 %v2311_v17, %v2269_v5  ;;  %v2316_v9 = vmul.f32 %v2304_v49, %v2268_v12 }
0x12e8   :  { %v2324_v39 = vadd.f32 %v2323_v18, %v2322_v37 }
0x12e9   :  { %v2325_v43 = vsel %vm179_vm3, %v2316_v9, 0.0  ;;  %v2327_v46 = vsel %vm179_vm3, %v2317_v11, 0.0  ;;  %v2924_v9 = vld [vmem:[#allocation3 + $0x4] sm:$0xf] }
0x12ea   :  { %v2326_v23 = vadd.f32 %v2325_v43, %v2324_v39  ;;  %v2923_v39 = vld [vmem:[#allocation3] sm:$0xf]  ;;  %v2927_v43 = vld [vmem:[#allocation3 + $0x10] sm:$0xf] }
0x12ec   :  { %v2328_v47 = vadd.f32 %v2327_v46, %v2326_v23  ;;  %v2925_v46 = vld [vmem:[#allocation3 + $0x8] sm:$0xf] }
0x12ee   :  { %5403 = vmatmul.mubr.msk.f32.vlgmr.msra.gmra.mrb[20].mxu1 %vm205_vm2, %v2328_v47 }
0x12ef   :  { %5759 = vmatpush3.bf16.msra.mxu1 %v6794_v41  ;;  %5424 = vmatprep.mubr.msk.f32.mxu1 %vm6294_vm0, %v6295_v1  ;;  %v2575_v41 = vld [vmem:[#allocation4 + $0xc] sm:$0xf] }
0x12f0   :  { %5760 = vmatprep.subr.bf16.mxu1 %v6293_v0 }
0x12f3   :  { %5762 = vmatpush3.bf16.msra.mxu1 %v6807_v28 }
0x12f4   :  { %5769 = vmatprep.subr.bf16.mxu1 %v6293_v0 }
0x13c1   :  { %v2406_v50 = vpop.f32.mrb[20].mxu1 }
0x13c2   :  { %v2477_v52 = vadd.f32 %v7058_v61, %v2406_v50  ;;  %v5404_v55 = vpop.f32.mrb[21].mxu1 }
0x13c4   :  { %v2487_v57 = vadd.f32 %v6811_v33, %v2477_v52 }
0x13c6   :  { %5425 = vmatmul.mubr.msk.f32.vlgmr.msra.gmra.mrb[22].mxu1 %vm205_vm2, %v2487_v57  ;;  %5436 = vmatmul.mubr.msk.f32.vlgmr.msra.gmra.mrb[18].mxu0 %vm205_vm2, %v2487_v57 }
0x13c7   :  { %5774 = vmatpush3.bf16.msra.mxu0 %v6961_v2  ;;  %5771 = vmatpush3.bf16.msra.mxu1 %v6947_v22 }
0x13c8   :  { %5442 = vmatprep.mubr.msk.f32.mxu1 %vm6294_vm0, %v6295_v1  ;;  %5775 = vmatprep.subr.bf16.mxu0 %v6293_v0 }
0x13c9   :  { %5453 = vmatprep.mubr.msk.f32.mxu0 %vm6294_vm0, %v6295_v1  ;;  %5778 = vmatprep.subr.bf16.mxu1 %v6293_v0 }
0x13ca   :  { %5443 = vmatmul.mubr.msk.f32.vlgmr.msra.gmra.mrb[24].mxu1 %vm279_vm1, %v2575_v41 }
0x13cb   :  { %5777 = vmatpush3.bf16.msra.mxu0 %v6974_v16  ;;  %5780 = vmatpush3.bf16.msra.mxu1 %v7009_v10 }
0x13cc   :  { %5781 = vmatprep.subr.bf16.mxu1 %v6293_v0  ;;  %5464 = vmatprep.mubr.msk.f32.mxu1 %vm6294_vm0, %v6295_v1 }
0x13cd   :  { %5784 = vmatprep.subr.bf16.mxu0 %v6293_v0 }
0x13ce   :  { %5454 = vmatmul.mubr.msk.f32.vlgmr.msra.gmra.mrb[20].mxu0 %vm205_vm2, %v7024_v35 }
0x13cf   :  { %5783 = vmatpush3.bf16.msra.mxu1 %v7015_v15  ;;  %5475 = vmatprep.mubr.msk.f32.mxu0 %vm6294_vm0, %v6295_v1 }
0x13d0   :  { %5790 = vmatprep.subr.bf16.mxu1 %v6293_v0 }
0x1499   :  { %v2568_v28 = vpop.f32.mrb[22].mxu1  ;;  %v2648_v33 = vpop.f32.mrb[18].mxu0 }
0x149a   :  { %v2569_v61 = vadd.f32 %v6842_v8, %v2568_v28  ;;  %v5426_v58 = vpop.f32.mrb[23].mxu1  ;;  %v5437_v59 = vpop.f32.mrb[19].mxu0 }
0x149b   :  { %v7167_v59 = vld [vmem:[#allocation13] ss:$0 sm:$0xff] }
0x149c   :  { %2573 = vst.msk [vmem:[#allocation21 + $0x8] sm:$0xf] %vm1032_vm11, %v2569_v61 }
0x149d   :  { %v2721_v63 = vpop.f32.mrb[24].mxu1 }
0x149e   :  { %v2722_v4 = vadd.f32 %v2721_v63, %v2648_v33  ;;  %v5444_v6 = vpop.f32.mrb[25].mxu1 }
0x14a1   :  { %v2795_v7 = vpop.f32.mrb[20].mxu0 }
0x14a2   :  { %v2799_v35 = vadd.f32 %v2795_v7, %v2722_v4  ;;  %v5455_v19 = vpop.f32.mrb[21].mxu0 }
0x14a4   :  { %v2807_v40 = vadd.f32 %v6991_v38, %v2799_v35  ;;  %v2928_v35 = vld [vmem:[#allocation3 + $0x14] sm:$0xf] }
0x14a6   :  { %5941 = vtanh.f32 %v2807_v40  ;;  %v4978_v24 = vmul.f32 -1.442695, %v2807_v40 }
0x14a8   :  { %5943 = vpow2.f32 %v4978_v24 }
0x14b0   :  { %v5942_v21 = vpop.eup %5941 }
0x14b1   :  { %2817 = vrot.lane.b32.xlu0 %v5942_v21, %s6286_s11 }
0x14b2   :  { %v5944_v34 = vpop.eup %5943 }
0x14b3   :  { %v2811_v8 = vadd.f32 1.0, %v5944_v34 }
0x14b5   :  { %5945 = vrcp.f32 %v2811_v8 }
0x14bf   :  { %v5946_v26 = vpop.eup %5945 }
0x14c0   :  { %v2815_v12 = vmul.f32 %v5946_v26, %v6997_v62 }
0x1523   :  { %v2818_v14 = vpop.permute.xlu0 %2817 }
0x1524   :  { %v2820_v5 = vmul.f32 %v5946_v26, %v2818_v14 }
0x1526   :  { %2822 = vrot.lane.b32.xlu1 %v2820_v5, %s6296_s26 }
0x1598   :  { %v2823_v36 = vpop.permute.xlu1 %2822 }
0x1599   :  { %v7132_v37 = vadd.f32 %v2823_v36, %v2815_v12 }
0x159b   :  { %5947 = vtanh.f32 %v7132_v37 }
0x15a5   :  { %v5948_v17 = vpop.eup %5947 }
0x15a6   :  { %2828 = vrot.lane.b32.xlu0 %v5948_v17, %s6286_s11 }
0x1618   :  { %v2829_v49 = vpop.permute.xlu0 %2828 }
0x1619   :  { %v2831_v18 = vmul.f32 %v5946_v26, %v2829_v49 }
0x161b   :  { %2833 = vrot.lane.b32.xlu1 %v2831_v18, %s6296_s26 }
0x168d   :  { %v7137_v11 = vpop.permute.xlu1 %2833 }
0x168e   :  { %2837 = vst.msk [vmem:[#allocation2 + $0xc] sm:$0xf] %vm179_vm3, %v7137_v11  ;;  %5465 = vmatmul.mubr.msk.f32.vlgmr.msra.gmra.mrb[26].mxu1 %vm205_vm2, %v7137_v11  ;;  %v2930_v62 = vmul.f32 %v2924_v9, %v7137_v11  ;;  %v2929_v23 = vmul.f32 %v2923_v39, %v7137_v11  ;;  %v2933_v52 = vmul.f32 %v2927_v43, %v7137_v11 }
0x168f   :  { %5792 = vmatpush3.bf16.msra.mxu1 %v7022_v27  ;;  %5486 = vmatprep.mubr.msk.f32.mxu1 %vm6294_vm0, %v6295_v1  ;;  %v2931_v55 = vmul.f32 %v2925_v46, %v7137_v11  ;;  %v2934_v21 = vmul.f32 %v2928_v35, %v7137_v11 }
0x1690   :  { %5793 = vmatprep.subr.bf16.mxu1 %v6293_v0  ;;  %v2938_v47 = vsel %vm179_vm3, %v2930_v62, 0.0  ;;  %v2935_v50 = vsel %vm179_vm3, %v2929_v23, 0.0  ;;  %v2947_v57 = vsel %vm179_vm3, %v2933_v52, 0.0 }
0x1691   :  { %2939 = vadd.xlane.f32.xlu1 %v2938_v47  ;;  %2936 = vadd.xlane.f32.xlu0 %v2935_v50  ;;  %v2941_v41 = vsel %vm179_vm3, %v2931_v55, 0.0  ;;  %v2950_v24 = vsel %vm179_vm3, %v2934_v21, 0.0 }
0x1693   :  { %5795 = vmatpush3.bf16.msra.mxu1 %v7033_v54 }
0x1694   :  { %5802 = vmatprep.subr.bf16.mxu1 %v6293_v0 }
0x1695   :  { %2948 = vadd.xlane.f32.xlu1 %v2947_v57  ;;  %2942 = vadd.xlane.f32.xlu0 %v2941_v41 }
0x1696   :  { %5487 = vmatmul.mubr.msk.f32.vlgmr.msra.gmra.mrb[28].mxu1 %vm205_vm2, %v7137_v11 }
0x1697   :  { %5804 = vmatpush3.bf16.msra.mxu1 %v6917_v20  ;;  %5508 = vmatprep.mubr.msk.f32.mxu1 %vm6294_vm0, %v6295_v1 }
0x1698   :  { %5805 = vmatprep.subr.bf16.mxu1 %v6293_v0 }
0x169b   :  { %5807 = vmatpush3.bf16.msra.mxu1 %v6942_v25 }
0x169c   :  { %5811 = vmatprep.subr.bf16.mxu1 %v6293_v0 }
0x171e   :  { %v2937_v28 = vpop.xlane.xlu0 %2936  ;;  %v2940_v34 = vpop.xlane.xlu1 %2939 }
0x171f   :  { %v2954_v33 = vadd.f32 %v2937_v28, %v6719_v30  ;;  %v2955_v8 = vadd.f32 %v2940_v34, %v6723_v32 }
0x1721   :  { %2967 = vperm.xlu1 %5904, %v2954_v33  }
0x1722   :  { %v2943_v61 = vpop.xlane.xlu0 %2942  ;;  %v2949_v26 = vpop.xlane.xlu1 %2948 }
0x1723   :  { %v2956_v58 = vadd.f32 %v2943_v61, %v6739_v51  ;;  %v2958_v14 = vadd.f32 %v2949_v26, %v6746_v44 }
0x1725   :  { %2973 = vperm.xlu1 %5904, %v2956_v58  }
0x1761   :  { %v2917_v20 = vpop.f32.mrb[26].mxu1 }
0x1762   :  { %v2918_v63 = vadd.f32 %v7167_v59, %v2917_v20  ;;  %v5466_v4 = vpop.f32.mrb[27].mxu1 }
0x1764   :  { %2922 = vst.msk [vmem:[#allocation3 + $0xc] sm:$0xf] %vm179_vm3, %v2918_v63 }
0x1769   :  { %v7171_v6 = vpop.f32.mrb[28].mxu1 }
0x176a   :  { %v5488_v25 = vpop.f32.mrb[29].mxu1 }
0x176b   :  { %v2926_v7 = vld [vmem:[#allocation3 + $0xc] sm:$0xf] }
0x176c   :  { %v2932_v19 = vmul.f32 %v2926_v7, %v7137_v11 }
0x176e   :  { %v2944_v40 = vsel %vm179_vm3, %v2932_v19, 0.0 }
0x176f   :  { %2945 = vadd.xlane.f32.xlu0 %v2944_v40 }
0x1773   :  { %2951 = vadd.xlane.f32.xlu0 %v2950_v24 }
0x1789   :  { %2970 = vperm.xlu0 %5903, %v2955_v8  }
0x178d   :  { %2979 = vperm.xlu0 %5903, %v2958_v14  }
0x17a0   :  { %v2968_v49 = vpop.permute.xlu1 %2967 }
0x17a1   :  { %v2987_v43 = vrot.slane %v2968_v49, %v6752_v13  ;;  %v3104_v49 = vld [vmem:[#allocation16 + $0x8] sm:$0xff] }
0x17a4   :  { %v2974_v39 = vpop.permute.xlu1 %2973 }
0x17a5   :  { %v2995_v23 = vrot.slane %v2974_v39, %v6752_v13 }
0x17fc   :  { %v2946_v5 = vpop.xlane.xlu0 %2945 }
0x17fd   :  { %v2957_v12 = vadd.f32 %v2946_v5, %v6721_v31 }
0x17ff   :  { %2976 = vperm.xlu1 %5904, %v2957_v12  }
0x1800   :  { %v2952_v36 = vpop.xlane.xlu0 %2951 }
0x1801   :  { %v2959_v17 = vadd.f32 %v2952_v36, %v6744_v3 }
0x1803   :  { %2982 = vperm.xlu1 %5904, %v2959_v17   ;;  %v3103_v17 = vld [vmem:[#allocation16] sm:$0xff] }
0x1808   :  { %v2971_v18 = vpop.permute.xlu0 %2970 }
0x1809   :  { %v2991_v9 = vrot.slane %v2971_v18, %v6752_v13  ;;  %v7195_v18 = vpack.c.bf16 %v3104_v49, %v3103_v17 }
0x180b   :  { %v3008_v62 = vsel %vm692_vm4, %v2991_v9, %v2987_v43  ;;  %5786 = vmatpush3.bf16.msra.mxu0 %v7195_v18  ;;  %v3105_v43 = vld [vmem:[#allocation16 + $0x10] sm:$0xff] }
0x180c   :  { %v2980_v47 = vpop.permute.xlu0 %2979  ;;  %v3009_v52 = vsel %vm694_vm5, %v2995_v23, %v3008_v62  ;;  %5787 = vmatprep.subr.bf16.mxu0 %v6293_v0  ;;  %v3106_v62 = vld [vmem:[#allocation16 + $0x18] sm:$0xff] }
0x180d   :  { %v3003_v57 = vrot.slane %v2980_v47, %v6752_v13  ;;  %v7201_v47 = vpack.c.bf16 %v3106_v62, %v3105_v43  ;;  %v3259_v43 = vld [vmem:[%s7539_s13 + $0x8] sm:$0xff] }
0x180f   :  { %5789 = vmatpush3.bf16.msra.mxu0 %v7201_v47 }
0x1810   :  { %5796 = vmatprep.subr.bf16.mxu0 %v6293_v0 }
0x187e   :  { %v2977_v46 = vpop.permute.xlu1 %2976 }
0x187f   :  { %v2999_v50 = vrot.slane %v2977_v46, %v6752_v13 }
0x1881   :  { %v3010_v55 = vsel %vm696_vm6, %v2999_v50, %v3009_v52 }
0x1882   :  { %v2983_v41 = vpop.permute.xlu1 %2982  ;;  %v3011_v33 = vsel %vm698_vm7, %v3003_v57, %v3010_v55 }
0x1883   :  { %v3007_v28 = vrot.slane %v2983_v41, %v6752_v13  ;;  %v3035_v41 = vld [vmem:[#allocation2 + $0x4] sm:$0xf] }
0x1885   :  { %v3012_v61 = vsel %vm700_vm8, %v3007_v28, %v3011_v33  ;;  %v3034_v33 = vld [vmem:[#allocation2] sm:$0xf] }
0x1886   :  { %v3014_v58 = vsel %vm2953_vm14, %v3012_v61, -inf }
0x1887   :  { %v3015_v20 = vsel %vm704_vm10, %v3014_v58, -inf }
0x1888   :  { %v3016_v63 = vrot.slane %v3015_v20, 4 }
0x188a   :  { %v3017_v4 = vmax.f32 %v3015_v20, %v3016_v63 }
0x188c   :  { %v3018_v25 = vrot.slane %v3017_v4, 2 }
0x188e   :  { %v3019_v7 = vmax.f32 %v3017_v4, %v3018_v25  ;;  %v3037_v25 = vld [vmem:[#allocation2 + $0xc] sm:$0xf] }
0x1890   :  { %v3020_v35 = vrot.slane %v3019_v7, 1 }
0x1892   :  { %v3021_v19 = vmax.f32 %v3019_v7, %v3020_v35  ;;  %v3036_v35 = vld [vmem:[#allocation2 + $0x8] sm:$0xf] }
0x1894   :  { %v3022_v40 = vsub.f32 %v3014_v58, %v3021_v19 }
0x1896   :  { %v3023_v21 = vmul.f32 1.442695, %v3022_v40 }
0x1898   :  { %5949 = vpow2.f32 %v3023_v21 }
0x18a2   :  { %v5950_v24 = vpop.eup %5949 }
0x18a3   :  { %v3025_v34 = vsel %vm704_vm10, %v5950_v24, 0.0 }
0x18a4   :  { %v3026_v8 = vrot.slane %v3025_v34, 4 }
0x18a6   :  { %v3027_v26 = vadd.f32 %v3026_v8, %v3025_v34  ;;  %v3039_v34 = vld [vmem:[#allocation2 + $0x14] sm:$0xf]  ;;  %v3038_v8 = vld [vmem:[#allocation2 + $0x10] sm:$0xf] }
0x18a8   :  { %v3028_v14 = vrot.slane %v3027_v26, 2 }
0x18aa   :  { %v3029_v5 = vadd.f32 %v3028_v14, %v3027_v26 }
0x18ac   :  { %v3030_v12 = vrot.slane %v3029_v5, 1 }
0x18ae   :  { %v3031_v36 = vadd.f32 %v3030_v12, %v3029_v5 }
0x18b0   :  { %5951 = vrcp.f32 %v3031_v36 }
0x18ba   :  { %v5952_v9 = vpop.eup %5951 }
0x18bb   :  { %v3033_v39 = vmul.f32 %v5952_v9, %v5950_v24 }
0x18bd   :  { %v3050_v23 = vrot.slane %v3033_v39, %v6615_v45  ;;  %v3043_v46 = vrot.slane %v3033_v39, %v6670_v56  ;;  %v3064_v50 = vrot.slane %v3033_v39, %v6676_v60  ;;  %v3057_v52 = vrot.slane %v3033_v39, %v6635_v53 }
0x18be   :  { %v3078_v55 = vrot.slane %v3033_v39, %v6715_v29  ;;  %v3071_v57 = vrot.slane %v3033_v39, %v6735_v48  ;;  %v3258_v39 = vld [vmem:[%s7539_s13] sm:$0xff] }
0x18bf   :  { %3052 = vbcast.lane.b32.xlu1 %v3050_v23, 256  ;;  %3045 = vbcast.lane.b32.xlu0 %v3043_v46, 256 }
0x18c3   :  { %3066 = vbcast.lane.b32.xlu1 %v3064_v50, 256  ;;  %3059 = vbcast.lane.b32.xlu0 %v3057_v52, 256  ;;  %v7221_v50 = vpack.c.bf16 %v3259_v43, %v3258_v39  ;;  %v3694_v43 = vld [vmem:[#allocation3 + $0x4] sm:$0xf] }
0x18c7   :  { %3080 = vbcast.lane.b32.xlu1 %v3078_v55, 256  ;;  %3073 = vbcast.lane.b32.xlu0 %v3071_v57, 256  ;;  %v3260_v55 = vld [vmem:[%s7539_s13 + $0x10] sm:$0xff]  ;;  %v3261_v57 = vld [vmem:[%s7539_s13 + $0x18] sm:$0xff] }
0x1931   :  { %v3053_v28 = vpop.permute.xlu1 %3052  ;;  %v3046_v61 = vpop.permute.xlu0 %3045 }
0x1932   :  { %v3083_v58 = vmul.f32 %v3053_v28, %v3035_v41  ;;  %v3082_v20 = vmul.f32 %v3046_v61, %v3034_v33  ;;  %v7234_v41 = vpack.c.bf16 %v3261_v57, %v3260_v55  ;;  %v7238_v33 = vld [vmem:[#allocation18] ss:$0 sm:$0xff] }
0x1934   :  { %v3089_v63 = vsel %vm179_vm3, %v3083_v58, 0.0  ;;  %v3088_v4 = vsel %vm179_vm3, %v3082_v20, 0.0 }
0x1935   :  { %v3067_v7 = vpop.permute.xlu1 %3066  ;;  %v3060_v19 = vpop.permute.xlu0 %3059  ;;  %v3090_v24 = vadd.f32 %v3089_v63, %v3088_v4  ;;  %v3345_v63 = vld [vmem:[#allocation4 + $0x10] sm:$0xf] }
0x1936   :  { %v3085_v40 = vmul.f32 %v3067_v7, %v3037_v25  ;;  %v3084_v21 = vmul.f32 %v3060_v19, %v3036_v35 }
0x1938   :  { %v3091_v26 = vsel %vm179_vm3, %v3084_v21, 0.0  ;;  %v3093_v36 = vsel %vm179_vm3, %v3085_v40, 0.0 }
0x1939   :  { %v3092_v14 = vadd.f32 %v3091_v26, %v3090_v24  ;;  %v3081_v5 = vpop.permute.xlu1 %3080  ;;  %v3074_v12 = vpop.permute.xlu0 %3073 }
0x193a   :  { %v3087_v17 = vmul.f32 %v3081_v5, %v3039_v34  ;;  %v3086_v49 = vmul.f32 %v3074_v12, %v3038_v8 }
0x193b   :  { %v3094_v9 = vadd.f32 %v3093_v36, %v3092_v14 }
0x193c   :  { %v3095_v62 = vsel %vm179_vm3, %v3086_v49, 0.0  ;;  %v3097_v46 = vsel %vm179_vm3, %v3087_v17, 0.0 }
0x193d   :  { %v3096_v23 = vadd.f32 %v3095_v62, %v3094_v9  ;;  %v3693_v62 = vld [vmem:[#allocation3] sm:$0xf] }
0x193f   :  { %v3098_v52 = vadd.f32 %v3097_v46, %v3096_v23  ;;  %v3695_v46 = vld [vmem:[#allocation3 + $0x8] sm:$0xf] }
0x1941   :  { %5476 = vmatmul.mubr.msk.f32.vlgmr.msra.gmra.mrb[22].mxu0 %vm205_vm2, %v3098_v52 }
0x1942   :  { %5798 = vmatpush3.bf16.msra.mxu0 %v7221_v50  ;;  %5497 = vmatprep.mubr.msk.f32.mxu0 %vm6294_vm0, %v6295_v1 }
0x1943   :  { %5799 = vmatprep.subr.bf16.mxu0 %v6293_v0 }
0x1946   :  { %5801 = vmatpush3.bf16.msra.mxu0 %v7234_v41 }
0x1947   :  { %5808 = vmatprep.subr.bf16.mxu0 %v6293_v0 }
0x1a14   :  { %v3176_v28 = vpop.f32.mrb[22].mxu0 }
0x1a15   :  { %v3247_v61 = vadd.f32 %v7171_v6, %v3176_v28  ;;  %v5477_v58 = vpop.f32.mrb[23].mxu0  ;;  %v3696_v28 = vld [vmem:[#allocation3 + $0xc] sm:$0xf] }
0x1a16   :  { %v3698_v58 = vld [vmem:[#allocation3 + $0x14] sm:$0xf] }
0x1a17   :  { %v3257_v20 = vadd.f32 %v7238_v33, %v3247_v61 }
0x1a19   :  { %5498 = vmatmul.mubr.msk.f32.vlgmr.msra.gmra.mrb[24].mxu0 %vm205_vm2, %v3257_v20  ;;  %5509 = vmatmul.mubr.msk.f32.vlgmr.msra.gmra.mrb[30].mxu1 %vm205_vm2, %v3257_v20 }
0x1a1a   :  { %5813 = vmatpush3.bf16.msra.mxu1 %v6961_v2  ;;  %5810 = vmatpush3.bf16.msra.mxu0 %v6947_v22  ;;  %v7269_v22 = vld [vmem:[#allocation19] ss:$0 sm:$0xff] }
0x1a1b   :  { %5515 = vmatprep.mubr.msk.f32.mxu0 %vm6294_vm0, %v6295_v1  ;;  %5814 = vmatprep.subr.bf16.mxu1 %v6293_v0 }
0x1a1c   :  { %5526 = vmatprep.mubr.msk.f32.mxu1 %vm6294_vm0, %v6295_v1  ;;  %5817 = vmatprep.subr.bf16.mxu0 %v6293_v0 }
0x1a1d   :  { %5516 = vmatmul.mubr.msk.f32.vlgmr.msra.gmra.mrb[26].mxu0 %vm279_vm1, %v3345_v63 }
0x1a1e   :  { %5816 = vmatpush3.bf16.msra.mxu1 %v6974_v16  ;;  %5819 = vmatpush3.bf16.msra.mxu0 %v7009_v10 }
0x1a1f   :  { %5820 = vmatprep.subr.bf16.mxu0 %v6293_v0  ;;  %5537 = vmatprep.mubr.msk.f32.mxu0 %vm6294_vm0, %v6295_v1 }
0x1a20   :  { %5823 = vmatprep.subr.bf16.mxu1 %v6293_v0 }
0x1a21   :  { %5527 = vmatmul.mubr.msk.f32.vlgmr.msra.gmra.mrb[32].mxu1 %vm205_vm2, %v7137_v11 }
0x1a22   :  { %5822 = vmatpush3.bf16.msra.mxu0 %v7015_v15  ;;  %5825 = vmatpush3.bf16.msra.mxu1 %v7195_v18 }
0x1a23   :  { %5829 = vmatprep.subr.bf16.mxu0 %v6293_v0  ;;  %5826 = vmatprep.subr.bf16.mxu1 %v6293_v0 }
0x1a24   :  { %5548 = vmatprep.mubr.msk.f32.mxu1 %vm6294_vm0, %v6295_v1 }
0x1a26   :  { %5828 = vmatpush3.bf16.msra.mxu1 %v7201_v47 }
0x1a27   :  { %5835 = vmatprep.subr.bf16.mxu1 %v6293_v0 }
0x1aec   :  { %v3338_v2 = vpop.f32.mrb[24].mxu0  ;;  %v3418_v16 = vpop.f32.mrb[30].mxu1 }
0x1aed   :  { %v3339_v10 = vadd.f32 %v7269_v22, %v3338_v2  ;;  %v5499_v15 = vpop.f32.mrb[25].mxu0  ;;  %v5510_v11 = vpop.f32.mrb[31].mxu1 }
0x1aef   :  { %3343 = vst.msk [vmem:[#allocation21 + $0xc] sm:$0xf] %vm1032_vm11, %v3339_v10 }
0x1af0   :  { %v3491_v6 = vpop.f32.mrb[26].mxu0 }
0x1af1   :  { %v3492_v4 = vadd.f32 %v3491_v6, %v3418_v16  ;;  %v5517_v25 = vpop.f32.mrb[27].mxu0 }
0x1af4   :  { %v3565_v7 = vpop.f32.mrb[32].mxu1 }
0x1af5   :  { %v3569_v35 = vadd.f32 %v3565_v7, %v3492_v4  ;;  %v5528_v19 = vpop.f32.mrb[33].mxu1 }
0x1af7   :  { %v3577_v40 = vadd.f32 %v6991_v38, %v3569_v35 }
0x1af9   :  { %5953 = vtanh.f32 %v3577_v40  ;;  %v4990_v24 = vmul.f32 -1.442695, %v3577_v40 }
0x1afb   :  { %5955 = vpow2.f32 %v4990_v24 }
0x1b03   :  { %v5954_v21 = vpop.eup %5953 }
0x1b04   :  { %3587 = vrot.lane.b32.xlu0 %v5954_v21, %s6286_s11 }
0x1b05   :  { %v5956_v34 = vpop.eup %5955 }
0x1b06   :  { %v3581_v8 = vadd.f32 1.0, %v5956_v34 }
0x1b08   :  { %5957 = vrcp.f32 %v3581_v8 }
0x1b12   :  { %v5958_v26 = vpop.eup %5957 }
0x1b13   :  { %v3585_v12 = vmul.f32 %v5958_v26, %v7132_v37 }
0x1b76   :  { %v3588_v14 = vpop.permute.xlu0 %3587 }
0x1b77   :  { %v3590_v5 = vmul.f32 %v5958_v26, %v3588_v14 }
0x1b79   :  { %3592 = vrot.lane.b32.xlu1 %v3590_v5, %s6296_s26 }
0x1beb   :  { %v3593_v36 = vpop.permute.xlu1 %3592 }
0x1bec   :  { %v7277_v17 = vadd.f32 %v3593_v36, %v3585_v12 }
0x1bee   :  { %5959 = vtanh.f32 %v7277_v17 }
0x1bf8   :  { %v5960_v38 = vpop.eup %5959 }
0x1bf9   :  { %3598 = vrot.lane.b32.xlu0 %v5960_v38, %s6286_s11 }
0x1c6b   :  { %v3599_v49 = vpop.permute.xlu0 %3598 }
0x1c6c   :  { %v3601_v9 = vmul.f32 %v5958_v26, %v3599_v49 }
0x1c6e   :  { %3603 = vrot.lane.b32.xlu1 %v3601_v9, %s6296_s26 }
0x1ce0   :  { %v7282_v39 = vpop.permute.xlu1 %3603 }
0x1ce1   :  { %3607 = vst.msk [vmem:[#allocation2 + $0x10] sm:$0xf] %vm179_vm3, %v7282_v39  ;;  %5538 = vmatmul.mubr.msk.f32.vlgmr.msra.gmra.mrb[28].mxu0 %vm205_vm2, %v7282_v39  ;;  %v3700_v37 = vmul.f32 %v3694_v43, %v7282_v39  ;;  %v3699_v23 = vmul.f32 %v3693_v62, %v7282_v39  ;;  %v3701_v57 = vmul.f32 %v3695_v46, %v7282_v39 }
0x1ce2   :  { %5831 = vmatpush3.bf16.msra.mxu0 %v7022_v27  ;;  %5559 = vmatprep.mubr.msk.f32.mxu0 %vm6294_vm0, %v6295_v1  ;;  %v3702_v27 = vmul.f32 %v3696_v28, %v7282_v39  ;;  %v3704_v63 = vmul.f32 %v3698_v58, %v7282_v39 }
0x1ce3   :  { %5832 = vmatprep.subr.bf16.mxu0 %v6293_v0  ;;  %v3708_v52 = vsel %vm179_vm3, %v3700_v37, 0.0  ;;  %v3705_v55 = vsel %vm179_vm3, %v3699_v23, 0.0  ;;  %v3711_v61 = vsel %vm179_vm3, %v3701_v57, 0.0 }
0x1ce4   :  { %3709 = vadd.xlane.f32.xlu1 %v3708_v52  ;;  %3706 = vadd.xlane.f32.xlu0 %v3705_v55  ;;  %v3714_v20 = vsel %vm179_vm3, %v3702_v27, 0.0 }
0x1ce6   :  { %5834 = vmatpush3.bf16.msra.mxu0 %v7033_v54  ;;  %v3720_v54 = vsel %vm179_vm3, %v3704_v63, 0.0 }
0x1ce7   :  { %5841 = vmatprep.subr.bf16.mxu0 %v6293_v0 }
0x1ce8   :  { %3712 = vadd.xlane.f32.xlu0 %v3711_v61 }
0x1ce9   :  { %5560 = vmatmul.mubr.msk.f32.vlgmr.msra.gmra.mrb[30].mxu0 %vm205_vm2, %v7282_v39 }
0x1cea   :  { %5581 = vmatprep.mubr.msk.f32.mxu0 %vm6294_vm0, %v6295_v1 }
0x1cec   :  { %3715 = vadd.xlane.f32.xlu0 %v3714_v20 }
0x1cf0   :  { %3721 = vadd.xlane.f32.xlu0 %v3720_v54 }
0x1d71   :  { %v3710_v2 = vpop.xlane.xlu1 %3709  ;;  %v3707_v19 = vpop.xlane.xlu0 %3706 }
0x1d72   :  { %v3725_v16 = vadd.f32 %v3710_v2, %v6723_v32  ;;  %v3724_v21 = vadd.f32 %v3707_v19, %v6719_v30 }
0x1d74   :  { %3740 = vperm.xlu0 %5903, %v3725_v16  }
0x1d75   :  { %v3713_v40 = vpop.xlane.xlu0 %3712 }
0x1d76   :  { %v3726_v34 = vadd.f32 %v3713_v40, %v6739_v51 }
0x1d79   :  { %v3716_v24 = vpop.xlane.xlu0 %3715 }
0x1d7a   :  { %v3727_v8 = vadd.f32 %v3716_v24, %v6721_v31 }
0x1d7d   :  { %v3722_v26 = vpop.xlane.xlu0 %3721 }
0x1d7e   :  { %v3729_v14 = vadd.f32 %v3722_v26, %v6744_v3 }
0x1db4   :  { %v3687_v10 = vpop.f32.mrb[28].mxu0 }
0x1db5   :  { %v3688_v15 = vadd.f32 %v7167_v59, %v3687_v10  ;;  %v5539_v11 = vpop.f32.mrb[29].mxu0 }
0x1db7   :  { %3692 = vst.msk [vmem:[#allocation3 + $0x10] sm:$0xf] %vm179_vm3, %v3688_v15 }
0x1dbc   :  { %v7311_v6 = vpop.f32.mrb[30].mxu0 }
0x1dbd   :  { %v5561_v4 = vpop.f32.mrb[31].mxu0 }
0x1dbe   :  { %v3697_v25 = vld [vmem:[#allocation3 + $0x10] sm:$0xf] }
0x1dbf   :  { %v3703_v7 = vmul.f32 %v3697_v25, %v7282_v39 }
0x1dc1   :  { %v3717_v35 = vsel %vm179_vm3, %v3703_v7, 0.0 }
0x1dc2   :  { %3718 = vadd.xlane.f32.xlu1 %v3717_v35 }
0x1dd3   :  { %3737 = vperm.xlu1 %5904, %v3724_v21  }
0x1dd7   :  { %3743 = vperm.xlu1 %5904, %v3726_v34  }
0x1ddb   :  { %3746 = vperm.xlu1 %5904, %v3727_v8  }
0x1ddf   :  { %3752 = vperm.xlu1 %5904, %v3729_v14  }
0x1df3   :  { %v3741_v9 = vpop.permute.xlu0 %3740 }
0x1df4   :  { %v3761_v37 = vrot.slane %v3741_v9, %v6752_v13  ;;  %v4118_v9 = vld [vmem:[%s7531_s5] sm:$0xff] }
0x1e4f   :  { %v3719_v5 = vpop.xlane.xlu1 %3718 }
0x1e50   :  { %v3728_v12 = vadd.f32 %v3719_v5, %v6746_v44 }
0x1e52   :  { %3749 = vperm.xlu0 %5903, %v3728_v12  }
0x1e53   :  { %v3738_v36 = vpop.permute.xlu1 %3737 }
0x1e54   :  { %v3757_v43 = vrot.slane %v3738_v36, %v6752_v13 }
0x1e56   :  { %v3778_v52 = vsel %vm692_vm4, %v3761_v37, %v3757_v43  ;;  %v4119_v43 = vld [vmem:[%s7531_s5 + $0x8] sm:$0xff] }
0x1e57   :  { %v3744_v38 = vpop.permute.xlu1 %3743 }
0x1e58   :  { %v3765_v62 = vrot.slane %v3744_v38, %v6752_v13 }
0x1e5a   :  { %v3779_v57 = vsel %vm694_vm5, %v3765_v62, %v3778_v52  ;;  %v5842_v62 = vpack.c.bf16 %v4119_v43, %v4118_v9  ;;  %v4266_v9 = vld [vmem:[%s7532_s6 + $0x8] sm:$0xff]  ;;  %v4116_v43 = vld [vmem:[#allocation10] sm:$0xff] }
0x1e5b   :  { %v3747_v49 = vpop.permute.xlu1 %3746 }
0x1e5c   :  { %v3769_v23 = vrot.slane %v3747_v49, %v6752_v13  ;;  %5843 = vmatpush3.bf16.msra.mxu0 %v5842_v62  ;;  %v4117_v62 = vld [vmem:[#allocation10 + $0x8] sm:$0xff] }
0x1e5d   :  { %5844 = vmatprep.subr.bf16.mxu0 %v6293_v0 }
0x1e5e   :  { %v3780_v61 = vsel %vm696_vm6, %v3769_v23, %v3779_v57 }
0x1e5f   :  { %v3753_v46 = vpop.permute.xlu1 %3752 }
0x1e60   :  { %v3777_v27 = vrot.slane %v3753_v46, %v6752_v13  ;;  %v3805_v46 = vld [vmem:[#allocation2 + $0x4] sm:$0xf] }
0x1ed1   :  { %v3750_v55 = vpop.permute.xlu0 %3749 }
0x1ed2   :  { %v3773_v28 = vrot.slane %v3750_v55, %v6752_v13  ;;  %v3804_v55 = vld [vmem:[#allocation2] sm:$0xf] }
0x1ed4   :  { %v3781_v58 = vsel %vm698_vm7, %v3773_v28, %v3780_v61 }
0x1ed5   :  { %v3782_v20 = vsel %vm700_vm8, %v3777_v27, %v3781_v58 }
0x1ed6   :  { %v3784_v63 = vsel %vm3723_vm15, %v3782_v20, -inf  ;;  %v3807_v20 = vld [vmem:[#allocation2 + $0xc] sm:$0xf] }
0x1ed7   :  { %v3785_v54 = vsel %vm704_vm10, %v3784_v63, -inf }
0x1ed8   :  { %v3786_v2 = vrot.slane %v3785_v54, 4 }
0x1eda   :  { %v3787_v16 = vmax.f32 %v3785_v54, %v3786_v2  ;;  %v3806_v54 = vld [vmem:[#allocation2 + $0x8] sm:$0xf] }
0x1edc   :  { %v3788_v10 = vrot.slane %v3787_v16, 2 }
0x1ede   :  { %v3789_v15 = vmax.f32 %v3787_v16, %v3788_v10 }
0x1ee0   :  { %v3790_v11 = vrot.slane %v3789_v15, 1 }
0x1ee2   :  { %v3791_v4 = vmax.f32 %v3789_v15, %v3790_v11  ;;  %v3809_v11 = vld [vmem:[#allocation2 + $0x14] sm:$0xf] }
0x1ee4   :  { %v3792_v25 = vsub.f32 %v3784_v63, %v3791_v4 }
0x1ee6   :  { %v3793_v7 = vmul.f32 1.442695, %v3792_v25 }
0x1ee8   :  { %5961 = vpow2.f32 %v3793_v7 }
0x1ef2   :  { %v5962_v35 = vpop.eup %5961 }
0x1ef3   :  { %v3795_v19 = vsel %vm704_vm10, %v5962_v35, 0.0 }
0x1ef4   :  { %v3796_v40 = vrot.slane %v3795_v19, 4 }
0x1ef6   :  { %v3797_v21 = vadd.f32 %v3796_v40, %v3795_v19  ;;  %v3808_v19 = vld [vmem:[#allocation2 + $0x10] sm:$0xf] }
0x1ef8   :  { %v3798_v24 = vrot.slane %v3797_v21, 2 }
0x1efa   :  { %v3799_v34 = vadd.f32 %v3798_v24, %v3797_v21 }
0x1efc   :  { %v3800_v8 = vrot.slane %v3799_v34, 1 }
0x1efe   :  { %v3801_v26 = vadd.f32 %v3800_v8, %v3799_v34 }
0x1f00   :  { %5963 = vrcp.f32 %v3801_v26 }
0x1f0a   :  { %v5964_v14 = vpop.eup %5963 }
0x1f0b   :  { %v3803_v5 = vmul.f32 %v5964_v14, %v5962_v35 }
0x1f0d   :  { %v3820_v12 = vrot.slane %v3803_v5, %v6615_v45  ;;  %v3813_v36 = vrot.slane %v3803_v5, %v6670_v56  ;;  %v3834_v38 = vrot.slane %v3803_v5, %v6676_v60  ;;  %v3827_v49 = vrot.slane %v3803_v5, %v6635_v53 }
0x1f0e   :  { %v3848_v37 = vrot.slane %v3803_v5, %v6715_v29  ;;  %v3841_v23 = vrot.slane %v3803_v5, %v6735_v48 }
0x1f0f   :  { %3822 = vbcast.lane.b32.xlu1 %v3820_v12, 256  ;;  %3815 = vbcast.lane.b32.xlu0 %v3813_v36, 256  ;;  %v4120_v12 = vld [vmem:[%s7531_s5 + $0x10] sm:$0xff]  ;;  %v4121_v36 = vld [vmem:[%s7531_s5 + $0x18] sm:$0xff] }
0x1f13   :  { %3836 = vbcast.lane.b32.xlu1 %v3834_v38, 256  ;;  %3829 = vbcast.lane.b32.xlu0 %v3827_v49, 256  ;;  %v5845_v38 = vpack.c.bf16 %v4121_v36, %v4120_v12  ;;  %v4265_v49 = vld [vmem:[%s7532_s6] sm:$0xff]  ;;  %v4380_v12 = vld [vmem:[%s7534_s8 + $0x10] sm:$0xff] }
0x1f15   :  { %5846 = vmatpush3.bf16.msra.mxu0 %v5845_v38 }
0x1f16   :  { %5850 = vmatprep.subr.bf16.mxu0 %v6293_v0 }
0x1f17   :  { %3850 = vbcast.lane.b32.xlu1 %v3848_v37, 256  ;;  %3843 = vbcast.lane.b32.xlu0 %v3841_v23, 256 }
0x1f81   :  { %v3823_v52 = vpop.permute.xlu1 %3822  ;;  %v3816_v57 = vpop.permute.xlu0 %3815 }
0x1f82   :  { %v3853_v28 = vmul.f32 %v3823_v52, %v3805_v46  ;;  %v3852_v61 = vmul.f32 %v3816_v57, %v3804_v55  ;;  %v5851_v52 = vpack.c.bf16 %v4266_v9, %v4265_v49  ;;  %v5848_v55 = vpack.c.bf16 %v4117_v62, %v4116_v43  ;;  %v4639_v62 = vld [vmem:[#allocation15] sm:$0xff] }
0x1f84   :  { %v3859_v27 = vsel %vm179_vm3, %v3853_v28, 0.0  ;;  %v3858_v58 = vsel %vm179_vm3, %v3852_v61, 0.0  ;;  %v4267_v28 = vld [vmem:[%s7532_s6 + $0x10] sm:$0xff]  ;;  %v4268_v61 = vld [vmem:[%s7532_s6 + $0x18] sm:$0xff] }
0x1f85   :  { %v3837_v63 = vpop.permute.xlu1 %3836  ;;  %v3830_v2 = vpop.permute.xlu0 %3829  ;;  %v3860_v15 = vadd.f32 %v3859_v27, %v3858_v58  ;;  %v5854_v27 = vpack.c.bf16 %v4268_v61, %v4267_v28  ;;  %v4463_v28 = vld [vmem:[#allocation3] sm:$0xf] }
0x1f86   :  { %v3855_v16 = vmul.f32 %v3837_v63, %v3807_v20  ;;  %v3854_v10 = vmul.f32 %v3830_v2, %v3806_v54 }
0x1f88   :  { %v3861_v4 = vsel %vm179_vm3, %v3854_v10, 0.0  ;;  %v3863_v40 = vsel %vm179_vm3, %v3855_v16, 0.0 }
0x1f89   :  { %v3862_v25 = vadd.f32 %v3861_v4, %v3860_v15  ;;  %v3851_v7 = vpop.permute.xlu1 %3850  ;;  %v3844_v35 = vpop.permute.xlu0 %3843  ;;  %v5001_v15 = vld [vmem:[#allocation12] ss:$0 sm:$0xff] }
0x1f8a   :  { %v3857_v21 = vmul.f32 %v3851_v7, %v3809_v11  ;;  %v3856_v24 = vmul.f32 %v3844_v35, %v3808_v19 }
0x1f8b   :  { %v3864_v34 = vadd.f32 %v3863_v40, %v3862_v25 }
0x1f8c   :  { %v3865_v8 = vsel %vm179_vm3, %v3856_v24, 0.0  ;;  %v3867_v14 = vsel %vm179_vm3, %v3857_v21, 0.0 }
0x1f8d   :  { %v3866_v26 = vadd.f32 %v3865_v8, %v3864_v34 }
0x1f8f   :  { %v3868_v5 = vadd.f32 %v3867_v14, %v3866_v26  ;;  %v4378_v14 = vld [vmem:[%s7534_s8] sm:$0xff] }
0x1f91   :  { %5549 = vmatmul.mubr.msk.f32.vlgmr.msra.gmra.mrb[34].mxu1 %vm205_vm2, %v3868_v5  ;;  %v4379_v5 = vld [vmem:[%s7534_s8 + $0x8] sm:$0xff] }
0x1f92   :  { %5837 = vmatpush3.bf16.msra.mxu1 %v7221_v50  ;;  %5570 = vmatprep.mubr.msk.f32.mxu1 %vm6294_vm0, %v6295_v1  ;;  %v5857_v36 = vpack.c.bf16 %v4379_v5, %v4378_v14 }
0x1f93   :  { %5838 = vmatprep.subr.bf16.mxu1 %v6293_v0 }
0x1f96   :  { %5840 = vmatpush3.bf16.msra.mxu1 %v7234_v41 }
0x1f97   :  { %5847 = vmatprep.subr.bf16.mxu1 %v6293_v0 }
0x2064   :  { %v3946_v37 = vpop.f32.mrb[34].mxu1 }
0x2065   :  { %v4017_v23 = vadd.f32 %v7311_v6, %v3946_v37  ;;  %v5550_v46 = vpop.f32.mrb[35].mxu1  ;;  %v4115_v6 = vld [vmem:[#allocation4 + $0x14] sm:$0xf]  ;;  %v4640_v37 = vld [vmem:[#allocation15 + $0x8] sm:$0xff] }
0x2066   :  { %v4641_v46 = vld [vmem:[#allocation15 + $0x10] sm:$0xff] }
0x2067   :  { %v4027_v57 = vadd.f32 %v7238_v33, %v4017_v23  ;;  %v5869_v23 = vpack.c.bf16 %v4640_v37, %v4639_v62 }
0x2069   :  { %5571 = vmatmul.mubr.msk.f32.vlgmr.msra.gmra.mrb[36].mxu1 %vm205_vm2, %v4027_v57  ;;  %5582 = vmatmul.mubr.msk.f32.vlgmr.msra.gmra.mrb[32].mxu0 %vm205_vm2, %v4027_v57  ;;  %v4464_v57 = vld [vmem:[#allocation3 + $0x4] sm:$0xf] }
0x206a   :  { %5852 = vmatpush3.bf16.msra.mxu0 %v5851_v52  ;;  %5849 = vmatpush3.bf16.msra.mxu1 %v5848_v55  ;;  %v4642_v52 = vld [vmem:[#allocation15 + $0x18] sm:$0xff] }
0x206b   :  { %5588 = vmatprep.mubr.msk.f32.mxu1 %vm6294_vm0, %v6295_v1  ;;  %5853 = vmatprep.subr.bf16.mxu0 %v6293_v0 }
0x206c   :  { %5599 = vmatprep.mubr.msk.f32.mxu0 %vm6294_vm0, %v6295_v1  ;;  %5856 = vmatprep.subr.bf16.mxu1 %v6293_v0 }
0x206d   :  { %5589 = vmatmul.mubr.msk.f32.vlgmr.msra.gmra.mrb[38].mxu1 %vm279_vm1, %v4115_v6  ;;  %vm4493_vm1 = vcmp.le.s32.totalorder %v6607_v42, 5 }
0x206e   :  { %5855 = vmatpush3.bf16.msra.mxu0 %v5854_v27  ;;  %5610 = vmatprep.mubr.msk.f32.mxu1 %vm6294_vm0, %v6295_v1  ;;  %v5872_v27 = vpack.c.bf16 %v4642_v52, %v4641_v46 }
0x206f   :  { %5862 = vmatprep.subr.bf16.mxu0 %v6293_v0  ;;  %5858 = vmatpush3.bf16.msra.mxu1 %v5857_v36 }
0x2070   :  { %5859 = vmatprep.subr.bf16.mxu1 %v6293_v0 }
0x2071   :  { %5600 = vmatmul.mubr.msk.f32.vlgmr.msra.gmra.mrb[34].mxu0 %vm205_vm2, %v7282_v39 }
0x2072   :  { %5864 = vmatpush3.bf16.msra.mxu0 %v7195_v18  ;;  %5621 = vmatprep.mubr.msk.f32.mxu0 %vm6294_vm0, %v6295_v1 }
0x2073   :  { %5865 = vmatprep.subr.bf16.mxu0 %v6293_v0 }
0x2076   :  { %5867 = vmatpush3.bf16.msra.mxu0 %v7201_v47 }
0x2077   :  { %5874 = vmatprep.subr.bf16.mxu0 %v6293_v0 }
0x213c   :  { %v4108_v58 = vpop.f32.mrb[36].mxu1  ;;  %v4188_v20 = vpop.f32.mrb[32].mxu0 }
0x213d   :  { %v4109_v63 = vadd.f32 %v7269_v22, %v4108_v58  ;;  %v5572_v54 = vpop.f32.mrb[37].mxu1  ;;  %v5583_v2 = vpop.f32.mrb[33].mxu0  ;;  %v4467_v58 = vld [vmem:[#allocation3 + $0x10] sm:$0xf] }
0x213f   :  { %4113 = vst.msk [vmem:[#allocation21 + $0x10] sm:$0xf] %vm1032_vm11, %v4109_v63 }
0x2140   :  { %v4261_v39 = vpop.f32.mrb[38].mxu1 }
0x2141   :  { %v4262_v16 = vadd.f32 %v4261_v39, %v4188_v20  ;;  %v5590_v18 = vpop.f32.mrb[39].mxu1  ;;  %v4465_v20 = vld [vmem:[#allocation3 + $0x8] sm:$0xf] }
0x2144   :  { %v4335_v10 = vpop.f32.mrb[34].mxu0 }
0x2145   :  { %v4339_v11 = vadd.f32 %v4335_v10, %v4262_v16  ;;  %v5601_v4 = vpop.f32.mrb[35].mxu0  ;;  %v4466_v16 = vld [vmem:[#allocation3 + $0xc] sm:$0xf] }
0x2147   :  { %v4347_v25 = vadd.f32 %v5001_v15, %v4339_v11 }
0x2149   :  { %5965 = vtanh.f32 %v4347_v25  ;;  %v5002_v7 = vmul.f32 -1.442695, %v4347_v25 }
0x214b   :  { %5967 = vpow2.f32 %v5002_v7 }
0x2153   :  { %v5966_v47 = vpop.eup %5965 }
0x2154   :  { %4357 = vrot.lane.b32.xlu0 %v5966_v47, %s6286_s11 }
0x2155   :  { %v5968_v35 = vpop.eup %5967 }
0x2156   :  { %v4351_v19 = vadd.f32 1.0, %v5968_v35 }
0x2158   :  { %5969 = vrcp.f32 %v4351_v19 }
0x2162   :  { %v5970_v40 = vpop.eup %5969 }
0x2163   :  { %v4355_v34 = vmul.f32 %v5970_v40, %v7277_v17  ;;  %v4381_v17 = vld [vmem:[%s7534_s8 + $0x18] sm:$0xff]  ;;  %s6298_s8 = smov 96  }
0x2164   :  { %v5860_v38 = vpack.c.bf16 %v4381_v17, %v4380_v12 }
0x2166   :  { %5861 = vmatpush3.bf16.msra.mxu1 %v5860_v38 }
0x2167   :  { %5868 = vmatprep.subr.bf16.mxu1 %v6293_v0 }
0x21c6   :  { %v4358_v21 = vpop.permute.xlu0 %4357 }
0x21c7   :  { %v4360_v24 = vmul.f32 %v5970_v40, %v4358_v21 }
0x21c9   :  { %4362 = vrot.lane.b32.xlu1 %v4360_v24, %s6296_s26 }
0x223b   :  { %v4363_v8 = vpop.permute.xlu1 %4362 }
0x223c   :  { %v7406_v26 = vadd.f32 %v4363_v8, %v4355_v34 }
0x223e   :  { %5971 = vtanh.f32 %v7406_v26 }
0x2248   :  { %v5972_v49 = vpop.eup %5971 }
0x2249   :  { %4368 = vrot.lane.b32.xlu0 %v5972_v49, %s6286_s11 }
0x22bb   :  { %v4369_v9 = vpop.permute.xlu0 %4368 }
0x22bc   :  { %v4371_v43 = vmul.f32 %v5970_v40, %v4369_v9 }
0x22be   :  { %4373 = vrot.lane.b32.xlu1 %v4371_v43, %s6296_s26  ;;  %s6299_s26 = smov [#allocation22]  }
0x22bf   :  { %s4908_s13 = sshll.u32 %s6299_s26, 4  ;;  %s4909_s13 = int_to_ptr.vmem [resolvable:$true] %s4908_s13 }
0x22c0   :  { %s6197_s9 = scalar_lea.vmem %s4909_s13, 64  ;;  %p6202_p11 = scmp.lt.s32.totalorder %s4909_s13, %s4909_s13 }
0x22c1   :  { %p6198_p10 = scmp.ne.s32.totalorder %s4909_s13, %s6197_s9  ;;  %p6203_p12 = scmp.lt.s32.totalorder %s6197_s9, %s6197_s9 }
0x22c3   :  { %p6204_p13 = por %p6203_p12, %p6202_p11 }
0x22c5   :  { %p6205_p0 = pnand %p6204_p13, %p6198_p10 }
0x2330   :  { %v4374_v55 = vpop.permute.xlu1 %4373 }
0x2331   :  { %4377 = vst.msk [vmem:[#allocation2 + $0x14] sm:$0xf] %vm179_vm3, %v4374_v55  ;;  %4884 = vst.msk [vmem:[#allocation22] sm:$0xf] %vm179_vm3, %v4374_v55  ;;  %5611 = vmatmul.mubr.msk.f32.vlgmr.msra.gmra.mrb[40].mxu1 %vm205_vm2, %v4374_v55  ;;  %v4470_v61 = vmul.f32 %v4464_v57, %v4374_v55  ;;  %v4469_v6 = vmul.f32 %v4463_v28, %v4374_v55  ;;  %v4473_v2 = vmul.f32 %v4467_v58, %v4374_v55 }
0x2332   :  { %5870 = vmatpush3.bf16.msra.mxu1 %v5869_v23  ;;  %5632 = vmatprep.mubr.msk.f32.mxu1 %vm6294_vm0, %v6295_v1  ;;  %v4471_v39 = vmul.f32 %v4465_v20, %v4374_v55  ;;  %v4472_v15 = vmul.f32 %v4466_v16, %v4374_v55 }
0x2333   :  { %5871 = vmatprep.subr.bf16.mxu1 %v6293_v0  ;;  %v4478_v63 = vsel %vm179_vm3, %v4470_v61, 0.0  ;;  %v4475_v54 = vsel %vm179_vm3, %v4469_v6, 0.0  ;;  %v4487_v18 = vsel %vm179_vm3, %v4473_v2, 0.0 }
0x2334   :  { %4479 = vadd.xlane.f32.xlu1 %v4478_v63  ;;  %4476 = vadd.xlane.f32.xlu0 %v4475_v54  ;;  %v4481_v10 = vsel %vm179_vm3, %v4471_v39, 0.0  ;;  %v4484_v11 = vsel %vm179_vm3, %v4472_v15, 0.0 }
0x2336   :  { %5873 = vmatpush3.bf16.msra.mxu1 %v5872_v27 }
0x2338   :  { %4488 = vadd.xlane.f32.xlu1 %v4487_v18  ;;  %4482 = vadd.xlane.f32.xlu0 %v4481_v10 }
0x2339   :  { %5633 = vmatmul.mubr.msk.f32.vlgmr.msra.gmra.mrb[42].mxu1 %vm205_vm2, %v4374_v55 }
0x233c   :  { %4485 = vadd.xlane.f32.xlu0 %v4484_v11 }
0x23c1   :  { %v4477_v4 = vpop.xlane.xlu0 %4476 }
0x23c2   :  { %v4494_v25 = vadd.f32 %v4477_v4, %v6719_v30 }
0x23c4   :  { %4507 = vperm.xlu1 %5904, %v4494_v25  }
0x23c5   :  { %v4483_v47 = vpop.xlane.xlu0 %4482 }
0x23c6   :  { %v4496_v7 = vadd.f32 %v4483_v47, %v6739_v51  ;;  %v4480_v51 = vpop.xlane.xlu1 %4479 }
0x23c7   :  { %v4495_v12 = vadd.f32 %v4480_v51, %v6723_v32 }
0x23c8   :  { %4513 = vperm.xlu1 %5904, %v4496_v7  }
0x23c9   :  { %v4486_v35 = vpop.xlane.xlu0 %4485 }
0x23ca   :  { %v4497_v19 = vadd.f32 %v4486_v35, %v6721_v31  ;;  %v4489_v36 = vpop.xlane.xlu1 %4488 }
0x23cb   :  { %v4498_v31 = vadd.f32 %v4489_v36, %v6746_v44 }
0x23cc   :  { %4516 = vperm.xlu1 %5904, %v4497_v19  }
0x2404   :  { %v4457_v40 = vpop.f32.mrb[40].mxu1 }
0x2405   :  { %v4458_v21 = vadd.f32 %v7167_v59, %v4457_v40  ;;  %v5612_v24 = vpop.f32.mrb[41].mxu1 }
0x2407   :  { %4462 = vst.msk [vmem:[#allocation3 + $0x14] sm:$0xf] %vm179_vm3, %v4458_v21 }
0x240c   :  { %v7442_v34 = vpop.f32.mrb[42].mxu1 }
0x240d   :  { %v5634_v8 = vpop.f32.mrb[43].mxu1 }
0x240e   :  { %v4468_v14 = vld [vmem:[#allocation3 + $0x14] sm:$0xf] }
0x240f   :  { %v4474_v30 = vmul.f32 %v4468_v14, %v4374_v55 }
0x2411   :  { %v4490_v5 = vsel %vm179_vm3, %v4474_v30, 0.0 }
0x2412   :  { %4491 = vadd.xlane.f32.xlu0 %v4490_v5 }
0x2428   :  { %4510 = vperm.xlu0 %5903, %v4495_v12  }
0x242c   :  { %4519 = vperm.xlu0 %5903, %v4498_v31   ;;  %v4577_v31 = vld [vmem:[#allocation2 + $0xc] sm:$0xf] }
0x2443   :  { %v4508_v38 = vpop.permute.xlu1 %4507 }
0x2444   :  { %v4527_v62 = vrot.slane %v4508_v38, %v6752_v13 }
0x2447   :  { %v4514_v9 = vpop.permute.xlu1 %4513 }
0x2448   :  { %v4535_v32 = vrot.slane %v4514_v9, %v6752_v13 }
0x244b   :  { %v4517_v23 = vpop.permute.xlu1 %4516 }
0x244c   :  { %v4539_v52 = vrot.slane %v4517_v23, %v6752_v13 }
0x249f   :  { %v4492_v59 = vpop.xlane.xlu0 %4491 }
0x24a0   :  { %v4499_v17 = vadd.f32 %v4492_v59, %v6744_v3 }
0x24a2   :  { %4522 = vperm.xlu1 %5904, %v4499_v17  }
0x24a7   :  { %v4511_v49 = vpop.permute.xlu0 %4510 }
0x24a8   :  { %v4531_v43 = vrot.slane %v4511_v49, %v6752_v13 }
0x24aa   :  { %v4548_v37 = vsel %vm692_vm4, %v4531_v43, %v4527_v62  ;;  %v4579_v43 = vld [vmem:[#allocation2 + $0x14] sm:$0xf] }
0x24ab   :  { %v4520_v46 = vpop.permute.xlu0 %4519  ;;  %v4549_v44 = vsel %vm694_vm5, %v4535_v32, %v4548_v37  ;;  %v4578_v37 = vld [vmem:[#allocation2 + $0x10] sm:$0xf] }
0x24ac   :  { %v4543_v3 = vrot.slane %v4520_v46, %v6752_v13  ;;  %v4550_v55 = vsel %vm696_vm6, %v4539_v52, %v4549_v44 }
0x24ae   :  { %v4551_v61 = vsel %vm698_vm7, %v4543_v3, %v4550_v55 }
0x2521   :  { %v4523_v57 = vpop.permute.xlu1 %4522 }
0x2522   :  { %v4547_v28 = vrot.slane %v4523_v57, %v6752_v13 }
0x2524   :  { %v4552_v6 = vsel %vm700_vm8, %v4547_v28, %v4551_v61 }
0x2525   :  { %v4554_v27 = vsel %vm4493_vm1, %v4552_v6, -inf }
0x2526   :  { %v4555_v58 = vsel %vm704_vm10, %v4554_v27, -inf }
0x2527   :  { %v4556_v20 = vrot.slane %v4555_v58, 4 }
0x2529   :  { %v4557_v63 = vmax.f32 %v4555_v58, %v4556_v20 }
0x252b   :  { %v4558_v54 = vrot.slane %v4557_v63, 2 }
0x252d   :  { %v4559_v2 = vmax.f32 %v4557_v63, %v4558_v54 }
0x252f   :  { %v4560_v39 = vrot.slane %v4559_v2, 1 }
0x2531   :  { %v4561_v16 = vmax.f32 %v4559_v2, %v4560_v39 }
0x2533   :  { %v4562_v18 = vsub.f32 %v4554_v27, %v4561_v16 }
0x2535   :  { %v4563_v10 = vmul.f32 1.442695, %v4562_v18 }
0x2537   :  { %5973 = vpow2.f32 %v4563_v10 }
0x2541   :  { %v5974_v15 = vpop.eup %5973 }
0x2542   :  { %v4565_v42 = vsel %vm704_vm10, %v5974_v15, 0.0 }
0x2543   :  { %v4566_v13 = vrot.slane %v4565_v42, 4 }
0x2545   :  { %v4567_v11 = vadd.f32 %v4566_v13, %v4565_v42 }
0x2547   :  { %v4568_v4 = vrot.slane %v4567_v11, 2 }
0x2549   :  { %v4569_v25 = vadd.f32 %v4568_v4, %v4567_v11 }
0x254b   :  { %v4570_v47 = vrot.slane %v4569_v25, 1 }
0x254d   :  { %v4571_v7 = vadd.f32 %v4570_v47, %v4569_v25 }
0x254f   :  { %5975 = vrcp.f32 %v4571_v7 }
0x2559   :  { %v5976_v35 = vpop.eup %5975 }
0x255a   :  { %v4573_v19 = vmul.f32 %v5976_v35, %v5974_v15 }
0x255c   :  { %v4590_v40 = vrot.slane %v4573_v19, %v6615_v45  ;;  %v4583_v21 = vrot.slane %v4573_v19, %v6670_v56  ;;  %v4604_v24 = vrot.slane %v4573_v19, %v6676_v60  ;;  %v4597_v8 = vrot.slane %v4573_v19, %v6635_v53  ;;  %v4575_v45 = vld [vmem:[#allocation2 + $0x4] sm:$0xf]  ;;  %v4574_v56 = vld [vmem:[#allocation2] sm:$0xf] }
0x255d   :  { %v4618_v14 = vrot.slane %v4573_v19, %v6715_v29  ;;  %v4611_v30 = vrot.slane %v4573_v19, %v6735_v48  ;;  %v4576_v29 = vld [vmem:[#allocation2 + $0x8] sm:$0xf] }
0x255e   :  { %4592 = vbcast.lane.b32.xlu1 %v4590_v40, 256  ;;  %4585 = vbcast.lane.b32.xlu0 %v4583_v21, 256 }
0x2562   :  { %4606 = vbcast.lane.b32.xlu1 %v4604_v24, 256  ;;  %4599 = vbcast.lane.b32.xlu0 %v4597_v8, 256 }
0x2566   :  { %4620 = vbcast.lane.b32.xlu1 %v4618_v14, 256  ;;  %4613 = vbcast.lane.b32.xlu0 %v4611_v30, 256 }
0x256a   :  { %4886 = vrot.lane.b32.xlu0 %v7406_v26, %s6298_s8 }
0x25d0   :  { %v4593_v5 = vpop.permute.xlu1 %4592  ;;  %v4586_v51 = vpop.permute.xlu0 %4585 }
0x25d1   :  { %v4623_v12 = vmul.f32 %v4593_v5, %v4575_v45  ;;  %v4622_v36 = vmul.f32 %v4586_v51, %v4574_v56 }
0x25d3   :  { %v4629_v60 = vsel %vm179_vm3, %v4623_v12, 0.0  ;;  %v4628_v53 = vsel %vm179_vm3, %v4622_v36, 0.0 }
0x25d4   :  { %v4607_v59 = vpop.permute.xlu1 %4606  ;;  %v4600_v17 = vpop.permute.xlu0 %4599  ;;  %v4630_v49 = vadd.f32 %v4629_v60, %v4628_v53 }
0x25d5   :  { %v4625_v48 = vmul.f32 %v4607_v59, %v4577_v31  ;;  %v4624_v38 = vmul.f32 %v4600_v17, %v4576_v29 }
0x25d7   :  { %v4631_v9 = vsel %vm179_vm3, %v4624_v38, 0.0  ;;  %v4633_v23 = vsel %vm179_vm3, %v4625_v48, 0.0 }
0x25d8   :  { %v4632_v26 = vadd.f32 %v4631_v9, %v4630_v49  ;;  %v4621_v62 = vpop.permute.xlu1 %4620  ;;  %v4614_v32 = vpop.permute.xlu0 %4613 }
0x25d9   :  { %v4627_v46 = vmul.f32 %v4621_v62, %v4579_v43  ;;  %v4626_v44 = vmul.f32 %v4614_v32, %v4578_v37 }
0x25da   :  { %v4634_v52 = vadd.f32 %v4633_v23, %v4632_v26 }
0x25db   :  { %v4635_v3 = vsel %vm179_vm3, %v4626_v44, 0.0  ;;  %v4637_v28 = vsel %vm179_vm3, %v4627_v46, 0.0 }
0x25dc   :  { %v4636_v55 = vadd.f32 %v4635_v3, %v4634_v52  ;;  %v4887_v57 = vpop.permute.xlu0 %4886 }
0x25dd   :  { %4889 = vst.msk [vmem:[#allocation24] sm:$0xf] %vm179_vm3, %v4887_v57 }
0x25de   :  { %v4638_v61 = vadd.f32 %v4637_v28, %v4636_v55 }
0x25e0   :  { %5622 = vmatmul.mubr.msk.f32.vlgmr.msra.gmra.mrb[36].mxu0 %vm205_vm2, %v4638_v61 }
0x25e1   :  { %5876 = vmatpush3.bf16.msra.mxu0 %v7221_v50  ;;  %5643 = vmatprep.mubr.msk.f32.mxu0 %vm6294_vm0, %v6295_v1 }
0x25e2   :  { %5877 = vmatprep.subr.bf16.mxu0 %v6293_v0 }
0x25e5   :  { %5879 = vmatpush3.bf16.msra.mxu0 %v7234_v41 }
0x26b3   :  { %v4716_v6 = vpop.f32.mrb[36].mxu0 }
0x26b4   :  { %v4787_v27 = vadd.f32 %v7442_v34, %v4716_v6  ;;  %v5623_v58 = vpop.f32.mrb[37].mxu0 }
0x26b6   :  { %v4797_v20 = vadd.f32 %v7238_v33, %v4787_v27 }
0x26b8   :  { %5644 = vmatmul.mubr.msk.f32.vlgmr.msra.gmra.mrb[38].mxu0 %vm205_vm2, %v4797_v20 }
0x26b9   :  { %6208 = shalt.err (!%p6205_p0)
}
0x26ba   :  { %s6209_s10 = scalar_lea.hbm %s7542_s16, 64 }
0x26bb   :  { %p6210_p1 = scmp.ne.s32.totalorder %s7542_s16, %s6209_s10  ;;  %p6213_p2 = scmp.lt.u32.totalorder %s6209_s10, %s7542_s16 }
0x26bd   :  { %p6215_p3 = pnand %p6213_p2, %p6210_p1 }
0x26bf   :  { %6218 = shalt.err (!%p6215_p3)
}
0x26c0   :  { %4911 = dma.vmem_to_hbm [thread:$0]  %s4909_s13, 64, %s7542_s16, [#allocation23]  }
0x26c1   :  { %s6300_s7 = smov [#allocation24]  }
0x26c2   :  { %s4918_s5 = sshll.u32 %s6300_s7, 4  ;;  %s4919_s5 = int_to_ptr.vmem [resolvable:$true] %s4918_s5 }
0x26c3   :  { %s6219_s27 = scalar_lea.vmem %s4919_s5, 64  ;;  %p6224_p5 = scmp.lt.s32.totalorder %s4919_s5, %s4919_s5 }
0x26c4   :  { %p6220_p4 = scmp.ne.s32.totalorder %s4919_s5, %s6219_s27  ;;  %p6225_p6 = scmp.lt.s32.totalorder %s6219_s27, %s6219_s27 }
0x26c6   :  { %p6226_p7 = por %p6225_p6, %p6224_p5 }
0x26c8   :  { %p6227_p8 = pnand %p6226_p7, %p6220_p4 }
0x26ca   :  { %6230 = shalt.err (!%p6227_p8)
}
0x26cb   :  { %s6231_s6 = scalar_lea.hbm %s7543_s17, 64 }
0x26cc   :  { %p6232_p9 = scmp.ne.s32.totalorder %s7543_s17, %s6231_s6  ;;  %p6235_p10 = scmp.lt.u32.totalorder %s6231_s6, %s7543_s17 }
0x26ce   :  { %p6237_p11 = pnand %p6235_p10, %p6232_p9 }
0x26d0   :  { %6240 = shalt.err (!%p6237_p11)
}
0x26d1   :  { %4921 = dma.vmem_to_hbm [thread:$0]  %s4919_s5, 64, %s7543_s17, [#allocation23]  }
0x26d2   :  { %s6301_s1 = smov [#allocation21]  }
0x26d3   :  { %s4895_s30 = sshll.u32 %s6301_s1, 4  ;;  %s4896_s30 = int_to_ptr.vmem [resolvable:$true] %s4895_s30 }
0x26d4   :  { %s6241_s8 = scalar_lea.vmem %s4896_s30, 384  ;;  %p6246_p13 = scmp.lt.s32.totalorder %s4896_s30, %s4896_s30 }
0x26d5   :  { %p6242_p12 = scmp.ne.s32.totalorder %s4896_s30, %s6241_s8  ;;  %p6247_p0 = scmp.lt.s32.totalorder %s6241_s8, %s6241_s8 }
0x26d7   :  { %p6248_p1 = por %p6247_p0, %p6246_p13 }
0x26d9   :  { %p6249_p2 = pnand %p6248_p1, %p6242_p12 }
0x278b   :  { %v4878_v0 = vpop.f32.mrb[38].mxu0 }
0x278c   :  { %v4879_v1 = vadd.f32 %v7269_v22, %v4878_v0  ;;  %v5645_v50 = vpop.f32.mrb[39].mxu0 }
0x278e   :  { %4883 = vst.msk [vmem:[#allocation21 + $0x14] sm:$0xf] %vm1032_vm11, %v4879_v1 }
0x278f   :  { %6252 = shalt.err (!%p6249_p2)
}
0x2790   :  { %s6253_s17 = scalar_lea.hbm %s7541_s15, 384 }
0x2791   :  { %p6254_p3 = scmp.ne.s32.totalorder %s7541_s15, %s6253_s17  ;;  %p6257_p4 = scmp.lt.u32.totalorder %s6253_s17, %s7541_s15 }
0x2793   :  { %p6259_p5 = pnand %p6257_p4, %p6254_p3 }
0x2795   :  { %6262 = shalt.err (!%p6259_p5)
}
0x2796   :  { %4901 = dma.vmem_to_hbm [thread:$0]  %s4896_s30, 384, %s7541_s15, [#allocation6], %s6286_s11, %s6286_s11, %s6287_s23  }
0x2797   :  { %6275 = dma.done.wait [#allocation6], 384  }
0x2798   :  { %6276 = vsyncadd [#allocation6], 4294966912 }
0x2799   :  { %6277 = dma.done.wait [#allocation23], 128  }
0x279a   :  { %6278 = vsyncadd [#allocation23], 4294967168 }
0x279b   :  { %4931 = vsyncpa [#allocation5], 1 }
0x279c   :  { %4932 = vsyncpa [#allocation8], 1 }
0x279d   :  { %4933 = vsyncpa [#allocation11], 1 }
0x279e   :  { %4934 = vsyncpa [#allocation14], 1 }
0x279f   :  { %4935 = vsyncpa [#allocation17], 1 }
0x27a0   :  { %4936 = vsyncpa [#allocation20], 1 }
0x27a1   :  { %4937 = vsyncpa [#allocation6], 1 }
0x27a2   :  { %4938 = vsyncpa [#allocation23], 1 }

</bundles_post_ra>
